<compile_context>
chip_gen: v7x
topology: tpu7x:2x2x1
jax: 0.10.0
libtpu: 0.0.40
codegen_flags: <defaults>
</compile_context>

<pallas_src>
import math
from functools import partial

import jax
import jax.numpy as jnp
from jax import lax
from jax.experimental import pallas as pl
from jax.experimental.pallas import tpu as pltpu


# ----------------------------------------------------------------------------
# Helpers
# ----------------------------------------------------------------------------
def _round_up(n, m):
    return ((n + m - 1) // m) * m


def _pad_to(x, target, axis):
    pad = target - x.shape[axis]
    if pad <= 0:
        return x
    widths = [(0, 0)] * x.ndim
    widths[axis] = (0, pad)
    return jnp.pad(x, widths)


# ----------------------------------------------------------------------------
# Fused kernel: all transformer blocks + final linear for one batch element
# ----------------------------------------------------------------------------
def _encoder_kernel(num_blk, num_heads, head_dim, d_real, ln_eps,
                    x_ref, wqkv_ref, bqkv_ref, wo_ref, vec_ref,
                    w1_ref, b1_ref, w2_ref, wout_ref, bout_ref,
                    out_ref):
    f32 = jnp.float32
    bf16 = jnp.bfloat16
    T = x_ref.shape[1]
    Dp = x_ref.shape[2]
    nh = num_heads
    inv_d = 1.0 / float(d_real)
    scale = 1.0 / math.sqrt(head_dim)

    def layer_norm(y, gamma, beta):
        # y has zeros in padded lanes; normalize over the d_real true features.
        mu = jnp.sum(y, axis=-1, keepdims=True) * inv_d
        mask = lax.broadcasted_iota(jnp.int32, y.shape, 1) < d_real
        c = jnp.where(mask, y - mu, 0.0)
        var = jnp.sum(c * c, axis=-1, keepdims=True) * inv_d
        # gamma/beta are zero in padded lanes -> padded lanes stay zero.
        return c * lax.rsqrt(var + ln_eps) * gamma + beta

    x = x_ref[0].astype(f32)                                   # (T, Dp)

    for l in range(num_blk):                                   # static unroll
        wqkv = wqkv_ref[l]                                     # (3nh, Dp, hd) bf16
        bqkv = bqkv_ref[l]                                     # (3nh, 1, hd)  f32
        wo = wo_ref[l]                                         # (nh, hd, Dp)  bf16
        vecs = vec_ref[l]                                      # (6, Dp)       f32
        bo = vecs[0:1]
        g1 = vecs[1:2]
        be1 = vecs[2:3]
        b2 = vecs[3:4]
        g2 = vecs[4:5]
        be2 = vecs[5:6]

        # ---- fused, head-batched Q/K/V projection (one batched dot) --------
        xb = jnp.broadcast_to(x.astype(bf16)[None], (3 * nh, T, Dp))
        qkv = jnp.einsum('gtd,gdk->gtk', xb, wqkv,
                         preferred_element_type=f32) + bqkv     # (3nh, T, hd)
        q = qkv[0:nh] * scale                                   # fold 1/sqrt(hd)
        k = qkv[nh:2 * nh]
        v = qkv[2 * nh:3 * nh]

        # ---- scaled dot-product attention, all heads batched ----------------
        s = jnp.einsum('htd,hsd->hts', q.astype(bf16), k.astype(bf16),
                       preferred_element_type=f32)              # (nh, T, T)
        s = s - jnp.max(s, axis=-1, keepdims=True)
        p = jnp.exp(s)
        p = p * pl.reciprocal(jnp.sum(p, axis=-1, keepdims=True), approx=True)
        ctx = jnp.einsum('hts,hsd->htd', p.astype(bf16), v.astype(bf16),
                         preferred_element_type=f32)            # (nh, T, hd)
        attn = jnp.sum(jnp.einsum('htd,hdo->hto', ctx.astype(bf16), wo,
                                  preferred_element_type=f32),
                       axis=0) + bo                             # (T, Dp)

        # ---- residual + LayerNorm 1 -----------------------------------------
        y = layer_norm(x + attn, g1, be1)

        # ---- feed-forward (Linear -> ReLU -> Linear) -------------------------
        h1 = jnp.maximum(jnp.dot(y.astype(bf16), w1_ref[l],
                                 preferred_element_type=f32) + b1_ref[l], 0.0)
        ff = jnp.dot(h1.astype(bf16), w2_ref[l],
                     preferred_element_type=f32) + b2

        # ---- residual + LayerNorm 2 (dropout = identity in eval) -------------
        x = layer_norm(y + ff, g2, be2)

    # ---- final Linear (padded out dim -> lane-dense store) -------------------
    out_ref[0] = (jnp.dot(x.astype(bf16), wout_ref[...],
                          preferred_element_type=f32) + bout_ref[...])


# ----------------------------------------------------------------------------
# Parameter packing: pad feature dims to 128, head-major fused QKV, bf16 weights
# ----------------------------------------------------------------------------
def _pack_params(params, num_heads):
    blocks = params["blocks"]
    L = len(blocks)
    D = blocks[0]["wq"].shape[0]
    hidden = blocks[0]["wq"].shape[1]
    dff = blocks[0]["w1"].shape[1]
    assert hidden % num_heads == 0
    hd = hidden // num_heads
    Dp = _round_up(D, 128)
    dffp = _round_up(dff, 128)

    def head_major(w):                       # (D, hidden) -> (nh, Dp, hd)
        w = w.reshape(D, num_heads, hd).transpose(1, 0, 2)
        return _pad_to(w, Dp, axis=1)

    def bias_heads(b):                       # (1, hidden) -> (nh, 1, hd)
        return b.reshape(num_heads, hd)[:, None, :]

    def wo_heads(w):                         # (hidden, D) -> (nh, hd, Dp)
        return _pad_to(w.reshape(num_heads, hd, D), Dp, axis=2)

    def padvec(v):                           # (1, D) -> (Dp,)
        return _pad_to(v.reshape(-1), Dp, axis=0)

    wqkv = jnp.stack([jnp.concatenate([head_major(bp["wq"]),
                                       head_major(bp["wk"]),
                                       head_major(bp["wv"])], axis=0)
                      for bp in blocks]).astype(jnp.bfloat16)   # (L,3nh,Dp,hd)
    bqkv = jnp.stack([jnp.concatenate([bias_heads(bp["bq"]),
                                       bias_heads(bp["bk"]),
                                       bias_heads(bp["bv"])], axis=0)
                      for bp in blocks]).astype(jnp.float32)    # (L,3nh,1,hd)
    wo = jnp.stack([wo_heads(bp["wo"]) for bp in blocks]).astype(jnp.bfloat16)
    vecs = jnp.stack([jnp.stack([padvec(bp["bo"]), padvec(bp["g1"]),
                                 padvec(bp["be1"]), padvec(bp["b2"]),
                                 padvec(bp["g2"]), padvec(bp["be2"])])
                      for bp in blocks]).astype(jnp.float32)    # (L,6,Dp)
    w1 = jnp.stack([_pad_to(_pad_to(bp["w1"], Dp, 0), dffp, 1)
                    for bp in blocks]).astype(jnp.bfloat16)     # (L,Dp,dffp)
    b1 = jnp.stack([_pad_to(bp["b1"], dffp, 1)
                    for bp in blocks]).astype(jnp.float32)      # (L,1,dffp)
    w2 = jnp.stack([_pad_to(_pad_to(bp["w2"], dffp, 0), Dp, 1)
                    for bp in blocks]).astype(jnp.bfloat16)     # (L,dffp,Dp)

    out_v = params["w_out"].shape[1]
    outp = _round_up(out_v, 128)
    wout = _pad_to(_pad_to(params["w_out"], Dp, 0), outp, 1).astype(jnp.bfloat16)
    bout = _pad_to(params["b_out"], outp, 1).astype(jnp.float32)

    return dict(wqkv=wqkv, bqkv=bqkv, wo=wo, vecs=vecs, w1=w1, b1=b1, w2=w2,
                wout=wout, bout=bout, L=L, D=D, hd=hd, Dp=Dp, dffp=dffp,
                out_v=out_v, outp=outp)


# ----------------------------------------------------------------------------
# Forward: X = concat(K, V, Q); fused blocks + final linear in ONE pallas_call
# ----------------------------------------------------------------------------
@partial(jax.jit, static_argnames=("num_heads",))
def encoder_transformer2(K, V, Q, params, num_heads):
    X = jnp.concatenate([K, V, Q], axis=2).astype(jnp.float32)
    B, T, D = X.shape
    pk = _pack_params(params, num_heads)
    Dp, outp = pk["Dp"], pk["outp"]
    Xp = _pad_to(X, Dp, axis=2)                                 # (B, T, Dp)

    kernel = partial(_encoder_kernel, pk["L"], num_heads, pk["hd"], D, 1e-5)

    grid_spec = pltpu.PrefetchScalarGridSpec(
        num_scalar_prefetch=0,
        grid=(B,),
        in_specs=[
            pl.BlockSpec((1, T, Dp), lambda b: (b, 0, 0)),
            pl.BlockSpec(pk["wqkv"].shape, lambda b: (0, 0, 0, 0)),
            pl.BlockSpec(pk["bqkv"].shape, lambda b: (0, 0, 0, 0)),
            pl.BlockSpec(pk["wo"].shape, lambda b: (0, 0, 0, 0)),
            pl.BlockSpec(pk["vecs"].shape, lambda b: (0, 0, 0)),
            pl.BlockSpec(pk["w1"].shape, lambda b: (0, 0, 0)),
            pl.BlockSpec(pk["b1"].shape, lambda b: (0, 0, 0)),
            pl.BlockSpec(pk["w2"].shape, lambda b: (0, 0, 0)),
            pl.BlockSpec(pk["wout"].shape, lambda b: (0, 0)),
            pl.BlockSpec(pk["bout"].shape, lambda b: (0, 0)),
        ],
        out_specs=pl.BlockSpec((1, T, outp), lambda b: (b, 0, 0)),
    )
    out_padded = pl.pallas_call(
        kernel,
        out_shape=jax.ShapeDtypeStruct((B, T, outp), jnp.float32),
        grid_spec=grid_spec,
        compiler_params=pltpu.CompilerParams(
            dimension_semantics=("parallel",)),
    )(Xp, pk["wqkv"], pk["bqkv"], pk["wo"], pk["vecs"], pk["w1"], pk["b1"],
      pk["w2"], pk["wout"], pk["bout"])
    return out_padded[:, :, :pk["out_v"]]


# ----------------------------------------------------------------------------
# Pure-JAX f32 reference (for a loose sanity check against bf16 kernel math)
# ----------------------------------------------------------------------------
def _ln_ref(x, g, b, eps=1e-5):
    mu = jnp.mean(x, axis=-1, keepdims=True)
    var = jnp.mean((x - mu) ** 2, axis=-1, keepdims=True)
    return (x - mu) * jax.lax.rsqrt(var + eps) * g + b


def _reference_forward(K, V, Q, params, num_heads):
    X = jnp.concatenate([K, V, Q], axis=2).astype(jnp.float32)
    for bp in params["blocks"]:
        hidden = bp["wq"].shape[1]
        hd = hidden // num_heads
        q = X @ bp["wq"] + bp["bq"]
        k = X @ bp["wk"] + bp["bk"]
        v = X @ bp["wv"] + bp["bv"]
        outs = []
        for h in range(num_heads):
            lo, hi = h * hd, (h + 1) * hd
            s = jnp.einsum('btd,bsd->bts', q[..., lo:hi], k[..., lo:hi])
            p = jax.nn.softmax(s / math.sqrt(hd), axis=-1)
            outs.append(jnp.einsum('bts,bsd->btd', p, v[..., lo:hi]))
        attn = jnp.concatenate(outs, axis=-1) @ bp["wo"] + bp["bo"]
        y = _ln_ref(X + attn, bp["g1"], bp["be1"])
        ff = jnp.maximum(y @ bp["w1"] + bp["b1"], 0.0) @ bp["w2"] + bp["b2"]
        X = _ln_ref(y + ff, bp["g2"], bp["be2"])
    return X @ params["w_out"] + params["b_out"]


# ----------------------------------------------------------------------------
# Deterministic parameter init (mirrors nn.Linear / nn.LayerNorm defaults)
# ----------------------------------------------------------------------------
def _linear_params(key, fan_in, fan_out):
    kw, kb = jax.random.split(key)
    bound = 1.0 / math.sqrt(fan_in)
    W = jax.random.uniform(kw, (fan_in, fan_out), jnp.float32, -bound, bound)
    b = jax.random.uniform(kb, (1, fan_out), jnp.float32, -bound, bound)
    return W, b


def init_block_params(key, input_size, hidden_size, dim_feedforward):
    ks = jax.random.split(key, 6)
    wq, bq = _linear_params(ks[0], input_size, hidden_size)
    wk, bk = _linear_params(ks[1], input_size, hidden_size)
    wv, bv = _linear_params(ks[2], input_size, hidden_size)
    wo, bo = _linear_params(ks[3], hidden_size, input_size)
    w1, b1 = _linear_params(ks[4], input_size, dim_feedforward)
    w2, b2 = _linear_params(ks[5], dim_feedforward, input_size)
    ones = jnp.ones((1, input_size), jnp.float32)
    zeros = jnp.zeros((1, input_size), jnp.float32)
    return dict(wq=wq, bq=bq, wk=wk, bk=bk, wv=wv, bv=bv, wo=wo, bo=bo,
                g1=ones, be1=zeros, w1=w1, b1=b1, w2=w2, b2=b2,
                g2=ones, be2=zeros)


def init_params(key, input_k, input_q, input_v, hidden_size,
                dim_feedforward, num_blk):
    input_size = input_k + input_q + input_v
    keys = jax.random.split(key, num_blk + 1)
    blocks = [init_block_params(keys[i], input_size, hidden_size,
                                dim_feedforward) for i in range(num_blk)]
    w_out, b_out = _linear_params(keys[-1], input_size, input_v)
    return dict(blocks=blocks, w_out=w_out, b_out=b_out)


# ----------------------------------------------------------------------------
if __name__ == "__main__":
    B, T = 2, 8
    input_k = input_q = input_v = 8          # -> input_size = 24
    hidden_size = 32
    num_heads = 4
    dim_feedforward = 64
    num_blk = 2

    root = jax.random.PRNGKey(0)
    k_in, k_par = jax.random.split(root)
    kK, kV, kQ = jax.random.split(k_in, 3)
    K = jax.random.normal(kK, (B, T, input_k), jnp.float32)
    V = jax.random.normal(kV, (B, T, input_v), jnp.float32)
    Q = jax.random.normal(kQ, (B, T, input_q), jnp.float32)

    params = init_params(k_par, input_k, input_q, input_v,
                         hidden_size, dim_feedforward, num_blk)

    out = encoder_transformer2(K, V, Q, params, num_heads=num_heads)
    out = jax.block_until_ready(out)
    assert out.shape == (B, T, input_v), out.shape
    assert bool(jnp.all(jnp.isfinite(out)))

    # loose tolerance: kernel uses bf16 matmul inputs with f32 accumulation
    ref = _reference_forward(K, V, Q, params, num_heads)
    max_err = float(jnp.max(jnp.abs(out - ref)))
    assert max_err < 1e-1, max_err

    print("KERNEL_OK")
</pallas_src>

<mosaic_0001>
module attributes {stable_mosaic.version = 11 : i64} {
  func.func @_encoder_kernel(%arg0: i32, %arg1: memref<1x8x128xf32, #tpu.memory_space<vmem>>, %arg2: memref<2x12x128x8xbf16, #tpu.memory_space<vmem>>, %arg3: memref<2x12x1x8xf32, #tpu.memory_space<vmem>>, %arg4: memref<2x4x8x128xbf16, #tpu.memory_space<vmem>>, %arg5: memref<2x6x128xf32, #tpu.memory_space<vmem>>, %arg6: memref<2x128x128xbf16, #tpu.memory_space<vmem>>, %arg7: memref<2x1x128xf32, #tpu.memory_space<vmem>>, %arg8: memref<2x128x128xbf16, #tpu.memory_space<vmem>>, %arg9: memref<128x128xbf16, #tpu.memory_space<vmem>>, %arg10: memref<1x128xf32, #tpu.memory_space<vmem>>, %arg11: memref<1x8x128xf32, #tpu.memory_space<vmem>>) attributes {dimension_semantics = [#tpu.dimension_semantics<parallel>], iteration_bounds = array<i64: 2>, scalar_prefetch = 0 : i64, scratch_operands = 0 : i64, tpu.core_type = #tpu.core_type<tc>, window_params = [{transform_indices = @transform_0, window_bounds = array<i64: 1, 8, 128>}, {pipeline_mode = #tpu.pipeline_mode<synchronous>, transform_indices = @transform_1, window_bounds = array<i64: 2, 12, 128, 8>}, {pipeline_mode = #tpu.pipeline_mode<synchronous>, transform_indices = @transform_2, window_bounds = array<i64: 2, 12, 1, 8>}, {pipeline_mode = #tpu.pipeline_mode<synchronous>, transform_indices = @transform_3, window_bounds = array<i64: 2, 4, 8, 128>}, {pipeline_mode = #tpu.pipeline_mode<synchronous>, transform_indices = @transform_4, window_bounds = array<i64: 2, 6, 128>}, {pipeline_mode = #tpu.pipeline_mode<synchronous>, transform_indices = @transform_5, window_bounds = array<i64: 2, 128, 128>}, {pipeline_mode = #tpu.pipeline_mode<synchronous>, transform_indices = @transform_6, window_bounds = array<i64: 2, 1, 128>}, {pipeline_mode = #tpu.pipeline_mode<synchronous>, transform_indices = @transform_7, window_bounds = array<i64: 2, 128, 128>}, {pipeline_mode = #tpu.pipeline_mode<synchronous>, transform_indices = @transform_8, window_bounds = array<i64: 128, 128>}, {pipeline_mode = #tpu.pipeline_mode<synchronous>, transform_indices = @transform_9, window_bounds = array<i64: 1, 128>}, {transform_indices = @transform_10, window_bounds = array<i64: 1, 8, 128>}]} {
    %c0 = arith.constant 0 : index
    %c0_0 = arith.constant 0 : index
    %c0_1 = arith.constant 0 : index
    %0 = vector.load %arg1[%c0, %c0_0, %c0_1] : memref<1x8x128xf32, #tpu.memory_space<vmem>>, vector<1x8x128xf32>
    %1 = vector.shape_cast %0 : vector<1x8x128xf32> to vector<8x128xf32>
    %c0_2 = arith.constant 0 : index
    %c0_3 = arith.constant 0 : index
    %c0_4 = arith.constant 0 : index
    %c0_5 = arith.constant 0 : index
    %2 = vector.load %arg2[%c0_2, %c0_3, %c0_4, %c0_5] : memref<2x12x128x8xbf16, #tpu.memory_space<vmem>>, vector<1x12x128x8xbf16>
    %3 = vector.shape_cast %2 : vector<1x12x128x8xbf16> to vector<12x128x8xbf16>
    %c0_6 = arith.constant 0 : index
    %c0_7 = arith.constant 0 : index
    %c0_8 = arith.constant 0 : index
    %c0_9 = arith.constant 0 : index
    %4 = vector.load %arg3[%c0_6, %c0_7, %c0_8, %c0_9] : memref<2x12x1x8xf32, #tpu.memory_space<vmem>>, vector<1x12x1x8xf32>
    %5 = vector.shape_cast %4 : vector<1x12x1x8xf32> to vector<12x1x8xf32>
    %c0_10 = arith.constant 0 : index
    %c0_11 = arith.constant 0 : index
    %c0_12 = arith.constant 0 : index
    %c0_13 = arith.constant 0 : index
    %6 = vector.load %arg4[%c0_10, %c0_11, %c0_12, %c0_13] : memref<2x4x8x128xbf16, #tpu.memory_space<vmem>>, vector<1x4x8x128xbf16>
    %7 = vector.shape_cast %6 : vector<1x4x8x128xbf16> to vector<4x8x128xbf16>
    %c0_14 = arith.constant 0 : index
    %c0_15 = arith.constant 0 : index
    %c0_16 = arith.constant 0 : index
    %8 = vector.load %arg5[%c0_14, %c0_15, %c0_16] : memref<2x6x128xf32, #tpu.memory_space<vmem>>, vector<1x6x128xf32>
    %9 = vector.shape_cast %8 : vector<1x6x128xf32> to vector<6x128xf32>
    %10 = vector.extract_strided_slice %9 {offsets = [0, 0], sizes = [1, 128], strides = [1, 1]} : vector<6x128xf32> to vector<1x128xf32>
    %11 = vector.extract_strided_slice %9 {offsets = [1, 0], sizes = [1, 128], strides = [1, 1]} : vector<6x128xf32> to vector<1x128xf32>
    %12 = vector.extract_strided_slice %9 {offsets = [2, 0], sizes = [1, 128], strides = [1, 1]} : vector<6x128xf32> to vector<1x128xf32>
    %13 = vector.extract_strided_slice %9 {offsets = [3, 0], sizes = [1, 128], strides = [1, 1]} : vector<6x128xf32> to vector<1x128xf32>
    %14 = vector.extract_strided_slice %9 {offsets = [4, 0], sizes = [1, 128], strides = [1, 1]} : vector<6x128xf32> to vector<1x128xf32>
    %15 = vector.extract_strided_slice %9 {offsets = [5, 0], sizes = [1, 128], strides = [1, 1]} : vector<6x128xf32> to vector<1x128xf32>
    %16 = arith.truncf %1 : vector<8x128xf32> to vector<8x128xbf16>
    %17 = vector.shape_cast %16 : vector<8x128xbf16> to vector<1x8x128xbf16>
    %18 = vector.shape_cast %17 : vector<1x8x128xbf16> to vector<1x8x128xbf16>
    %19 = vector.broadcast %18 : vector<1x8x128xbf16> to vector<12x8x128xbf16>
    "tpu.trace_start"() <{level = 10 : i32, message = "gtd,gdk->gtk"}> : () -> ()
    %cst = arith.constant dense<0.000000e+00> : vector<12x8x8xf32>
    %20 = tpu.matmul %19, %3, %cst {dimension_numbers = #tpu.dot_dimension_numbers<[2], [1], [1], [2], [0, 0, 0, 1, 1, 2], [0], [0]>} : vector<12x8x128xbf16>, vector<12x128x8xbf16>, vector<12x8x8xf32> -> vector<12x8x8xf32>
    "tpu.trace_stop"() : () -> ()
    %21 = vector.broadcast %5 : vector<12x1x8xf32> to vector<12x8x8xf32>
    %22 = arith.addf %20, %21 : vector<12x8x8xf32>
    %23 = vector.extract_strided_slice %22 {offsets = [0, 0, 0], sizes = [4, 8, 8], strides = [1, 1, 1]} : vector<12x8x8xf32> to vector<4x8x8xf32>
    %cst_17 = arith.constant 0.353553385 : f32
    %24 = vector.broadcast %cst_17 : f32 to vector<4x8x8xf32>
    %25 = arith.mulf %23, %24 : vector<4x8x8xf32>
    %26 = vector.extract_strided_slice %22 {offsets = [4, 0, 0], sizes = [4, 8, 8], strides = [1, 1, 1]} : vector<12x8x8xf32> to vector<4x8x8xf32>
    %27 = vector.extract_strided_slice %22 {offsets = [8, 0, 0], sizes = [4, 8, 8], strides = [1, 1, 1]} : vector<12x8x8xf32> to vector<4x8x8xf32>
    %28 = arith.truncf %25 : vector<4x8x8xf32> to vector<4x8x8xbf16>
    %29 = arith.truncf %26 : vector<4x8x8xf32> to vector<4x8x8xbf16>
    "tpu.trace_start"() <{level = 10 : i32, message = "htd,hsd->hts"}> : () -> ()
    %cst_18 = arith.constant dense<0.000000e+00> : vector<4x8x8xf32>
    %30 = tpu.matmul %28, %29, %cst_18 {dimension_numbers = #tpu.dot_dimension_numbers<[2], [2], [1], [1], [0, 0, 0, 1, 1, 1], [0], [0]>} : vector<4x8x8xbf16>, vector<4x8x8xbf16>, vector<4x8x8xf32> -> vector<4x8x8xf32>
    "tpu.trace_stop"() : () -> ()
    %cst_19 = arith.constant dense<0xFF800000> : vector<4x8xf32>
    %31 = vector.multi_reduction <maximumf>, %30, %cst_19 [2] : vector<4x8x8xf32> to vector<4x8xf32>
    %32 = vector.shape_cast %31 : vector<4x8xf32> to vector<4x8x1xf32>
    %33 = vector.broadcast %32 : vector<4x8x1xf32> to vector<4x8x8xf32>
    %34 = arith.subf %30, %33 : vector<4x8x8xf32>
    %35 = math.exp %34 : vector<4x8x8xf32>
    %cst_20 = arith.constant dense<0.000000e+00> : vector<4x8xf32>
    %36 = vector.multi_reduction <add>, %35, %cst_20 [2] : vector<4x8x8xf32> to vector<4x8xf32>
    %37 = vector.shape_cast %36 : vector<4x8xf32> to vector<4x8x1xf32>
    %38 = tpu.reciprocal %37 {approx = true} : vector<4x8x1xf32> -> vector<4x8x1xf32>
    %39 = vector.broadcast %38 : vector<4x8x1xf32> to vector<4x8x8xf32>
    %40 = arith.mulf %35, %39 : vector<4x8x8xf32>
    %41 = arith.truncf %40 : vector<4x8x8xf32> to vector<4x8x8xbf16>
    %42 = arith.truncf %27 : vector<4x8x8xf32> to vector<4x8x8xbf16>
    "tpu.trace_start"() <{level = 10 : i32, message = "hts,hsd->htd"}> : () -> ()
    %cst_21 = arith.constant dense<0.000000e+00> : vector<4x8x8xf32>
    %43 = tpu.matmul %41, %42, %cst_21 {dimension_numbers = #tpu.dot_dimension_numbers<[2], [1], [1], [2], [0, 0, 0, 1, 1, 2], [0], [0]>} : vector<4x8x8xbf16>, vector<4x8x8xbf16>, vector<4x8x8xf32> -> vector<4x8x8xf32>
    "tpu.trace_stop"() : () -> ()
    %44 = arith.truncf %43 : vector<4x8x8xf32> to vector<4x8x8xbf16>
    "tpu.trace_start"() <{level = 10 : i32, message = "htd,hdo->hto"}> : () -> ()
    %cst_22 = arith.constant dense<0.000000e+00> : vector<4x8x128xf32>
    %45 = tpu.matmul %44, %7, %cst_22 {dimension_numbers = #tpu.dot_dimension_numbers<[2], [1], [1], [2], [0, 0, 0, 1, 1, 2], [0], [0]>} : vector<4x8x8xbf16>, vector<4x8x128xbf16>, vector<4x8x128xf32> -> vector<4x8x128xf32>
    "tpu.trace_stop"() : () -> ()
    %cst_23 = arith.constant dense<0.000000e+00> : vector<8x128xf32>
    %46 = vector.multi_reduction <add>, %45, %cst_23 [0] : vector<4x8x128xf32> to vector<8x128xf32>
    %47 = vector.broadcast %10 : vector<1x128xf32> to vector<8x128xf32>
    %48 = arith.addf %46, %47 : vector<8x128xf32>
    %49 = arith.addf %1, %48 : vector<8x128xf32>
    %cst_24 = arith.constant dense<0.000000e+00> : vector<8xf32>
    %50 = vector.multi_reduction <add>, %49, %cst_24 [1] : vector<8x128xf32> to vector<8xf32>
    %51 = vector.shape_cast %50 : vector<8xf32> to vector<8x1xf32>
    %cst_25 = arith.constant 0.0416666679 : f32
    %52 = vector.broadcast %cst_25 : f32 to vector<8x1xf32>
    %53 = arith.mulf %51, %52 : vector<8x1xf32>
    %54 = tpu.iota {dimensions = array<i32: 1>} : vector<8x128xi32>
    %c24_i32 = arith.constant 24 : i32
    %55 = vector.broadcast %c24_i32 : i32 to vector<8x128xi32>
    %56 = arith.cmpi slt, %54, %55 : vector<8x128xi32>
    %57 = vector.broadcast %53 : vector<8x1xf32> to vector<8x128xf32>
    %58 = arith.subf %49, %57 : vector<8x128xf32>
    %cst_26 = arith.constant 0.000000e+00 : f32
    %59 = vector.broadcast %cst_26 : f32 to vector<8x128xf32>
    %60 = arith.select %56, %58, %59 : vector<8x128xi1>, vector<8x128xf32>
    %61 = arith.mulf %60, %60 : vector<8x128xf32>
    %cst_27 = arith.constant dense<0.000000e+00> : vector<8xf32>
    %62 = vector.multi_reduction <add>, %61, %cst_27 [1] : vector<8x128xf32> to vector<8xf32>
    %63 = vector.shape_cast %62 : vector<8xf32> to vector<8x1xf32>
    %cst_28 = arith.constant 0.0416666679 : f32
    %64 = vector.broadcast %cst_28 : f32 to vector<8x1xf32>
    %65 = arith.mulf %63, %64 : vector<8x1xf32>
    %cst_29 = arith.constant 9.99999974E-6 : f32
    %66 = vector.broadcast %cst_29 : f32 to vector<8x1xf32>
    %67 = arith.addf %65, %66 : vector<8x1xf32>
    %68 = math.rsqrt %67 : vector<8x1xf32>
    %69 = vector.broadcast %68 : vector<8x1xf32> to vector<8x128xf32>
    %70 = arith.mulf %60, %69 : vector<8x128xf32>
    %71 = vector.broadcast %11 : vector<1x128xf32> to vector<8x128xf32>
    %72 = arith.mulf %70, %71 : vector<8x128xf32>
    %73 = vector.broadcast %12 : vector<1x128xf32> to vector<8x128xf32>
    %74 = arith.addf %72, %73 : vector<8x128xf32>
    %75 = arith.truncf %74 : vector<8x128xf32> to vector<8x128xbf16>
    %c0_30 = arith.constant 0 : index
    %c0_31 = arith.constant 0 : index
    %c0_32 = arith.constant 0 : index
    %76 = vector.load %arg6[%c0_30, %c0_31, %c0_32] : memref<2x128x128xbf16, #tpu.memory_space<vmem>>, vector<1x128x128xbf16>
    %77 = vector.shape_cast %76 : vector<1x128x128xbf16> to vector<128x128xbf16>
    %cst_33 = arith.constant dense<0.000000e+00> : vector<8x128xf32>
    %78 = tpu.matmul %75, %77, %cst_33 {dimension_numbers = #tpu.dot_dimension_numbers<[1], [0], [0], [1], [0, 0, 1, 1], [], []>} : vector<8x128xbf16>, vector<128x128xbf16>, vector<8x128xf32> -> vector<8x128xf32>
    %c0_34 = arith.constant 0 : index
    %c0_35 = arith.constant 0 : index
    %c0_36 = arith.constant 0 : index
    %79 = vector.load %arg7[%c0_34, %c0_35, %c0_36] : memref<2x1x128xf32, #tpu.memory_space<vmem>>, vector<1x1x128xf32>
    %80 = vector.shape_cast %79 : vector<1x1x128xf32> to vector<1x128xf32>
    %81 = vector.broadcast %80 : vector<1x128xf32> to vector<8x128xf32>
    %82 = arith.addf %78, %81 : vector<8x128xf32>
    %cst_37 = arith.constant 0.000000e+00 : f32
    %83 = vector.broadcast %cst_37 : f32 to vector<8x128xf32>
    %84 = arith.maximumf %82, %83 : vector<8x128xf32>
    %85 = arith.truncf %84 : vector<8x128xf32> to vector<8x128xbf16>
    %c0_38 = arith.constant 0 : index
    %c0_39 = arith.constant 0 : index
    %c0_40 = arith.constant 0 : index
    %86 = vector.load %arg8[%c0_38, %c0_39, %c0_40] : memref<2x128x128xbf16, #tpu.memory_space<vmem>>, vector<1x128x128xbf16>
    %87 = vector.shape_cast %86 : vector<1x128x128xbf16> to vector<128x128xbf16>
    %cst_41 = arith.constant dense<0.000000e+00> : vector<8x128xf32>
    %88 = tpu.matmul %85, %87, %cst_41 {dimension_numbers = #tpu.dot_dimension_numbers<[1], [0], [0], [1], [0, 0, 1, 1], [], []>} : vector<8x128xbf16>, vector<128x128xbf16>, vector<8x128xf32> -> vector<8x128xf32>
    %89 = vector.broadcast %13 : vector<1x128xf32> to vector<8x128xf32>
    %90 = arith.addf %88, %89 : vector<8x128xf32>
    %91 = arith.addf %74, %90 : vector<8x128xf32>
    %cst_42 = arith.constant dense<0.000000e+00> : vector<8xf32>
    %92 = vector.multi_reduction <add>, %91, %cst_42 [1] : vector<8x128xf32> to vector<8xf32>
    %93 = vector.shape_cast %92 : vector<8xf32> to vector<8x1xf32>
    %cst_43 = arith.constant 0.0416666679 : f32
    %94 = vector.broadcast %cst_43 : f32 to vector<8x1xf32>
    %95 = arith.mulf %93, %94 : vector<8x1xf32>
    %96 = tpu.iota {dimensions = array<i32: 1>} : vector<8x128xi32>
    %c24_i32_44 = arith.constant 24 : i32
    %97 = vector.broadcast %c24_i32_44 : i32 to vector<8x128xi32>
    %98 = arith.cmpi slt, %96, %97 : vector<8x128xi32>
    %99 = vector.broadcast %95 : vector<8x1xf32> to vector<8x128xf32>
    %100 = arith.subf %91, %99 : vector<8x128xf32>
    %cst_45 = arith.constant 0.000000e+00 : f32
    %101 = vector.broadcast %cst_45 : f32 to vector<8x128xf32>
    %102 = arith.select %98, %100, %101 : vector<8x128xi1>, vector<8x128xf32>
    %103 = arith.mulf %102, %102 : vector<8x128xf32>
    %cst_46 = arith.constant dense<0.000000e+00> : vector<8xf32>
    %104 = vector.multi_reduction <add>, %103, %cst_46 [1] : vector<8x128xf32> to vector<8xf32>
    %105 = vector.shape_cast %104 : vector<8xf32> to vector<8x1xf32>
    %cst_47 = arith.constant 0.0416666679 : f32
    %106 = vector.broadcast %cst_47 : f32 to vector<8x1xf32>
    %107 = arith.mulf %105, %106 : vector<8x1xf32>
    %cst_48 = arith.constant 9.99999974E-6 : f32
    %108 = vector.broadcast %cst_48 : f32 to vector<8x1xf32>
    %109 = arith.addf %107, %108 : vector<8x1xf32>
    %110 = math.rsqrt %109 : vector<8x1xf32>
    %111 = vector.broadcast %110 : vector<8x1xf32> to vector<8x128xf32>
    %112 = arith.mulf %102, %111 : vector<8x128xf32>
    %113 = vector.broadcast %14 : vector<1x128xf32> to vector<8x128xf32>
    %114 = arith.mulf %112, %113 : vector<8x128xf32>
    %115 = vector.broadcast %15 : vector<1x128xf32> to vector<8x128xf32>
    %116 = arith.addf %114, %115 : vector<8x128xf32>
    %c1 = arith.constant 1 : index
    %c0_49 = arith.constant 0 : index
    %c0_50 = arith.constant 0 : index
    %c0_51 = arith.constant 0 : index
    %117 = vector.load %arg2[%c1, %c0_49, %c0_50, %c0_51] : memref<2x12x128x8xbf16, #tpu.memory_space<vmem>>, vector<1x12x128x8xbf16>
    %118 = vector.shape_cast %117 : vector<1x12x128x8xbf16> to vector<12x128x8xbf16>
    %c1_52 = arith.constant 1 : index
    %c0_53 = arith.constant 0 : index
    %c0_54 = arith.constant 0 : index
    %c0_55 = arith.constant 0 : index
    %119 = vector.load %arg3[%c1_52, %c0_53, %c0_54, %c0_55] : memref<2x12x1x8xf32, #tpu.memory_space<vmem>>, vector<1x12x1x8xf32>
    %120 = vector.shape_cast %119 : vector<1x12x1x8xf32> to vector<12x1x8xf32>
    %c1_56 = arith.constant 1 : index
    %c0_57 = arith.constant 0 : index
    %c0_58 = arith.constant 0 : index
    %c0_59 = arith.constant 0 : index
    %121 = vector.load %arg4[%c1_56, %c0_57, %c0_58, %c0_59] : memref<2x4x8x128xbf16, #tpu.memory_space<vmem>>, vector<1x4x8x128xbf16>
    %122 = vector.shape_cast %121 : vector<1x4x8x128xbf16> to vector<4x8x128xbf16>
    %c1_60 = arith.constant 1 : index
    %c0_61 = arith.constant 0 : index
    %c0_62 = arith.constant 0 : index
    %123 = vector.load %arg5[%c1_60, %c0_61, %c0_62] : memref<2x6x128xf32, #tpu.memory_space<vmem>>, vector<1x6x128xf32>
    %124 = vector.shape_cast %123 : vector<1x6x128xf32> to vector<6x128xf32>
    %125 = vector.extract_strided_slice %124 {offsets = [0, 0], sizes = [1, 128], strides = [1, 1]} : vector<6x128xf32> to vector<1x128xf32>
    %126 = vector.extract_strided_slice %124 {offsets = [1, 0], sizes = [1, 128], strides = [1, 1]} : vector<6x128xf32> to vector<1x128xf32>
    %127 = vector.extract_strided_slice %124 {offsets = [2, 0], sizes = [1, 128], strides = [1, 1]} : vector<6x128xf32> to vector<1x128xf32>
    %128 = vector.extract_strided_slice %124 {offsets = [3, 0], sizes = [1, 128], strides = [1, 1]} : vector<6x128xf32> to vector<1x128xf32>
    %129 = vector.extract_strided_slice %124 {offsets = [4, 0], sizes = [1, 128], strides = [1, 1]} : vector<6x128xf32> to vector<1x128xf32>
    %130 = vector.extract_strided_slice %124 {offsets = [5, 0], sizes = [1, 128], strides = [1, 1]} : vector<6x128xf32> to vector<1x128xf32>
    %131 = arith.truncf %116 : vector<8x128xf32> to vector<8x128xbf16>
    %132 = vector.shape_cast %131 : vector<8x128xbf16> to vector<1x8x128xbf16>
    %133 = vector.shape_cast %132 : vector<1x8x128xbf16> to vector<1x8x128xbf16>
    %134 = vector.broadcast %133 : vector<1x8x128xbf16> to vector<12x8x128xbf16>
    "tpu.trace_start"() <{level = 10 : i32, message = "gtd,gdk->gtk"}> : () -> ()
    %cst_63 = arith.constant dense<0.000000e+00> : vector<12x8x8xf32>
    %135 = tpu.matmul %134, %118, %cst_63 {dimension_numbers = #tpu.dot_dimension_numbers<[2], [1], [1], [2], [0, 0, 0, 1, 1, 2], [0], [0]>} : vector<12x8x128xbf16>, vector<12x128x8xbf16>, vector<12x8x8xf32> -> vector<12x8x8xf32>
    "tpu.trace_stop"() : () -> ()
    %136 = vector.broadcast %120 : vector<12x1x8xf32> to vector<12x8x8xf32>
    %137 = arith.addf %135, %136 : vector<12x8x8xf32>
    %138 = vector.extract_strided_slice %137 {offsets = [0, 0, 0], sizes = [4, 8, 8], strides = [1, 1, 1]} : vector<12x8x8xf32> to vector<4x8x8xf32>
    %cst_64 = arith.constant 0.353553385 : f32
    %139 = vector.broadcast %cst_64 : f32 to vector<4x8x8xf32>
    %140 = arith.mulf %138, %139 : vector<4x8x8xf32>
    %141 = vector.extract_strided_slice %137 {offsets = [4, 0, 0], sizes = [4, 8, 8], strides = [1, 1, 1]} : vector<12x8x8xf32> to vector<4x8x8xf32>
    %142 = vector.extract_strided_slice %137 {offsets = [8, 0, 0], sizes = [4, 8, 8], strides = [1, 1, 1]} : vector<12x8x8xf32> to vector<4x8x8xf32>
    %143 = arith.truncf %140 : vector<4x8x8xf32> to vector<4x8x8xbf16>
    %144 = arith.truncf %141 : vector<4x8x8xf32> to vector<4x8x8xbf16>
    "tpu.trace_start"() <{level = 10 : i32, message = "htd,hsd->hts"}> : () -> ()
    %cst_65 = arith.constant dense<0.000000e+00> : vector<4x8x8xf32>
    %145 = tpu.matmul %143, %144, %cst_65 {dimension_numbers = #tpu.dot_dimension_numbers<[2], [2], [1], [1], [0, 0, 0, 1, 1, 1], [0], [0]>} : vector<4x8x8xbf16>, vector<4x8x8xbf16>, vector<4x8x8xf32> -> vector<4x8x8xf32>
    "tpu.trace_stop"() : () -> ()
    %cst_66 = arith.constant dense<0xFF800000> : vector<4x8xf32>
    %146 = vector.multi_reduction <maximumf>, %145, %cst_66 [2] : vector<4x8x8xf32> to vector<4x8xf32>
    %147 = vector.shape_cast %146 : vector<4x8xf32> to vector<4x8x1xf32>
    %148 = vector.broadcast %147 : vector<4x8x1xf32> to vector<4x8x8xf32>
    %149 = arith.subf %145, %148 : vector<4x8x8xf32>
    %150 = math.exp %149 : vector<4x8x8xf32>
    %cst_67 = arith.constant dense<0.000000e+00> : vector<4x8xf32>
    %151 = vector.multi_reduction <add>, %150, %cst_67 [2] : vector<4x8x8xf32> to vector<4x8xf32>
    %152 = vector.shape_cast %151 : vector<4x8xf32> to vector<4x8x1xf32>
    %153 = tpu.reciprocal %152 {approx = true} : vector<4x8x1xf32> -> vector<4x8x1xf32>
    %154 = vector.broadcast %153 : vector<4x8x1xf32> to vector<4x8x8xf32>
    %155 = arith.mulf %150, %154 : vector<4x8x8xf32>
    %156 = arith.truncf %155 : vector<4x8x8xf32> to vector<4x8x8xbf16>
    %157 = arith.truncf %142 : vector<4x8x8xf32> to vector<4x8x8xbf16>
    "tpu.trace_start"() <{level = 10 : i32, message = "hts,hsd->htd"}> : () -> ()
    %cst_68 = arith.constant dense<0.000000e+00> : vector<4x8x8xf32>
    %158 = tpu.matmul %156, %157, %cst_68 {dimension_numbers = #tpu.dot_dimension_numbers<[2], [1], [1], [2], [0, 0, 0, 1, 1, 2], [0], [0]>} : vector<4x8x8xbf16>, vector<4x8x8xbf16>, vector<4x8x8xf32> -> vector<4x8x8xf32>
    "tpu.trace_stop"() : () -> ()
    %159 = arith.truncf %158 : vector<4x8x8xf32> to vector<4x8x8xbf16>
    "tpu.trace_start"() <{level = 10 : i32, message = "htd,hdo->hto"}> : () -> ()
    %cst_69 = arith.constant dense<0.000000e+00> : vector<4x8x128xf32>
    %160 = tpu.matmul %159, %122, %cst_69 {dimension_numbers = #tpu.dot_dimension_numbers<[2], [1], [1], [2], [0, 0, 0, 1, 1, 2], [0], [0]>} : vector<4x8x8xbf16>, vector<4x8x128xbf16>, vector<4x8x128xf32> -> vector<4x8x128xf32>
    "tpu.trace_stop"() : () -> ()
    %cst_70 = arith.constant dense<0.000000e+00> : vector<8x128xf32>
    %161 = vector.multi_reduction <add>, %160, %cst_70 [0] : vector<4x8x128xf32> to vector<8x128xf32>
    %162 = vector.broadcast %125 : vector<1x128xf32> to vector<8x128xf32>
    %163 = arith.addf %161, %162 : vector<8x128xf32>
    %164 = arith.addf %116, %163 : vector<8x128xf32>
    %cst_71 = arith.constant dense<0.000000e+00> : vector<8xf32>
    %165 = vector.multi_reduction <add>, %164, %cst_71 [1] : vector<8x128xf32> to vector<8xf32>
    %166 = vector.shape_cast %165 : vector<8xf32> to vector<8x1xf32>
    %cst_72 = arith.constant 0.0416666679 : f32
    %167 = vector.broadcast %cst_72 : f32 to vector<8x1xf32>
    %168 = arith.mulf %166, %167 : vector<8x1xf32>
    %169 = tpu.iota {dimensions = array<i32: 1>} : vector<8x128xi32>
    %c24_i32_73 = arith.constant 24 : i32
    %170 = vector.broadcast %c24_i32_73 : i32 to vector<8x128xi32>
    %171 = arith.cmpi slt, %169, %170 : vector<8x128xi32>
    %172 = vector.broadcast %168 : vector<8x1xf32> to vector<8x128xf32>
    %173 = arith.subf %164, %172 : vector<8x128xf32>
    %cst_74 = arith.constant 0.000000e+00 : f32
    %174 = vector.broadcast %cst_74 : f32 to vector<8x128xf32>
    %175 = arith.select %171, %173, %174 : vector<8x128xi1>, vector<8x128xf32>
    %176 = arith.mulf %175, %175 : vector<8x128xf32>
    %cst_75 = arith.constant dense<0.000000e+00> : vector<8xf32>
    %177 = vector.multi_reduction <add>, %176, %cst_75 [1] : vector<8x128xf32> to vector<8xf32>
    %178 = vector.shape_cast %177 : vector<8xf32> to vector<8x1xf32>
    %cst_76 = arith.constant 0.0416666679 : f32
    %179 = vector.broadcast %cst_76 : f32 to vector<8x1xf32>
    %180 = arith.mulf %178, %179 : vector<8x1xf32>
    %cst_77 = arith.constant 9.99999974E-6 : f32
    %181 = vector.broadcast %cst_77 : f32 to vector<8x1xf32>
    %182 = arith.addf %180, %181 : vector<8x1xf32>
    %183 = math.rsqrt %182 : vector<8x1xf32>
    %184 = vector.broadcast %183 : vector<8x1xf32> to vector<8x128xf32>
    %185 = arith.mulf %175, %184 : vector<8x128xf32>
    %186 = vector.broadcast %126 : vector<1x128xf32> to vector<8x128xf32>
    %187 = arith.mulf %185, %186 : vector<8x128xf32>
    %188 = vector.broadcast %127 : vector<1x128xf32> to vector<8x128xf32>
    %189 = arith.addf %187, %188 : vector<8x128xf32>
    %190 = arith.truncf %189 : vector<8x128xf32> to vector<8x128xbf16>
    %c1_78 = arith.constant 1 : index
    %c0_79 = arith.constant 0 : index
    %c0_80 = arith.constant 0 : index
    %191 = vector.load %arg6[%c1_78, %c0_79, %c0_80] : memref<2x128x128xbf16, #tpu.memory_space<vmem>>, vector<1x128x128xbf16>
    %192 = vector.shape_cast %191 : vector<1x128x128xbf16> to vector<128x128xbf16>
    %cst_81 = arith.constant dense<0.000000e+00> : vector<8x128xf32>
    %193 = tpu.matmul %190, %192, %cst_81 {dimension_numbers = #tpu.dot_dimension_numbers<[1], [0], [0], [1], [0, 0, 1, 1], [], []>} : vector<8x128xbf16>, vector<128x128xbf16>, vector<8x128xf32> -> vector<8x128xf32>
    %c1_82 = arith.constant 1 : index
    %c0_83 = arith.constant 0 : index
    %c0_84 = arith.constant 0 : index
    %194 = vector.load %arg7[%c1_82, %c0_83, %c0_84] : memref<2x1x128xf32, #tpu.memory_space<vmem>>, vector<1x1x128xf32>
    %195 = vector.shape_cast %194 : vector<1x1x128xf32> to vector<1x128xf32>
    %196 = vector.broadcast %195 : vector<1x128xf32> to vector<8x128xf32>
    %197 = arith.addf %193, %196 : vector<8x128xf32>
    %cst_85 = arith.constant 0.000000e+00 : f32
    %198 = vector.broadcast %cst_85 : f32 to vector<8x128xf32>
    %199 = arith.maximumf %197, %198 : vector<8x128xf32>
    %200 = arith.truncf %199 : vector<8x128xf32> to vector<8x128xbf16>
    %c1_86 = arith.constant 1 : index
    %c0_87 = arith.constant 0 : index
    %c0_88 = arith.constant 0 : index
    %201 = vector.load %arg8[%c1_86, %c0_87, %c0_88] : memref<2x128x128xbf16, #tpu.memory_space<vmem>>, vector<1x128x128xbf16>
    %202 = vector.shape_cast %201 : vector<1x128x128xbf16> to vector<128x128xbf16>
    %cst_89 = arith.constant dense<0.000000e+00> : vector<8x128xf32>
    %203 = tpu.matmul %200, %202, %cst_89 {dimension_numbers = #tpu.dot_dimension_numbers<[1], [0], [0], [1], [0, 0, 1, 1], [], []>} : vector<8x128xbf16>, vector<128x128xbf16>, vector<8x128xf32> -> vector<8x128xf32>
    %204 = vector.broadcast %128 : vector<1x128xf32> to vector<8x128xf32>
    %205 = arith.addf %203, %204 : vector<8x128xf32>
    %206 = arith.addf %189, %205 : vector<8x128xf32>
    %cst_90 = arith.constant dense<0.000000e+00> : vector<8xf32>
    %207 = vector.multi_reduction <add>, %206, %cst_90 [1] : vector<8x128xf32> to vector<8xf32>
    %208 = vector.shape_cast %207 : vector<8xf32> to vector<8x1xf32>
    %cst_91 = arith.constant 0.0416666679 : f32
    %209 = vector.broadcast %cst_91 : f32 to vector<8x1xf32>
    %210 = arith.mulf %208, %209 : vector<8x1xf32>
    %211 = tpu.iota {dimensions = array<i32: 1>} : vector<8x128xi32>
    %c24_i32_92 = arith.constant 24 : i32
    %212 = vector.broadcast %c24_i32_92 : i32 to vector<8x128xi32>
    %213 = arith.cmpi slt, %211, %212 : vector<8x128xi32>
    %214 = vector.broadcast %210 : vector<8x1xf32> to vector<8x128xf32>
    %215 = arith.subf %206, %214 : vector<8x128xf32>
    %cst_93 = arith.constant 0.000000e+00 : f32
    %216 = vector.broadcast %cst_93 : f32 to vector<8x128xf32>
    %217 = arith.select %213, %215, %216 : vector<8x128xi1>, vector<8x128xf32>
    %218 = arith.mulf %217, %217 : vector<8x128xf32>
    %cst_94 = arith.constant dense<0.000000e+00> : vector<8xf32>
    %219 = vector.multi_reduction <add>, %218, %cst_94 [1] : vector<8x128xf32> to vector<8xf32>
    %220 = vector.shape_cast %219 : vector<8xf32> to vector<8x1xf32>
    %cst_95 = arith.constant 0.0416666679 : f32
    %221 = vector.broadcast %cst_95 : f32 to vector<8x1xf32>
    %222 = arith.mulf %220, %221 : vector<8x1xf32>
    %cst_96 = arith.constant 9.99999974E-6 : f32
    %223 = vector.broadcast %cst_96 : f32 to vector<8x1xf32>
    %224 = arith.addf %222, %223 : vector<8x1xf32>
    %225 = math.rsqrt %224 : vector<8x1xf32>
    %226 = vector.broadcast %225 : vector<8x1xf32> to vector<8x128xf32>
    %227 = arith.mulf %217, %226 : vector<8x128xf32>
    %228 = vector.broadcast %129 : vector<1x128xf32> to vector<8x128xf32>
    %229 = arith.mulf %227, %228 : vector<8x128xf32>
    %230 = vector.broadcast %130 : vector<1x128xf32> to vector<8x128xf32>
    %231 = arith.addf %229, %230 : vector<8x128xf32>
    %232 = arith.truncf %231 : vector<8x128xf32> to vector<8x128xbf16>
    %c0_97 = arith.constant 0 : index
    %c0_98 = arith.constant 0 : index
    %233 = vector.load %arg9[%c0_97, %c0_98] : memref<128x128xbf16, #tpu.memory_space<vmem>>, vector<128x128xbf16>
    %cst_99 = arith.constant dense<0.000000e+00> : vector<8x128xf32>
    %234 = tpu.matmul %232, %233, %cst_99 {dimension_numbers = #tpu.dot_dimension_numbers<[1], [0], [0], [1], [0, 0, 1, 1], [], []>} : vector<8x128xbf16>, vector<128x128xbf16>, vector<8x128xf32> -> vector<8x128xf32>
    %c0_100 = arith.constant 0 : index
    %c0_101 = arith.constant 0 : index
    %235 = vector.load %arg10[%c0_100, %c0_101] : memref<1x128xf32, #tpu.memory_space<vmem>>, vector<1x128xf32>
    %236 = vector.broadcast %235 : vector<1x128xf32> to vector<8x128xf32>
    %237 = arith.addf %234, %236 : vector<8x128xf32>
    %c0_102 = arith.constant 0 : index
    %c0_103 = arith.constant 0 : index
    %c0_104 = arith.constant 0 : index
    %238 = vector.load %arg11[%c0_102, %c0_103, %c0_104] : memref<1x8x128xf32, #tpu.memory_space<vmem>>, vector<1x8x128xf32>
    %239 = vector.shape_cast %238 : vector<1x8x128xf32> to vector<8x128xf32>
    %240 = vector.shape_cast %237 : vector<8x128xf32> to vector<1x8x128xf32>
    tpu.vector_store %arg11[%c0_102, %c0_103, %c0_104], %240 {strides = array<i32>} : memref<1x8x128xf32, #tpu.memory_space<vmem>>, vector<1x8x128xf32>,
    return
  }
  func.func @transform_0(%arg0: i32) -> (i32, i32, i32) {
    %c0_i32 = arith.constant 0 : i32
    %c0_i32_0 = arith.constant 0 : i32
    %c0_i32_1 = arith.constant 0 : i32
    return %arg0, %c0_i32, %c0_i32_0 : i32, i32, i32
  }
  func.func @transform_1(%arg0: i32) -> (i32, i32, i32, i32) {
    %c0_i32 = arith.constant 0 : i32
    %c0_i32_0 = arith.constant 0 : i32
    %c0_i32_1 = arith.constant 0 : i32
    %c0_i32_2 = arith.constant 0 : i32
    %c0_i32_3 = arith.constant 0 : i32
    return %c0_i32, %c0_i32_0, %c0_i32_1, %c0_i32_2 : i32, i32, i32, i32
  }
  func.func @transform_2(%arg0: i32) -> (i32, i32, i32, i32) {
    %c0_i32 = arith.constant 0 : i32
    %c0_i32_0 = arith.constant 0 : i32
    %c0_i32_1 = arith.constant 0 : i32
    %c0_i32_2 = arith.constant 0 : i32
    %c0_i32_3 = arith.constant 0 : i32
    return %c0_i32, %c0_i32_0, %c0_i32_1, %c0_i32_2 : i32, i32, i32, i32
  }
  func.func @transform_3(%arg0: i32) -> (i32, i32, i32, i32) {
    %c0_i32 = arith.constant 0 : i32
    %c0_i32_0 = arith.constant 0 : i32
    %c0_i32_1 = arith.constant 0 : i32
    %c0_i32_2 = arith.constant 0 : i32
    %c0_i32_3 = arith.constant 0 : i32
    return %c0_i32, %c0_i32_0, %c0_i32_1, %c0_i32_2 : i32, i32, i32, i32
  }
  func.func @transform_4(%arg0: i32) -> (i32, i32, i32) {
    %c0_i32 = arith.constant 0 : i32
    %c0_i32_0 = arith.constant 0 : i32
    %c0_i32_1 = arith.constant 0 : i32
    %c0_i32_2 = arith.constant 0 : i32
    return %c0_i32, %c0_i32_0, %c0_i32_1 : i32, i32, i32
  }
  func.func @transform_5(%arg0: i32) -> (i32, i32, i32) {
    %c0_i32 = arith.constant 0 : i32
    %c0_i32_0 = arith.constant 0 : i32
    %c0_i32_1 = arith.constant 0 : i32
    %c0_i32_2 = arith.constant 0 : i32
    return %c0_i32, %c0_i32_0, %c0_i32_1 : i32, i32, i32
  }
  func.func @transform_6(%arg0: i32) -> (i32, i32, i32) {
    %c0_i32 = arith.constant 0 : i32
    %c0_i32_0 = arith.constant 0 : i32
    %c0_i32_1 = arith.constant 0 : i32
    %c0_i32_2 = arith.constant 0 : i32
    return %c0_i32, %c0_i32_0, %c0_i32_1 : i32, i32, i32
  }
  func.func @transform_7(%arg0: i32) -> (i32, i32, i32) {
    %c0_i32 = arith.constant 0 : i32
    %c0_i32_0 = arith.constant 0 : i32
    %c0_i32_1 = arith.constant 0 : i32
    %c0_i32_2 = arith.constant 0 : i32
    return %c0_i32, %c0_i32_0, %c0_i32_1 : i32, i32, i32
  }
  func.func @transform_8(%arg0: i32) -> (i32, i32) {
    %c0_i32 = arith.constant 0 : i32
    %c0_i32_0 = arith.constant 0 : i32
    %c0_i32_1 = arith.constant 0 : i32
    return %c0_i32, %c0_i32_0 : i32, i32
  }
  func.func @transform_9(%arg0: i32) -> (i32, i32) {
    %c0_i32 = arith.constant 0 : i32
    %c0_i32_0 = arith.constant 0 : i32
    %c0_i32_1 = arith.constant 0 : i32
    return %c0_i32, %c0_i32_0 : i32, i32
  }
  func.func @transform_10(%arg0: i32) -> (i32, i32, i32) {
    %c0_i32 = arith.constant 0 : i32
    %c0_i32_0 = arith.constant 0 : i32
    %c0_i32_1 = arith.constant 0 : i32
    return %arg0, %c0_i32, %c0_i32_0 : i32, i32, i32
  }
}

</mosaic_0001>

<bundles_post_ra>
// kernel: encoder_transformer2.1
= control target key start
LH: loop header
LB: loop body
LE: loop exit
PB: predicated region body
PF: predicated region fallthrough
CT: control target
= control target key end

     0   :  { %15 = vsyncpa [#allocation3], 0  ;;  %s8465_s0 = inlined_call_operand.vmem [shape: f32[2,8,128], index: 0, kind: input, shape index: {}]   ;;  %s8466_s1 = inlined_call_operand.vmem [shape: bf16[2,12,128,8], index: 1, kind: input, shape index: {}]   ;;  %s8467_s2 = inlined_call_operand.vmem [shape: f32[2,12,1,8], index: 2, kind: input, shape index: {}]   ;;  %s8468_s3 = inlined_call_operand.vmem [shape: bf16[2,4,8,128], index: 3, kind: input, shape index: {}]   ;;  %s8469_s4 = inlined_call_operand.vmem [shape: f32[2,6,128], index: 4, kind: input, shape index: {}]   ;;  %s8470_s5 = inlined_call_operand.vmem [shape: bf16[2,128,128], index: 5, kind: input, shape index: {}]   ;;  %s8471_s6 = inlined_call_operand.vmem [shape: f32[2,1,128], index: 6, kind: input, shape index: {}]   ;;  %s8472_s7 = inlined_call_operand.vmem [shape: bf16[2,128,128], index: 7, kind: input, shape index: {}]   ;;  %s8473_s8 = inlined_call_operand.vmem [shape: bf16[128,128], index: 8, kind: input, shape index: {}]   ;;  %s8474_s9 = inlined_call_operand.vmem [shape: f32[1,128], index: 9, kind: input, shape index: {}]   ;;  %s8475_s10 = inlined_call_operand.hbm [shape: f32[2,8,128], index: 10, kind: output, shape index: {}]  }
   0x1   :  { %17 = vsyncpa [#allocation3 + $0x1], 0  ;;  %s7027_s13 = smov 0   ;;  %s7029_s14 = smov 0  }
   0x2   :  { %s7031_s15 = smov 0   ;;  %s7033_s16 = smov 0  }
   0x3 LB: > { %s7048_s17 = sadd.s32 4294967295, %s6967_s16   ;;  %s5023_s18 = sadd.s32 4294967294, %s6967_s16   ;;  %s6967_s16 = sphi %s7033_s16, %s8481_s16   ;;  %s6963_s15 = sphi %s7031_s15, %s8480_s15   ;;  %s6959_s14 = sphi %s7029_s14, %s8479_s14   ;;  %s6955_s13 = sphi %s7027_s13, %s8478_s13  }
   0x4   : > { %s7052_s19 = sadd.s32 1, %s6967_s16   ;;  %s245_s20 = sadd.s32 1, %s6963_s15 }
   0x5   : > { %s242_s21 = ssub.s32 %s6967_s16, %s7052_s19  ;;  %p255_p0 = scmp.ne.s32.totalorder %s6963_s15, %s6959_s14 }
   0x6   : > { %p243_p1 = scmp.eq.s32.totalorder %s242_s21, 0  ;;  %p256_p2 = scmp.eq.s32.totalorder %s7048_s17, 1 }
   0x7   : > { %p261_p3 = scmp.ne.s32.totalorder %s6959_s14, %s6955_s13  ;;  %p262_p4 = scmp.eq.s32.totalorder %s5023_s18, 1 }
   0x8   : > { %s7063_s22 = scalar_select %p243_p1, %s6963_s15, %s245_s20  }
   0x9   : > { %p7065_p5 = por %p256_p2, %p255_p0  ;;  %p7069_p6 = por %p262_p4, %p261_p3 }
   0xa   : > { %p5026_p7 = scmp.ge.s32.totalorder %s6967_s16, 1  ;;  %p314_p8 = scmp.lt.s32.totalorder %s6967_s16, 3 }
   0xc   : > { %p315_p9 = pnand %p5026_p7, %p314_p8 }
   0xd   : > { %v6632_v0 = vld [vmem:[%s8466_s1] sm:$0xff] (!%p315_p9)   ;;  %v6969_v1 = vmov (!%p315_p9), 0.0   ;;  %v6633_v2 = vld [vmem:[%s8466_s1 + $0x8] sm:$0xff] (!%p315_p9)   ;;  %vm6970_vm0 = vmmov (!%p315_p9), 0   ;;  %v6635_v5 = vld [vmem:[%s8466_s1 + $0x10] sm:$0xff] (!%p315_p9)   ;;  %p351_p10 = scmp.lt.s32.totalorder (!%p315_p9), %s7048_s17, 1 }
   0xe   : > { %318 = sbr.rel (%p315_p9) target bundleno = 4969 (0x1369), region = 60  ;;  %5867 = vmatprep.subr.bf16.mxu0 (!%p315_p9), %v6969_v1  ;;  %5887 = vmatprep.subr.bf16.mxu1 (!%p315_p9), %v6969_v1  ;;  %v6634_v3 = vld [vmem:[%s8466_s1 + $0x40] sm:$0xff] (!%p315_p9)   ;;  %v6636_v4 = vld [vmem:[%s8466_s1 + $0x48] sm:$0xff] (!%p315_p9)   ;;  %v6638_v6 = vld [vmem:[%s8466_s1 + $0x50] sm:$0xff] (!%p315_p9)   ;;  %vm1707_vm1 = vcmask (!%p315_p9), 64512   ;;  %vm1947_vm2 = vcmask (!%p315_p9), 1043456  }
   0xf   : > { %5868 = vmatpush3.bf16.msra.mxu0 (!%p315_p9), %v6632_v0  ;;  %5883 = vmatprep.mubr.msk.bf16.mxu0 (!%p315_p9), %vm6970_vm0, %v6969_v1  ;;  %v6637_v7 = vld [vmem:[%s8466_s1 + $0x18] sm:$0xff] (!%p315_p9)   ;;  %v6639_v9 = vld [vmem:[%s8466_s1 + $0x20] sm:$0xff] (!%p315_p9)   ;;  %v6641_v11 = vld [vmem:[%s8466_s1 + $0x28] sm:$0xff] (!%p315_p9)  }
  0x10   : > { %5869 = vmatprep.subr.bf16.mxu0 (!%p315_p9), %v6969_v1  ;;  %5903 = vmatprep.mubr.msk.bf16.mxu1 (!%p315_p9), %vm6970_vm0, %v6969_v1  ;;  %v6640_v8 = vld [vmem:[%s8466_s1 + $0x58] sm:$0xff] (!%p315_p9)   ;;  %v6642_v10 = vld [vmem:[%s8466_s1 + $0x60] sm:$0xff] (!%p315_p9)   ;;  %v6644_v12 = vld [vmem:[%s8466_s1 + $0x68] sm:$0xff] (!%p315_p9)  }
  0x11   : > { %5888 = vmatpush3.bf16.msra.mxu1 (!%p315_p9), %v6634_v3  ;;  %v6643_v13 = vld [vmem:[%s8466_s1 + $0x30] sm:$0xff] (!%p315_p9)   ;;  %v6645_v15 = vld [vmem:[%s8466_s1 + $0x38] sm:$0xff] (!%p315_p9)   ;;  %v6647_v19 = vld [vmem:[%s8466_s1 + $0x80] sm:$0xff] (!%p315_p9)  }
  0x12   : > { %5889 = vmatprep.subr.bf16.mxu1 (!%p315_p9), %v6969_v1  ;;  %v6646_v14 = vld [vmem:[%s8466_s1 + $0x70] sm:$0xff] (!%p315_p9)   ;;  %v6648_v17 = vld [vmem:[%s8466_s1 + $0x78] sm:$0xff] (!%p315_p9)   ;;  %v6650_v20 = vld [vmem:[%s8466_s1 + $0xc0] sm:$0xff] (!%p315_p9)  }
  0x13   : > { %5870 = vmatpush3.bf16.msra.mxu0 (!%p315_p9), %v6633_v2  ;;  %v6649_v21 = vld [vmem:[%s8466_s1 + $0x88] sm:$0xff] (!%p315_p9)   ;;  %v6651_v23 = vld [vmem:[%s8466_s1 + $0x90] sm:$0xff] (!%p315_p9)   ;;  %v6653_v25 = vld [vmem:[%s8466_s1 + $0x98] sm:$0xff] (!%p315_p9)  }
  0x14   : > { %5871 = vmatprep.subr.bf16.mxu0 (!%p315_p9), %v6969_v1  ;;  %v6652_v22 = vld [vmem:[%s8466_s1 + $0xc8] sm:$0xff] (!%p315_p9)   ;;  %v6654_v24 = vld [vmem:[%s8466_s1 + $0xd0] sm:$0xff] (!%p315_p9)   ;;  %v6656_v26 = vld [vmem:[%s8466_s1 + $0xd8] sm:$0xff] (!%p315_p9)  }
  0x15   : > { %5890 = vmatpush3.bf16.msra.mxu1 %v6636_v4  ;;  %s352_s20 = scalar_select %p351_p10, %s7048_s17, 1  ;;  %v6655_v27 = vld [vmem:[%s8466_s1 + $0xa0] sm:$0xff]   ;;  %v6657_v29 = vld [vmem:[%s8466_s1 + $0xa8] sm:$0xff]   ;;  %v6659_v31 = vld [vmem:[%s8466_s1 + $0xb0] sm:$0xff]  }
  0x16   : > { %5891 = vmatprep.subr.bf16.mxu1 %v6969_v1  ;;  %v6658_v28 = vld [vmem:[%s8466_s1 + $0xe0] sm:$0xff]   ;;  %v6660_v30 = vld [vmem:[%s8466_s1 + $0xe8] sm:$0xff]   ;;  %v6662_v32 = vld [vmem:[%s8466_s1 + $0xf0] sm:$0xff]  }
  0x17   : > { %5872 = vmatpush3.bf16.msra.mxu0 %v6635_v5  ;;  %s5028_s28 = sshll.u32 %s352_s20, 3  ;;  %v6661_v33 = vld [vmem:[%s8466_s1 + $0xb8] sm:$0xff]   ;;  %v6663_v35 = vld [vmem:[%s8466_s1 + $0x100] sm:$0xff]   ;;  %v6665_v36 = vld [vmem:[%s8466_s1 + $0x108] sm:$0xff]   ;;  %s348_s20 = sand.u32 1, %s6959_s14  }
  0x18   : > { %5873 = vmatprep.subr.bf16.mxu0 %v6969_v1  ;;  %s7136_s18 = scalar_lea.vmem %s8465_s0, %s5028_s28  ;;  %v6664_v34 = vld [vmem:[%s8466_s1 + $0xf8] sm:$0xff]   ;;  %v6666_v37 = vld [vmem:[%s8466_s1 + $0x140] sm:$0xff]   ;;  %v6668_v38 = vld [vmem:[%s8466_s1 + $0x148] sm:$0xff]   ;;  %s5027_s26 = sshll.u32 %s348_s20, 3 }
  0x19   : > { %5892 = vmatpush3.bf16.msra.mxu1 %v6638_v6  ;;  %v356_v16 = vld [vmem:[%s7136_s18] sm:$0xff]  ;;  %v6667_v39 = vld [vmem:[%s8466_s1 + $0x110] sm:$0xff]   ;;  %v6669_v41 = vld [vmem:[%s8466_s1 + $0x118] sm:$0xff]   ;;  %s5555_s28 = sshll.u32 %s7048_s17, 7  ;;  %s350_s29 = scalar_lea.vmem [#allocation2], %s5027_s26 }
  0x1a   : > { %5893 = vmatprep.subr.bf16.mxu1 %v6969_v1  ;;  %v7150_v18 = vpack.c.bf16 %v356_v16, %v356_v16  ;;  %v6670_v40 = vld [vmem:[%s8466_s1 + $0x150] sm:$0xff]   ;;  %v6672_v42 = vld [vmem:[%s8466_s1 + $0x158] sm:$0xff]   ;;  %v6671_v43 = vld [vmem:[%s8466_s1 + $0x120] sm:$0xff]   ;;  %s4964_s30 = sshll.u32 %s350_s29, 4  ;;  %s8423_s21 = scalar_lea.hbm %s8475_s10, %s5555_s28  ;;  %s8425_s30 = int_to_ptr.vmem [resolvable:$true] %s4964_s30 }
  0x1b   : > { %5874 = vmatpush3.bf16.msra.mxu0 %v6637_v7  ;;  %v6674_v44 = vld [vmem:[%s8466_s1 + $0x160] sm:$0xff]   ;;  %v6673_v45 = vld [vmem:[%s8466_s1 + $0x128] sm:$0xff]   ;;  %v6675_v47 = vld [vmem:[%s8466_s1 + $0x130] sm:$0xff]   ;;  %s4951_s25 = scalar_lea.sflag [#allocation3], %s348_s20  ;;  %s6905_s17 = scalar_lea.vmem %s8425_s30, 128 }
  0x1c   : > { %5875 = vmatprep.subr.bf16.mxu0 %v6969_v1  ;;  %v6676_v46 = vld [vmem:[%s8466_s1 + $0x168] sm:$0xff]   ;;  %v6678_v48 = vld [vmem:[%s8466_s1 + $0x170] sm:$0xff]   ;;  %v6677_v49 = vld [vmem:[%s8466_s1 + $0x138] sm:$0xff]   ;;  %p6906_p11 = scmp.ne.s32.totalorder %s8425_s30, %s6905_s17  ;;  %s6971_s26 = smov [#allocation2]  }
  0x1d   : > { %5894 = vmatpush3.bf16.msra.mxu1 %v6640_v8  ;;  %v6680_v50 = vld [vmem:[%s8466_s1 + $0x178] sm:$0xff]   ;;  %v6679_v51 = vld [vmem:[%s8466_s1 + $0x180] sm:$0xff]   ;;  %v6681_v53 = vld [vmem:[%s8466_s1 + $0x188] sm:$0xff]  }
  0x1e   : > { %5895 = vmatprep.subr.bf16.mxu1 %v6969_v1  ;;  %v6682_v52 = vld [vmem:[%s8466_s1 + $0x1c0] sm:$0xff]   ;;  %v6684_v54 = vld [vmem:[%s8466_s1 + $0x1c8] sm:$0xff]   ;;  %v6683_v55 = vld [vmem:[%s8466_s1 + $0x190] sm:$0xff]   ;;  %p6907_p12 = pnand %p6906_p11, %p7065_p5 }
  0x1f   : > { %5876 = vmatpush3.bf16.msra.mxu0 %v6639_v9  ;;  %v6686_v56 = vld [vmem:[%s8466_s1 + $0x1d0] sm:$0xff]   ;;  %v6685_v57 = vld [vmem:[%s8466_s1 + $0x198] sm:$0xff]   ;;  %v6687_v59 = vld [vmem:[%s8466_s1 + $0x1a0] sm:$0xff]  }
  0x20   : > { %5877 = vmatprep.subr.bf16.mxu0 %v6969_v1  ;;  %v6688_v58 = vld [vmem:[%s8466_s1 + $0x1d8] sm:$0xff]   ;;  %v6690_v60 = vld [vmem:[%s8466_s1 + $0x1e0] sm:$0xff]   ;;  %v6689_v61 = vld [vmem:[%s8466_s1 + $0x1a8] sm:$0xff]   ;;  %p6908_p13 = pneg %p6907_p12 }
  0x21   : > { %5896 = vmatpush3.bf16.msra.mxu1 %v6642_v10  ;;  %v6692_v62 = vld [vmem:[%s8466_s1 + $0x1e8] sm:$0xff]   ;;  %v6691_v63 = vld [vmem:[%s8466_s1 + $0x1b0] sm:$0xff]   ;;  %v6693_v2 = vld [vmem:[%s8466_s1 + $0x1b8] sm:$0xff]  }
  0x22   : > { %5897 = vmatprep.subr.bf16.mxu1 %v6969_v1  ;;  %v6694_v0 = vld [vmem:[%s8466_s1 + $0x1f0] sm:$0xff]   ;;  %v6695_v3 = vld [vmem:[%s8466_s1 + $0x1f8] sm:$0xff]   ;;  %v6696_v4 = vld [vmem:[%s8466_s1 + $0x240] sm:$0xff]  }
  0x23   : > { %5878 = vmatpush3.bf16.msra.mxu0 %v6641_v11  ;;  %v6697_v5 = vld [vmem:[%s8466_s1 + $0x248] sm:$0xff]   ;;  %v6698_v6 = vld [vmem:[%s8466_s1 + $0x250] sm:$0xff]   ;;  %v6699_v7 = vld [vmem:[%s8466_s1 + $0x258] sm:$0xff]  }
  0x24   : > { %5879 = vmatprep.subr.bf16.mxu0 %v6969_v1  ;;  %v6700_v8 = vld [vmem:[%s8466_s1 + $0x260] sm:$0xff]   ;;  %v6701_v9 = vld [vmem:[%s8466_s1 + $0x268] sm:$0xff]   ;;  %v6702_v10 = vld [vmem:[%s8466_s1 + $0x270] sm:$0xff]  }
  0x25   : > { %5898 = vmatpush3.bf16.msra.mxu1 %v6644_v12  ;;  %v6703_v11 = vld [vmem:[%s8466_s1 + $0x278] sm:$0xff]   ;;  %v6704_v12 = vld [vmem:[%s8466_s1 + $0x2c0] sm:$0xff]  }
  0x26   : > { %5899 = vmatprep.subr.bf16.mxu1 %v6969_v1  ;;  %v6708_v16 = vld [vmem:[%s8466_s1 + $0x2e0] sm:$0xff]  }
  0x27   : > { %5880 = vmatpush3.bf16.msra.mxu0 %v6643_v13  ;;  %v6705_v13 = vld [vmem:[%s8466_s1 + $0x2c8] sm:$0xff]  }
  0x28   : > { %5881 = vmatprep.subr.bf16.mxu0 %v6969_v1 }
  0x29   : > { %5900 = vmatpush3.bf16.msra.mxu1 %v6646_v14  ;;  %v6706_v14 = vld [vmem:[%s8466_s1 + $0x2d0] sm:$0xff]  }
  0x2a   : > { %5901 = vmatprep.subr.bf16.mxu1 %v6969_v1 }
  0x2b   : > { %5882 = vmatpush3.bf16.msra.mxu0 %v6645_v15  ;;  %v6707_v15 = vld [vmem:[%s8466_s1 + $0x2d8] sm:$0xff]  }
  0x2c   : > { %5907 = vmatprep.subr.bf16.mxu0 %v6969_v1 }
  0x2d   : > { %5902 = vmatpush3.bf16.msra.mxu1 %v6648_v17  ;;  %v6709_v17 = vld [vmem:[%s8466_s1 + $0x2e8] sm:$0xff]  }
  0x2e   : > { %5884 = vmatmul.mubr.bf16.vlgmr.msra.gmra.mrb[0].mxu0 %v7150_v18  ;;  %5927 = vmatprep.subr.bf16.mxu1 %v6969_v1 }
  0x2f   : > { %5908 = vmatpush3.bf16.msra.mxu0 %v6647_v19  ;;  %5923 = vmatprep.mubr.msk.bf16.mxu0 %vm6970_vm0, %v6969_v1  ;;  %v6710_v19 = vld [vmem:[%s8466_s1 + $0x2f0] sm:$0xff]  }
  0x30   : > { %5909 = vmatprep.subr.bf16.mxu0 %v6969_v1  ;;  %5904 = vmatmul.mubr.bf16.vlgmr.msra.gmra.mrb[0].mxu1 %v7150_v18 }
  0x31   : > { %5928 = vmatpush3.bf16.msra.mxu1 %v6650_v20  ;;  %5943 = vmatprep.mubr.msk.bf16.mxu1 %vm6970_vm0, %v6969_v1  ;;  %v6711_v20 = vld [vmem:[%s8466_s1 + $0x2f8] sm:$0xff]  }
  0x32   : > { %5929 = vmatprep.subr.bf16.mxu1 %v6969_v1 }
  0x33   : > { %5910 = vmatpush3.bf16.msra.mxu0 %v6649_v21 }
  0x34   : > { %5911 = vmatprep.subr.bf16.mxu0 %v6969_v1 }
  0x35   : > { %5930 = vmatpush3.bf16.msra.mxu1 %v6652_v22 }
  0x36   : > { %5931 = vmatprep.subr.bf16.mxu1 %v6969_v1 }
  0x37   : > { %5912 = vmatpush3.bf16.msra.mxu0 %v6651_v23 }
  0x38   : > { %5913 = vmatprep.subr.bf16.mxu0 %v6969_v1 }
  0x39   : > { %5932 = vmatpush3.bf16.msra.mxu1 %v6654_v24 }
  0x3a   : > { %5933 = vmatprep.subr.bf16.mxu1 %v6969_v1 }
  0x3b   : > { %5914 = vmatpush3.bf16.msra.mxu0 %v6653_v25 }
  0x3c   : > { %5915 = vmatprep.subr.bf16.mxu0 %v6969_v1 }
  0x3d   : > { %5934 = vmatpush3.bf16.msra.mxu1 %v6656_v26 }
  0x3e   : > { %5935 = vmatprep.subr.bf16.mxu1 %v6969_v1 }
  0x3f   : > { %5916 = vmatpush3.bf16.msra.mxu0 %v6655_v27 }
  0x40   : > { %5917 = vmatprep.subr.bf16.mxu0 %v6969_v1 }
  0x41   : > { %5936 = vmatpush3.bf16.msra.mxu1 %v6658_v28 }
  0x42   : > { %5937 = vmatprep.subr.bf16.mxu1 %v6969_v1 }
  0x43   : > { %5918 = vmatpush3.bf16.msra.mxu0 %v6657_v29 }
  0x44   : > { %5919 = vmatprep.subr.bf16.mxu0 %v6969_v1 }
  0x45   : > { %5938 = vmatpush3.bf16.msra.mxu1 %v6660_v30 }
  0x46   : > { %5939 = vmatprep.subr.bf16.mxu1 %v6969_v1 }
  0x47   : > { %5920 = vmatpush3.bf16.msra.mxu0 %v6659_v31 }
  0x48   : > { %5921 = vmatprep.subr.bf16.mxu0 %v6969_v1 }
  0x49   : > { %5940 = vmatpush3.bf16.msra.mxu1 %v6662_v32 }
  0x4a   : > { %5941 = vmatprep.subr.bf16.mxu1 %v6969_v1 }
  0x4b   : > { %5922 = vmatpush3.bf16.msra.mxu0 %v6661_v33 }
  0x4c   : > { %5947 = vmatprep.subr.bf16.mxu0 %v6969_v1 }
  0x4d   : > { %5942 = vmatpush3.bf16.msra.mxu1 %v6664_v34 }
  0x4e   : > { %5924 = vmatmul.mubr.bf16.vlgmr.msra.gmra.mrb[4].mxu0 %v7150_v18  ;;  %5967 = vmatprep.subr.bf16.mxu1 %v6969_v1 }
  0x4f   : > { %5948 = vmatpush3.bf16.msra.mxu0 %v6663_v35  ;;  %5963 = vmatprep.mubr.msk.bf16.mxu0 %vm6970_vm0, %v6969_v1 }
  0x50   : > { %5949 = vmatprep.subr.bf16.mxu0 %v6969_v1  ;;  %5944 = vmatmul.mubr.bf16.vlgmr.msra.gmra.mrb[4].mxu1 %v7150_v18 }
  0x51   : > { %5968 = vmatpush3.bf16.msra.mxu1 %v6666_v37  ;;  %5983 = vmatprep.mubr.msk.bf16.mxu1 %vm6970_vm0, %v6969_v1  ;;  %v5033_v37 = vld [vmem:[%s8467_s2 + $0x4] ss:$0 sm:$0xff] }
  0x52   : > { %5969 = vmatprep.subr.bf16.mxu1 %v6969_v1 }
  0x53   : > { %5950 = vmatpush3.bf16.msra.mxu0 %v6665_v36 }
  0x54   : > { %5951 = vmatprep.subr.bf16.mxu0 %v6969_v1 }
  0x55   : > { %5970 = vmatpush3.bf16.msra.mxu1 %v6668_v38  ;;  %v5029_v38 = vld [vmem:[%s8467_s2] ss:$0 sm:$0xff] }
  0x56   : > { %5971 = vmatprep.subr.bf16.mxu1 %v6969_v1 }
  0x57   : > { %5952 = vmatpush3.bf16.msra.mxu0 %v6667_v39 }
  0x58   : > { %5953 = vmatprep.subr.bf16.mxu0 %v6969_v1 }
  0x59   : > { %5972 = vmatpush3.bf16.msra.mxu1 %v6670_v40  ;;  %v5034_v40 = vld [vmem:[%s8467_s2 + $0x5] ss:$0 sm:$0xff] }
  0x5a   : > { %5973 = vmatprep.subr.bf16.mxu1 %v6969_v1 }
  0x5b   : > { %5954 = vmatpush3.bf16.msra.mxu0 %v6669_v41 }
  0x5c   : > { %5955 = vmatprep.subr.bf16.mxu0 %v6969_v1 }
  0x5d   : > { %5974 = vmatpush3.bf16.msra.mxu1 %v6672_v42 }
  0x5e   : > { %5975 = vmatprep.subr.bf16.mxu1 %v6969_v1 }
  0x5f   : > { %5956 = vmatpush3.bf16.msra.mxu0 %v6671_v43 }
  0x60   : > { %5957 = vmatprep.subr.bf16.mxu0 %v6969_v1 }
  0x61   : > { %5976 = vmatpush3.bf16.msra.mxu1 %v6674_v44 }
  0x62   : > { %5977 = vmatprep.subr.bf16.mxu1 %v6969_v1 }
  0x63   : > { %5958 = vmatpush3.bf16.msra.mxu0 %v6673_v45 }
  0x64   : > { %5959 = vmatprep.subr.bf16.mxu0 %v6969_v1 }
  0x65   : > { %5978 = vmatpush3.bf16.msra.mxu1 %v6676_v46 }
  0x66   : > { %5979 = vmatprep.subr.bf16.mxu1 %v6969_v1 }
  0x67   : > { %5960 = vmatpush3.bf16.msra.mxu0 %v6675_v47 }
  0x68   : > { %5961 = vmatprep.subr.bf16.mxu0 %v6969_v1 }
  0x69   : > { %5980 = vmatpush3.bf16.msra.mxu1 %v6678_v48 }
  0x6a   : > { %5981 = vmatprep.subr.bf16.mxu1 %v6969_v1 }
  0x6b   : > { %5962 = vmatpush3.bf16.msra.mxu0 %v6677_v49 }
  0x6c   : > { %5987 = vmatprep.subr.bf16.mxu0 %v6969_v1 }
  0x6d   : > { %5982 = vmatpush3.bf16.msra.mxu1 %v6680_v50 }
  0x6e   : > { %5964 = vmatmul.mubr.bf16.vlgmr.msra.gmra.mrb[8].mxu0 %v7150_v18  ;;  %6007 = vmatprep.subr.bf16.mxu1 %v6969_v1 }
  0x6f   : > { %5988 = vmatpush3.bf16.msra.mxu0 %v6679_v51  ;;  %6003 = vmatprep.mubr.msk.bf16.mxu0 %vm6970_vm0, %v6969_v1 }
  0x70   : > { %5989 = vmatprep.subr.bf16.mxu0 %v6969_v1  ;;  %5984 = vmatmul.mubr.bf16.vlgmr.msra.gmra.mrb[8].mxu1 %v7150_v18 }
  0x71   : > { %6008 = vmatpush3.bf16.msra.mxu1 %v6682_v52  ;;  %6023 = vmatprep.mubr.msk.bf16.mxu1 %vm6970_vm0, %v6969_v1 }
  0x72   : > { %6009 = vmatprep.subr.bf16.mxu1 %v6969_v1 }
  0x73   : > { %5990 = vmatpush3.bf16.msra.mxu0 %v6681_v53 }
  0x74   : > { %5991 = vmatprep.subr.bf16.mxu0 %v6969_v1 }
  0x75   : > { %6010 = vmatpush3.bf16.msra.mxu1 %v6684_v54 }
  0x76   : > { %6011 = vmatprep.subr.bf16.mxu1 %v6969_v1 }
  0x77   : > { %5992 = vmatpush3.bf16.msra.mxu0 %v6683_v55  ;;  %v5030_v55 = vld [vmem:[%s8467_s2 + $0x1] ss:$0 sm:$0xff] }
  0x78   : > { %5993 = vmatprep.subr.bf16.mxu0 %v6969_v1 }
  0x79   : > { %6012 = vmatpush3.bf16.msra.mxu1 %v6686_v56 }
  0x7a   : > { %6013 = vmatprep.subr.bf16.mxu1 %v6969_v1 }
  0x7b   : > { %5994 = vmatpush3.bf16.msra.mxu0 %v6685_v57 }
  0x7c   : > { %5995 = vmatprep.subr.bf16.mxu0 %v6969_v1 }
  0x7d   : > { %6014 = vmatpush3.bf16.msra.mxu1 %v6688_v58 }
  0x7e   : > { %6015 = vmatprep.subr.bf16.mxu1 %v6969_v1 }
  0x7f   : > { %5996 = vmatpush3.bf16.msra.mxu0 %v6687_v59 }
  0x80   : > { %5997 = vmatprep.subr.bf16.mxu0 %v6969_v1 }
  0x81   : > { %6016 = vmatpush3.bf16.msra.mxu1 %v6690_v60 }
  0x82   : > { %6017 = vmatprep.subr.bf16.mxu1 %v6969_v1 }
  0x83   : > { %5998 = vmatpush3.bf16.msra.mxu0 %v6689_v61  ;;  %v5035_v61 = vld [vmem:[%s8467_s2 + $0x6] ss:$0 sm:$0xff] }
  0x84   : > { %5999 = vmatprep.subr.bf16.mxu0 %v6969_v1 }
  0x85   : > { %6018 = vmatpush3.bf16.msra.mxu1 %v6692_v62  ;;  %v5031_v62 = vld [vmem:[%s8467_s2 + $0x2] ss:$0 sm:$0xff] }
  0x86   : > { %6019 = vmatprep.subr.bf16.mxu1 %v6969_v1 }
  0x87   : > { %6000 = vmatpush3.bf16.msra.mxu0 %v6691_v63 }
  0x88   : > { %6001 = vmatprep.subr.bf16.mxu0 %v6969_v1 }
  0x89   : > { %6020 = vmatpush3.bf16.msra.mxu1 %v6694_v0  ;;  %v5036_v0 = vld [vmem:[%s8467_s2 + $0x7] ss:$0 sm:$0xff] }
  0x8a   : > { %6021 = vmatprep.subr.bf16.mxu1 %v6969_v1 }
  0x8b   : > { %6002 = vmatpush3.bf16.msra.mxu0 %v6693_v2 }
  0x8c   : > { %6027 = vmatprep.subr.bf16.mxu0 %v6969_v1 }
  0x8d   : > { %6022 = vmatpush3.bf16.msra.mxu1 %v6695_v3 }
  0x8e   : > { %6004 = vmatmul.mubr.bf16.vlgmr.msra.gmra.mrb[12].mxu0 %v7150_v18  ;;  %6047 = vmatprep.subr.bf16.mxu1 %v6969_v1 }
  0x8f   : > { %6043 = vmatprep.mubr.msk.bf16.mxu0 %vm6970_vm0, %v6969_v1 }
  0x90   : > { %6024 = vmatmul.mubr.bf16.vlgmr.msra.gmra.mrb[12].mxu1 %v7150_v18 }
  0x91   : > { %6048 = vmatpush3.bf16.msra.mxu1 %v6696_v4  ;;  %6063 = vmatprep.mubr.msk.bf16.mxu1 %vm6970_vm0, %v6969_v1 }
  0x92   : > { %6049 = vmatprep.subr.bf16.mxu1 %v6969_v1 }
  0x95   : > { %6050 = vmatpush3.bf16.msra.mxu1 %v6697_v5 }
  0x96   : > { %6051 = vmatprep.subr.bf16.mxu1 %v6969_v1 }
  0x99   : > { %6052 = vmatpush3.bf16.msra.mxu1 %v6698_v6 }
  0x9a   : > { %6053 = vmatprep.subr.bf16.mxu1 %v6969_v1 }
  0x9d   : > { %6054 = vmatpush3.bf16.msra.mxu1 %v6699_v7 }
  0x9e   : > { %6055 = vmatprep.subr.bf16.mxu1 %v6969_v1 }
  0xa1   : > { %6056 = vmatpush3.bf16.msra.mxu1 %v6700_v8 }
  0xa2   : > { %6057 = vmatprep.subr.bf16.mxu1 %v6969_v1 }
  0xa5   : > { %6058 = vmatpush3.bf16.msra.mxu1 %v6701_v9 }
  0xa6   : > { %6059 = vmatprep.subr.bf16.mxu1 %v6969_v1 }
  0xa9   : > { %6060 = vmatpush3.bf16.msra.mxu1 %v6702_v10 }
  0xaa   : > { %6061 = vmatprep.subr.bf16.mxu1 %v6969_v1 }
  0xad   : > { %6062 = vmatpush3.bf16.msra.mxu1 %v6703_v11 }
  0xae   : > { %6087 = vmatprep.subr.bf16.mxu1 %v6969_v1 }
  0xb0   : > { %6064 = vmatmul.mubr.bf16.vlgmr.msra.gmra.mrb[16].mxu1 %v7150_v18 }
  0xb1   : > { %6088 = vmatpush3.bf16.msra.mxu1 %v6704_v12  ;;  %6103 = vmatprep.mubr.msk.bf16.mxu1 %vm6970_vm0, %v6969_v1 }
  0xb2   : > { %6089 = vmatprep.subr.bf16.mxu1 %v6969_v1 }
  0xb5   : > { %6090 = vmatpush3.bf16.msra.mxu1 %v6705_v13 }
  0xb6   : > { %6091 = vmatprep.subr.bf16.mxu1 %v6969_v1 }
  0xb9   : > { %6092 = vmatpush3.bf16.msra.mxu1 %v6706_v14 }
  0xba   : > { %6093 = vmatprep.subr.bf16.mxu1 %v6969_v1 }
  0xbd   : > { %6094 = vmatpush3.bf16.msra.mxu1 %v6707_v15 }
  0xbe   : > { %6095 = vmatprep.subr.bf16.mxu1 %v6969_v1 }
  0xc1   : > { %6096 = vmatpush3.bf16.msra.mxu1 %v6708_v16  ;;  %v5032_v16 = vld [vmem:[%s8467_s2 + $0x3] ss:$0 sm:$0xff] }
  0xc2   : > { %6097 = vmatprep.subr.bf16.mxu1 %v6969_v1 }
  0xc5   : > { %6098 = vmatpush3.bf16.msra.mxu1 %v6709_v17 }
  0xc6   : > { %6099 = vmatprep.subr.bf16.mxu1 %v6969_v1 }
  0xc9   : > { %6100 = vmatpush3.bf16.msra.mxu1 %v6710_v19 }
  0xca   : > { %6101 = vmatprep.subr.bf16.mxu1 %v6969_v1 }
  0xcd   : > { %6102 = vmatpush3.bf16.msra.mxu1 %v6711_v20 }
  0xce   : > { %6107 = vmatprep.subr.bf16.mxu1 %v6969_v1 }
  0xd0   : > { %6104 = vmatmul.mubr.bf16.vlgmr.msra.gmra.mrb[20].mxu1 %v7150_v18 }
  0xd1   : > { %6109 = vmatprep.mubr.msk.bf16.mxu1 %vm6970_vm0, %v6969_v1 }
 0x101   : > { %v721_v21 = vpop.f32.mrb[0].mxu0 }
 0x102   : > { %v5885_v22 = vpop.f32.mrb[1].mxu0  ;;  %v722_v45 = vadd.f32 %v5029_v38, %v721_v21  ;;  %v6715_v38 = vld [vmem:[%s8466_s1 + $0x218] sm:$0xff]  }
 0x103   : > { %v724_v23 = vpop.f32.mrb[2].mxu0  ;;  %v809_v24 = vpop.f32.mrb[0].mxu1 }
 0x104   : > { %v5886_v25 = vpop.f32.mrb[3].mxu0  ;;  %v5905_v26 = vpop.f32.mrb[1].mxu1  ;;  %v1695_v53 = vmul.f32 0.35355338, %v722_v45  ;;  %v810_v57 = vadd.f32 %v5030_v55, %v809_v24  ;;  %v5038_v23 = vld [vmem:[%s8467_s2 + $0x9] ss:$0 sm:$0xff] }
 0x105   : > { %v812_v27 = vpop.f32.mrb[2].mxu1  ;;  %v6722_v45 = vld [vmem:[%s8466_s1 + $0x290] sm:$0xff]  }
 0x106   : > { %v5906_v28 = vpop.f32.mrb[3].mxu1  ;;  %v1699_v56 = vpack.c.bf16 %v1695_v53, %v1695_v53  ;;  %v1696_v59 = vmul.f32 0.35355338, %v810_v57 }
 0x108   : > { %v1700_v60 = vpack.c.bf16 %v1696_v59, %v1696_v59 }
 0x121   : > { %v897_v29 = vpop.f32.mrb[4].mxu0 }
 0x122   : > { %v5925_v30 = vpop.f32.mrb[5].mxu0  ;;  %v898_v6 = vadd.f32 %v5031_v62, %v897_v29 }
 0x123   : > { %v900_v31 = vpop.f32.mrb[6].mxu0  ;;  %v985_v32 = vpop.f32.mrb[4].mxu1 }
 0x124   : > { %v5926_v33 = vpop.f32.mrb[7].mxu0  ;;  %v5945_v34 = vpop.f32.mrb[5].mxu1  ;;  %v1697_v14 = vmul.f32 0.35355338, %v898_v6  ;;  %v986_v19 = vadd.f32 %v5032_v16, %v985_v32 }
 0x125   : > { %v988_v35 = vpop.f32.mrb[6].mxu1 }
 0x126   : > { %v5946_v36 = vpop.f32.mrb[7].mxu1  ;;  %v1701_v17 = vpack.c.bf16 %v1697_v14, %v1697_v14  ;;  %v1698_v21 = vmul.f32 0.35355338, %v986_v19  ;;  %v6712_v35 = vld [vmem:[%s8466_s1 + $0x200] sm:$0xff]  }
 0x127   : > { %6028 = vmatpush3.bf16.msra.mxu0 %v6712_v35  ;;  %v6713_v36 = vld [vmem:[%s8466_s1 + $0x208] sm:$0xff]  }
 0x128   : > { %v1702_v22 = vpack.c.bf16 %v1698_v21, %v1698_v21  ;;  %6029 = vmatprep.subr.bf16.mxu0 %v6969_v1  ;;  %v5037_v21 = vld [vmem:[%s8467_s2 + $0x8] ss:$0 sm:$0xff] }
 0x12b   : > { %6030 = vmatpush3.bf16.msra.mxu0 %v6713_v36 }
 0x12c   : > { %6031 = vmatprep.subr.bf16.mxu0 %v6969_v1 }
 0x141   : > { %v1073_v39 = vpop.f32.mrb[8].mxu0 }
 0x142   : > { %v1074_v41 = vadd.f32 %v5033_v37, %v1073_v39  ;;  %v5965_v42 = vpop.f32.mrb[9].mxu0  ;;  %v6714_v37 = vld [vmem:[%s8466_s1 + $0x210] sm:$0xff]   ;;  %v6716_v39 = vld [vmem:[%s8466_s1 + $0x220] sm:$0xff]  }
 0x143   : > { %v1076_v43 = vpop.f32.mrb[10].mxu0  ;;  %v1161_v44 = vpop.f32.mrb[8].mxu1  ;;  %6032 = vmatpush3.bf16.msra.mxu0 %v6714_v37  ;;  %v6719_v42 = vld [vmem:[%s8466_s1 + $0x238] sm:$0xff]  }
 0x144   : > { %v1703_v46 = vpack.c.bf16 %v1074_v41, %v1074_v41  ;;  %v5966_v47 = vpop.f32.mrb[11].mxu0  ;;  %v1162_v48 = vadd.f32 %v5034_v40, %v1161_v44  ;;  %v5985_v49 = vpop.f32.mrb[9].mxu1  ;;  %6033 = vmatprep.subr.bf16.mxu0 %v6969_v1  ;;  %v6717_v40 = vld [vmem:[%s8466_s1 + $0x228] sm:$0xff]   ;;  %v6718_v41 = vld [vmem:[%s8466_s1 + $0x230] sm:$0xff]   ;;  %v6720_v43 = vld [vmem:[%s8466_s1 + $0x280] sm:$0xff]  }
 0x145   : > { %v1164_v50 = vpop.f32.mrb[10].mxu1  ;;  %v6721_v44 = vld [vmem:[%s8466_s1 + $0x288] sm:$0xff]   ;;  %v6724_v47 = vld [vmem:[%s8466_s1 + $0x2a0] sm:$0xff]   ;;  %v6726_v49 = vld [vmem:[%s8466_s1 + $0x2b0] sm:$0xff]  }
 0x146   : > { %v1712_v51 = vsel %vm1707_vm1, %v1703_v46, 0  ;;  %v5986_v52 = vpop.f32.mrb[11].mxu1  ;;  %v1704_v54 = vpack.c.bf16 %v1162_v48, %v1162_v48  ;;  %v6723_v46 = vld [vmem:[%s8466_s1 + $0x298] sm:$0xff]   ;;  %v6725_v48 = vld [vmem:[%s8466_s1 + $0x2a8] sm:$0xff]  }
 0x147   : > { %6108 = vmatpush3.bf16.xpose.msra.mxu1 %v1712_v51  ;;  %6034 = vmatpush3.bf16.msra.mxu0 %v6715_v38  ;;  %v6727_v50 = vld [vmem:[%s8466_s1 + $0x2b8] sm:$0xff]  }
 0x148   : > { %6113 = vmatprep.subr.bf16.mxu1 %v6969_v1  ;;  %v1758_v58 = vsel %vm1707_vm1, %v1704_v54, 0  ;;  %6035 = vmatprep.subr.bf16.mxu0 %v6969_v1 }
 0x14b   : > { %6036 = vmatpush3.bf16.msra.mxu0 %v6716_v39 }
 0x14c   : > { %6037 = vmatprep.subr.bf16.mxu0 %v6969_v1 }
 0x14e   : > { %6110 = vmatmul.mubr.msk.bf16.vlgmr.msra.gmra.mrb[24].mxu1 %vm1707_vm1, %v1699_v56 }
 0x14f   : > { %6114 = vmatpush3.bf16.xpose.msra.mxu1 %v1758_v58  ;;  %6115 = vmatprep.mubr.msk.bf16.mxu1 %vm6970_vm0, %v6969_v1 }
 0x150   : > { %6119 = vmatprep.subr.bf16.mxu1 %v6969_v1  ;;  %6038 = vmatpush3.bf16.msra.mxu0 %v6717_v40 }
 0x151   : > { %6039 = vmatprep.subr.bf16.mxu0 %v6969_v1 }
 0x154   : > { %6040 = vmatpush3.bf16.msra.mxu0 %v6718_v41 }
 0x155   : > { %6041 = vmatprep.subr.bf16.mxu0 %v6969_v1 }
 0x156   : > { %6116 = vmatmul.mubr.msk.bf16.vlgmr.msra.gmra.mrb[28].mxu1 %vm1707_vm1, %v1700_v60 }
 0x157   : > { %6121 = vmatprep.mubr.msk.bf16.mxu1 %vm6970_vm0, %v6969_v1 }
 0x158   : > { %6042 = vmatpush3.bf16.msra.mxu0 %v6719_v42  ;;  %v5039_v42 = vld [vmem:[%s8467_s2 + $0xa] ss:$0 sm:$0xff] }
 0x159   : > { %6067 = vmatprep.subr.bf16.mxu0 %v6969_v1 }
 0x15b   : > { %6044 = vmatmul.mubr.bf16.vlgmr.msra.gmra.mrb[16].mxu0 %v7150_v18 }
 0x15c   : > { %6068 = vmatpush3.bf16.msra.mxu0 %v6720_v43  ;;  %6083 = vmatprep.mubr.msk.bf16.mxu0 %vm6970_vm0, %v6969_v1 }
 0x15d   : > { %6069 = vmatprep.subr.bf16.mxu0 %v6969_v1 }
 0x160   : > { %6070 = vmatpush3.bf16.msra.mxu0 %v6721_v44 }
 0x161   : > { %v1249_v63 = vpop.f32.mrb[12].mxu0  ;;  %6071 = vmatprep.subr.bf16.mxu0 %v6969_v1 }
 0x162   : > { %v1250_v2 = vadd.f32 %v5035_v61, %v1249_v63  ;;  %v6005_v3 = vpop.f32.mrb[13].mxu0 }
 0x163   : > { %v1252_v4 = vpop.f32.mrb[14].mxu0  ;;  %v1337_v5 = vpop.f32.mrb[12].mxu1 }
 0x164   : > { %v1705_v7 = vpack.c.bf16 %v1250_v2, %v1250_v2  ;;  %v6006_v8 = vpop.f32.mrb[15].mxu0  ;;  %v1338_v9 = vadd.f32 %v5036_v0, %v1337_v5  ;;  %v6025_v10 = vpop.f32.mrb[13].mxu1  ;;  %6072 = vmatpush3.bf16.msra.mxu0 %v6722_v45 }
 0x165   : > { %v1340_v11 = vpop.f32.mrb[14].mxu1  ;;  %6073 = vmatprep.subr.bf16.mxu0 %v6969_v1 }
 0x166   : > { %v1804_v12 = vsel %vm1707_vm1, %v1705_v7, 0  ;;  %v6026_v13 = vpop.f32.mrb[15].mxu1  ;;  %v1706_v15 = vpack.c.bf16 %v1338_v9, %v1338_v9 }
 0x167   : > { %6120 = vmatpush3.bf16.xpose.msra.mxu1 %v1804_v12 }
 0x168   : > { %6125 = vmatprep.subr.bf16.mxu1 %v6969_v1  ;;  %v1850_v20 = vsel %vm1707_vm1, %v1706_v15, 0  ;;  %6074 = vmatpush3.bf16.msra.mxu0 %v6723_v46 }
 0x169   : > { %6075 = vmatprep.subr.bf16.mxu0 %v6969_v1 }
 0x16c   : > { %6076 = vmatpush3.bf16.msra.mxu0 %v6724_v47 }
 0x16d   : > { %6077 = vmatprep.subr.bf16.mxu0 %v6969_v1 }
 0x16e   : > { %6122 = vmatmul.mubr.msk.bf16.vlgmr.msra.gmra.mrb[32].mxu1 %vm1707_vm1, %v1701_v17 }
 0x16f   : > { %6126 = vmatpush3.bf16.xpose.msra.mxu1 %v1850_v20  ;;  %6127 = vmatprep.mubr.msk.bf16.mxu1 %vm6970_vm0, %v6969_v1 }
 0x170   : > { %6137 = vmatprep.subr.bf16.mxu1 %v6969_v1  ;;  %6078 = vmatpush3.bf16.msra.mxu0 %v6725_v48  ;;  %v5040_v48 = vld [vmem:[%s8467_s2 + $0xb] ss:$0 sm:$0xff] }
 0x171   : > { %6079 = vmatprep.subr.bf16.mxu0 %v6969_v1 }
 0x174   : > { %6080 = vmatpush3.bf16.msra.mxu0 %v6726_v49 }
 0x175   : > { %6081 = vmatprep.subr.bf16.mxu0 %v6969_v1 }
 0x176   : > { %6128 = vmatmul.mubr.msk.bf16.vlgmr.msra.gmra.mrb[36].mxu1 %vm1707_vm1, %v1702_v22 }
 0x177   : > { %6139 = vmatprep.mubr.msk.bf16.mxu1 %vm6970_vm0, %v6969_v1 }
 0x178   : > { %6082 = vmatpush3.bf16.msra.mxu0 %v6727_v50 }
 0x179   : > { %6131 = vmatprep.subr.bf16.mxu0 %v6969_v1 }
 0x17b   : > { %6084 = vmatmul.mubr.bf16.vlgmr.msra.gmra.mrb[20].mxu0 %v7150_v18 }
 0x17c   : > { %6133 = vmatprep.mubr.msk.bf16.mxu0 %vm6970_vm0, %v6969_v1 }
 0x183   : > { %v1513_v24 = vpop.f32.mrb[16].mxu1 }
 0x184   : > { %v1514_v25 = vadd.f32 %v5038_v23, %v1513_v24  ;;  %v6065_v26 = vpop.f32.mrb[17].mxu1 }
 0x185   : > { %v1516_v27 = vpop.f32.mrb[18].mxu1 }
 0x186   : > { %v1941_v28 = vpack.c.bf16 %v1514_v25, %v1514_v25  ;;  %v6066_v29 = vpop.f32.mrb[19].mxu1 }
 0x188   : > { %v1995_v30 = vsel %vm1947_vm2, %v1941_v28, 0 }
 0x189   : > { %6138 = vmatpush3.bf16.msra.mxu1 %v1995_v30 }
 0x18a   : > { %6149 = vmatprep.subr.bf16.mxu1 %v6969_v1 }
 0x1a3   : > { %v7490_v31 = vpop.f32.mrb[20].mxu1 }
 0x1a4   : > { %v6105_v32 = vpop.f32.mrb[21].mxu1 }
 0x1a5   : > { %v1692_v33 = vpop.f32.mrb[22].mxu1 }
 0x1a6   : > { %v6106_v34 = vpop.f32.mrb[23].mxu1 }
 0x221   : > { %v1748_v51 = vpop.f32.mrb[24].mxu1 }
 0x222   : > { %v6111_v52 = vpop.f32.mrb[25].mxu1  ;;  %v1892_v53 = vsel %vm1707_vm1, %v1748_v51, -inf }
 0x223   : > { %1893 = vmax.xlane.f32.xlu0 %v1892_v53  ;;  %v1751_v54 = vpop.f32.mrb[26].mxu1 }
 0x224   : > { %v6112_v55 = vpop.f32.mrb[27].mxu1 }
 0x229   : > { %v1794_v56 = vpop.f32.mrb[28].mxu1 }
 0x22a   : > { %v6117_v57 = vpop.f32.mrb[29].mxu1  ;;  %v1895_v58 = vsel %vm1707_vm1, %v1794_v56, -inf }
 0x22b   : > { %1896 = vmax.xlane.f32.xlu0 %v1895_v58  ;;  %v1797_v59 = vpop.f32.mrb[30].mxu1 }
 0x22c   : > { %v6118_v60 = vpop.f32.mrb[31].mxu1 }
 0x22e   : > { %v1425_v22 = vpop.f32.mrb[16].mxu0 }
 0x22f   : > { %v1426_v23 = vadd.f32 %v5037_v21, %v1425_v22  ;;  %v6045_v24 = vpop.f32.mrb[17].mxu0 }
 0x230   : > { %v1428_v25 = vpop.f32.mrb[18].mxu0 }
 0x231   : > { %v1940_v27 = vpack.c.bf16 %v1426_v23, %v1426_v23  ;;  %v6046_v28 = vpop.f32.mrb[19].mxu0 }
 0x233   : > { %v1949_v30 = vsel %vm1947_vm2, %v1940_v27, 0 }
 0x234   : > { %6132 = vmatpush3.bf16.msra.mxu0 %v1949_v30 }
 0x235   : > { %6143 = vmatprep.subr.bf16.mxu0 %v6969_v1 }
 0x241   : > { %v1840_v61 = vpop.f32.mrb[32].mxu1 }
 0x242   : > { %v6123_v62 = vpop.f32.mrb[33].mxu1  ;;  %v1898_v18 = vsel %vm1707_vm1, %v1840_v61, -inf }
 0x243   : > { %1899 = vmax.xlane.f32.xlu1 %v1898_v18  ;;  %v1843_v63 = vpop.f32.mrb[34].mxu1 }
 0x244   : > { %v6124_v0 = vpop.f32.mrb[35].mxu1  ;;  %v561_v63 = vld [vmem:[%s8468_s3] sm:$0xf] }
 0x245   : > { %v2137_v0 = vsel %vm1947_vm2, %v561_v63, 0  ;;  %v6730_v63 = vld [vmem:[%s8470_s5 + $0x10] sm:$0xff]  }
 0x249   : > { %v1886_v2 = vpop.f32.mrb[36].mxu1 }
 0x24a   : > { %v6129_v3 = vpop.f32.mrb[37].mxu1  ;;  %v1901_v4 = vsel %vm1707_vm1, %v1886_v2, -inf }
 0x24b   : > { %1902 = vmax.xlane.f32.xlu1 %v1901_v4  ;;  %v1889_v5 = vpop.f32.mrb[38].mxu1  ;;  %v563_v4 = vld [vmem:[%s8468_s3 + $0x8] sm:$0xf] }
 0x24c   : > { %v6130_v6 = vpop.f32.mrb[39].mxu1 }
 0x24e   : > { %v1601_v37 = vpop.f32.mrb[20].mxu0 }
 0x24f   : > { %v6085_v38 = vpop.f32.mrb[21].mxu0  ;;  %v1602_v43 = vadd.f32 %v5039_v42, %v1601_v37 }
 0x250   : > { %v1604_v39 = vpop.f32.mrb[22].mxu0 }
 0x251   : > { %v6086_v40 = vpop.f32.mrb[23].mxu0  ;;  %v1942_v45 = vpack.c.bf16 %v1602_v43, %v1602_v43  ;;  %v2320_v39 = vlaneseq }
 0x253   : > { %v2041_v50 = vsel %vm1947_vm2, %v1942_v45, 0  ;;  %v7630_v40 = vshrl.u32 %v2320_v39, 7 }
 0x2b0   : > { %v1894_v7 = vpop.xlane.xlu0 %1893 }
 0x2b1   : > { %v1904_v8 = vsub.f32 %v1748_v51, %v1894_v7  ;;  %v1690_v51 = vadd.f32 %v5040_v48, %v7490_v31 }
 0x2b3   : > { %v1908_v9 = vmul.f32 1.442695, %v1904_v8  ;;  %v1943_v53 = vpack.c.bf16 %v1690_v51, %v1690_v51  ;;  %v2229_v8 = vsel %vm1947_vm2, %v563_v4, 0  ;;  %v6734_v4 = vld [vmem:[%s8470_s5 + $0x30] sm:$0xff]  }
 0x2b5   : > { %6864 = vpow2.f32 %v1908_v9 }
 0x2b8   : > { %v1897_v10 = vpop.xlane.xlu0 %1896 }
 0x2b9   : > { %v1905_v11 = vsub.f32 %v1794_v56, %v1897_v10  ;;  %v2087_v56 = vsel %vm1947_vm2, %v1943_v53, 0 }
 0x2bb   : > { %v1910_v12 = vmul.f32 1.442695, %v1905_v11  ;;  %v564_v11 = vld [vmem:[%s8468_s3 + $0xc] sm:$0xf] }
 0x2bd   : > { %6866 = vpow2.f32 %v1910_v12 }
 0x2bf   : > { %v6865_v13 = vpop.eup %6864 }
 0x2c0   : > { %v1916_v14 = vsel %vm1707_vm1, %v6865_v13, 0.0 }
 0x2c1   : > { %1917 = vadd.xlane.f32.xlu0 %v1916_v14 }
 0x2c7   : > { %v6867_v15 = vpop.eup %6866 }
 0x2c8   : > { %v1919_v16 = vsel %vm1707_vm1, %v6867_v15, 0.0 }
 0x2c9   : > { %1920 = vadd.xlane.f32.xlu1 %v1919_v16 }
 0x2d0   : > { %v1900_v17 = vpop.xlane.xlu1 %1899 }
 0x2d1   : > { %v1906_v19 = vsub.f32 %v1840_v61, %v1900_v17 }
 0x2d3   : > { %v1912_v20 = vmul.f32 1.442695, %v1906_v19 }
 0x2d5   : > { %6868 = vpow2.f32 %v1912_v20 }
 0x2d8   : > { %v1903_v26 = vpop.xlane.xlu1 %1902 }
 0x2d9   : > { %v1907_v29 = vsub.f32 %v1886_v2, %v1903_v26  ;;  %v562_v2 = vld [vmem:[%s8468_s3 + $0x4] sm:$0xf] }
 0x2da   : > { %v2183_v3 = vsel %vm1947_vm2, %v562_v2, 0  ;;  %v6732_v2 = vld [vmem:[%s8470_s5 + $0x20] sm:$0xff]  }
 0x2db   : > { %v1914_v32 = vmul.f32 1.442695, %v1907_v29 }
 0x2dd   : > { %6870 = vpow2.f32 %v1914_v32 }
 0x2df   : > { %v6869_v33 = vpop.eup %6868 }
 0x2e0   : > { %v1922_v34 = vsel %vm1707_vm1, %v6869_v33, 0.0 }
 0x2e1   : > { %1923 = vadd.xlane.f32.xlu0 %v1922_v34 }
 0x2e7   : > { %v6871_v35 = vpop.eup %6870 }
 0x2e8   : > { %v1925_v36 = vsel %vm1707_vm1, %v6871_v35, 0.0 }
 0x2e9   : > { %1926 = vadd.xlane.f32.xlu1 %v1925_v36 }
 0x34e   : > { %v1918_v41 = vpop.xlane.xlu0 %1917 }
 0x34f   : > { %6872 = vrcp.f32 %v1918_v41 }
 0x356   : > { %v1921_v44 = vpop.xlane.xlu1 %1920 }
 0x357   : > { %6874 = vrcp.f32 %v1921_v44 }
 0x359   : > { %v6873_v46 = vpop.eup %6872 }
 0x35a   : > { %v1932_v47 = vmul.f32 %v6873_v46, %v6865_v13  ;;  %v2322_v46 = vsub.s32 0, %v7630_v40 }
 0x35c   : > { %v1936_v49 = vpack.c.bf16 %v1932_v47, %v1932_v47  ;;  %v7636_v47 = vld [vmem:[%s8469_s4] sm:$0x3f] }
 0x35d   : > { %v2323_v48 = vrot.slane %v7636_v47, %v2322_v46 }
 0x35e   : > { %6134 = vmatmul.mubr.msk.bf16.vlgmr.msra.gmra.mrb[24].mxu0 %vm1707_vm1, %v1936_v49 }
 0x35f   : > { %6144 = vmatpush3.bf16.msra.mxu0 %v2041_v50  ;;  %6145 = vmatprep.mubr.msk.bf16.mxu0 %vm6970_vm0, %v6969_v1 }
 0x360   : > { %6155 = vmatprep.subr.bf16.mxu0 %v6969_v1 }
 0x361   : > { %v6875_v52 = vpop.eup %6874 }
 0x362   : > { %v1933_v54 = vmul.f32 %v6875_v52, %v6867_v15  ;;  %v2275_v15 = vsel %vm1947_vm2, %v564_v11, 0  ;;  %v6741_v11 = vld [vmem:[%s8472_s7 + $0x28] sm:$0xff]  }
 0x364   : > { %v1937_v55 = vpack.c.bf16 %v1933_v54, %v1933_v54 }
 0x366   : > { %6140 = vmatmul.mubr.msk.bf16.vlgmr.msra.gmra.mrb[40].mxu1 %vm1707_vm1, %v1937_v55  ;;  %v6904_v55 = vld [vmem:[%s7136_s18] sm:$0xff]  ;;  %s6909_s18 = sshll.u32 %s6971_s26, 4  ;;  %s6910_s18 = int_to_ptr.vmem [resolvable:$false] %s6909_s18 }
 0x367   : > { %6150 = vmatpush3.bf16.msra.mxu1 %v2087_v56  ;;  %6151 = vmatprep.mubr.msk.bf16.mxu1 %vm6970_vm0, %v6969_v1  ;;  %s6911_s27 = scalar_lea.vmem %s6910_s18, 256  ;;  %p6912_p0 = scmp.lt.s32.totalorder %s8425_s30, %s6910_s18 }
 0x368   : > { %6161 = vmatprep.subr.bf16.mxu1 %v6969_v1  ;;  %p6913_p1 = scmp.lt.s32.totalorder %s6911_s27, %s6905_s17 }
 0x36a   : > { %p6914_p2 = por %p6913_p1, %p6912_p0 }
 0x36c   : > { %p6915_p3 = pnand %p6914_p2, %p6908_p13 }
 0x36e   : > { %v1924_v31 = vpop.xlane.xlu0 %1923 }
 0x36f   : > { %6876 = vrcp.f32 %v1924_v31  ;;  %v6728_v31 = vld [vmem:[%s8470_s5] sm:$0xff]  }
 0x376   : > { %v1927_v57 = vpop.xlane.xlu1 %1926 }
 0x377   : > { %6878 = vrcp.f32 %v1927_v57  ;;  %v6729_v57 = vld [vmem:[%s8470_s5 + $0x8] sm:$0xff]  }
 0x379   : > { %v6877_v58 = vpop.eup %6876 }
 0x37a   : > { %v1934_v59 = vmul.f32 %v6877_v58, %v6869_v33  ;;  %v7650_v58 = vand.u32 127, %v2320_v39 }
 0x37c   : > { %v1938_v60 = vpack.c.bf16 %v1934_v59, %v1934_v59  ;;  %vm2331_vm3 = vcmp.lt.s32.totalorder %v7650_v58, 24  ;;  %v6860_v58 = vld [vmem:[%s8473_s8 + $0x20] sm:$0xff]  }
 0x37e   : > { %6146 = vmatmul.mubr.msk.bf16.vlgmr.msra.gmra.mrb[28].mxu0 %vm1707_vm1, %v1938_v60 }
 0x37f   : > { %6157 = vmatprep.mubr.msk.bf16.mxu0 %vm6970_vm0, %v6969_v1  ;;  %6156 = vmatpush3.bf16.msra.mxu0 %v2137_v0  ;;  %v6731_v0 = vld [vmem:[%s8470_s5 + $0x18] sm:$0xff]  }
 0x380   : > { %6167 = vmatprep.subr.bf16.mxu0 %v6969_v1 }
 0x381   : > { %v6879_v61 = vpop.eup %6878 }
 0x382   : > { %v1935_v62 = vmul.f32 %v6879_v61, %v6871_v35 }
 0x384   : > { %v1939_v18 = vpack.c.bf16 %v1935_v62, %v1935_v62 }
 0x386   : > { %6152 = vmatmul.mubr.msk.bf16.vlgmr.msra.gmra.mrb[44].mxu1 %vm1707_vm1, %v1939_v18 }
 0x387   : > { %6163 = vmatprep.mubr.msk.bf16.mxu1 %vm6970_vm0, %v6969_v1  ;;  %6162 = vmatpush3.bf16.msra.mxu1 %v2183_v3  ;;  %v6733_v3 = vld [vmem:[%s8470_s5 + $0x28] sm:$0xff]  }
 0x388   : > { %6173 = vmatprep.subr.bf16.mxu1 %v6969_v1 }
 0x431   : > { %v1985_v5 = vpop.f32.mrb[24].mxu0 }
 0x432   : > { %v2129_v6 = vpack.c.bf16 %v1985_v5, %v1985_v5  ;;  %v6135_v7 = vpop.f32.mrb[25].mxu0  ;;  %v6735_v5 = vld [vmem:[%s8470_s5 + $0x38] sm:$0xff]  }
 0x433   : > { %v1988_v9 = vpop.f32.mrb[26].mxu0  ;;  %v6737_v7 = vld [vmem:[%s8472_s7 + $0x8] sm:$0xff]  }
 0x434   : > { %v6136_v10 = vpop.f32.mrb[27].mxu0  ;;  %6158 = vmatmul.mubr.msk.bf16.vlgmr.msra.gmra.mrb[32].mxu0 %vm1707_vm1, %v2129_v6  ;;  %v6736_v6 = vld [vmem:[%s8472_s7] sm:$0xff]   ;;  %v6739_v9 = vld [vmem:[%s8472_s7 + $0x18] sm:$0xff]  }
 0x435   : > { %6168 = vmatpush3.bf16.msra.mxu0 %v2229_v8  ;;  %6169 = vmatprep.mubr.msk.bf16.mxu0 %vm6970_vm0, %v6969_v1  ;;  %v6738_v8 = vld [vmem:[%s8472_s7 + $0x10] sm:$0xff]   ;;  %v6740_v10 = vld [vmem:[%s8472_s7 + $0x20] sm:$0xff]  }
 0x436   : > { %6179 = vmatprep.subr.bf16.mxu0 %v6969_v1 }
 0x439   : > { %v2031_v12 = vpop.f32.mrb[40].mxu1 }
 0x43a   : > { %v2130_v13 = vpack.c.bf16 %v2031_v12, %v2031_v12  ;;  %v6141_v14 = vpop.f32.mrb[41].mxu1 }
 0x43b   : > { %v2034_v16 = vpop.f32.mrb[42].mxu1 }
 0x43c   : > { %v6142_v17 = vpop.f32.mrb[43].mxu1  ;;  %6164 = vmatmul.mubr.msk.bf16.vlgmr.msra.gmra.mrb[48].mxu1 %vm1707_vm1, %v2130_v13  ;;  %v2348_v16 = vsub.s32 2, %v7630_v40 }
 0x43d   : > { %6174 = vmatpush3.bf16.msra.mxu1 %v2275_v15  ;;  %6175 = vmatprep.mubr.msk.bf16.mxu1 %vm6970_vm0, %v6969_v1  ;;  %v2343_v15 = vsub.s32 1, %v7630_v40 }
 0x43e   : > { %6199 = vmatprep.subr.bf16.mxu1 %v6969_v1 }
 0x43f   : > { %v2344_v17 = vrot.slane %v7636_v47, %v2343_v15 }
 0x451   : > { %v2077_v19 = vpop.f32.mrb[28].mxu0 }
 0x452   : > { %v2131_v20 = vpack.c.bf16 %v2077_v19, %v2077_v19  ;;  %v6147_v21 = vpop.f32.mrb[29].mxu0 }
 0x453   : > { %v2080_v22 = vpop.f32.mrb[30].mxu0  ;;  %v2349_v21 = vrot.slane %v7636_v47, %v2348_v16 }
 0x454   : > { %v6148_v23 = vpop.f32.mrb[31].mxu0  ;;  %6170 = vmatmul.mubr.msk.bf16.vlgmr.msra.gmra.mrb[36].mxu0 %vm1707_vm1, %v2131_v20 }
 0x455   : > { %6195 = vmatprep.mubr.msk.bf16.mxu0 %vm6970_vm0, %v6969_v1  ;;  %6180 = vmatpush3.bf16.msra.mxu0 %v6728_v31 }
 0x456   : > { %6181 = vmatprep.subr.bf16.mxu0 %v6969_v1 }
 0x459   : > { %v2123_v24 = vpop.f32.mrb[44].mxu1  ;;  %6182 = vmatpush3.bf16.msra.mxu0 %v6729_v57  ;;  %v6750_v57 = vld [vmem:[%s8466_s1 + $0x318] sm:$0xff]  }
 0x45a   : > { %v2132_v25 = vpack.c.bf16 %v2123_v24, %v2123_v24  ;;  %v6153_v26 = vpop.f32.mrb[45].mxu1  ;;  %6183 = vmatprep.subr.bf16.mxu0 %v6969_v1 }
 0x45b   : > { %v2126_v27 = vpop.f32.mrb[46].mxu1  ;;  %v6743_v26 = vld [vmem:[%s8472_s7 + $0x38] sm:$0xff]  }
 0x45c   : > { %v6154_v28 = vpop.f32.mrb[47].mxu1  ;;  %6176 = vmatmul.mubr.msk.bf16.vlgmr.msra.gmra.mrb[52].mxu1 %vm1707_vm1, %v2132_v25  ;;  %v6742_v25 = vld [vmem:[%s8472_s7 + $0x30] sm:$0xff]   ;;  %v5149_v27 = vld [vmem:[%s8471_s6] ss:$0 sm:$0xff] }
 0x45d   : > { %6215 = vmatprep.mubr.msk.bf16.mxu1 %vm6970_vm0, %v6969_v1  ;;  %6184 = vmatpush3.bf16.msra.mxu0 %v6730_v63  ;;  %v6756_v63 = vld [vmem:[%s8466_s1 + $0x330] sm:$0xff]  }
 0x45e   : > { %6185 = vmatprep.subr.bf16.mxu0 %v6969_v1  ;;  %6200 = vmatpush3.bf16.msra.mxu1 %v6736_v6 }
 0x45f   : > { %6201 = vmatprep.subr.bf16.mxu1 %v6969_v1 }
 0x461   : > { %6186 = vmatpush3.bf16.msra.mxu0 %v6731_v0  ;;  %v6757_v0 = vld [vmem:[%s8466_s1 + $0x370] sm:$0xff]  }
 0x462   : > { %6187 = vmatprep.subr.bf16.mxu0 %v6969_v1  ;;  %6202 = vmatpush3.bf16.msra.mxu1 %v6737_v7  ;;  %v2588_v7 = vsub.s32 4, %v7630_v40 }
 0x463   : > { %6203 = vmatprep.subr.bf16.mxu1 %v6969_v1 }
 0x465   : > { %6188 = vmatpush3.bf16.msra.mxu0 %v6732_v2  ;;  %v6758_v2 = vld [vmem:[%s8466_s1 + $0x338] sm:$0xff]  }
 0x466   : > { %6189 = vmatprep.subr.bf16.mxu0 %v6969_v1  ;;  %6204 = vmatpush3.bf16.msra.mxu1 %v6738_v8  ;;  %v2593_v8 = vsub.s32 5, %v7630_v40 }
 0x467   : > { %6205 = vmatprep.subr.bf16.mxu1 %v6969_v1 }
 0x469   : > { %6190 = vmatpush3.bf16.msra.mxu0 %v6733_v3  ;;  %v6759_v3 = vld [vmem:[%s8466_s1 + $0x378] sm:$0xff]  }
 0x46a   : > { %6191 = vmatprep.subr.bf16.mxu0 %v6969_v1  ;;  %6206 = vmatpush3.bf16.msra.mxu1 %v6739_v9  ;;  %v2589_v9 = vrot.slane %v7636_v47, %v2588_v7 }
 0x46b   : > { %6207 = vmatprep.subr.bf16.mxu1 %v6969_v1 }
 0x46d   : > { %6192 = vmatpush3.bf16.msra.mxu0 %v6734_v4 }
 0x46e   : > { %6193 = vmatprep.subr.bf16.mxu0 %v6969_v1  ;;  %6208 = vmatpush3.bf16.msra.mxu1 %v6740_v10 }
 0x46f   : > { %6209 = vmatprep.subr.bf16.mxu1 %v6969_v1 }
 0x471   : > { %6194 = vmatpush3.bf16.msra.mxu0 %v6735_v5 }
 0x472   : > { %6219 = vmatprep.subr.bf16.mxu0 %v6969_v1  ;;  %6210 = vmatpush3.bf16.msra.mxu1 %v6741_v11  ;;  %v2594_v11 = vrot.slane %v7636_v47, %v2593_v8 }
 0x473   : > { %6211 = vmatprep.subr.bf16.mxu1 %v6969_v1 }
 0x476   : > { %6212 = vmatpush3.bf16.msra.mxu1 %v6742_v25  ;;  %v6767_v25 = vld [vmem:[%s8466_s1 + $0x3d8] sm:$0xff]  }
 0x477   : > { %6213 = vmatprep.subr.bf16.mxu1 %v6969_v1 }
 0x47a   : > { %6214 = vmatpush3.bf16.msra.mxu1 %v6743_v26  ;;  %v6768_v26 = vld [vmem:[%s8466_s1 + $0x3a0] sm:$0xff]  }
 0x47b   : > { %6239 = vmatprep.subr.bf16.mxu1 %v6969_v1 }
 0x507   : > { %v2173_v29 = vpop.f32.mrb[32].mxu0 }
 0x508   : > { %v6159_v30 = vpop.f32.mrb[33].mxu0 }
 0x509   : > { %v2176_v32 = vpop.f32.mrb[34].mxu0 }
 0x50a   : > { %v6160_v33 = vpop.f32.mrb[35].mxu0 }
 0x50f   : > { %v2219_v34 = vpop.f32.mrb[48].mxu1 }
 0x510   : > { %v2317_v35 = vadd.f32 %v2219_v34, %v2173_v29  ;;  %v6165_v36 = vpop.f32.mrb[49].mxu1 }
 0x511   : > { %v2222_v37 = vpop.f32.mrb[50].mxu1  ;;  %v2483_v36 = vsub.s32 3, %v7630_v40 }
 0x512   : > { %v6166_v38 = vpop.f32.mrb[51].mxu1 }
 0x513   : > { %v2484_v37 = vrot.slane %v7636_v47, %v2483_v36  ;;  %v6762_v47 = vld [vmem:[%s8466_s1 + $0x388] sm:$0xff]  }
 0x527   : > { %v2265_v41 = vpop.f32.mrb[36].mxu0 }
 0x528   : > { %v2318_v42 = vadd.f32 %v2317_v35, %v2265_v41  ;;  %v6171_v43 = vpop.f32.mrb[37].mxu0 }
 0x529   : > { %v2268_v44 = vpop.f32.mrb[38].mxu0 }
 0x52a   : > { %v6172_v45 = vpop.f32.mrb[39].mxu0 }
 0x52b   : > { %v6744_v45 = vld [vmem:[%s8466_s1 + $0x300] sm:$0xff]  }
 0x52f   : > { %v2311_v49 = vpop.f32.mrb[52].mxu1 }
 0x530   : > { %v2319_v50 = vadd.f32 %v2318_v42, %v2311_v49  ;;  %v6177_v51 = vpop.f32.mrb[53].mxu1  ;;  %v6746_v49 = vld [vmem:[%s8466_s1 + $0x308] sm:$0xff]  }
 0x531   : > { %v2314_v52 = vpop.f32.mrb[54].mxu1  ;;  %v6748_v51 = vld [vmem:[%s8466_s1 + $0x310] sm:$0xff]  }
 0x532   : > { %v2324_v53 = vadd.f32 %v2323_v48, %v2319_v50  ;;  %v6178_v54 = vpop.f32.mrb[55].mxu1  ;;  %v6745_v48 = vld [vmem:[%s8466_s1 + $0x340] sm:$0xff]   ;;  %v6747_v50 = vld [vmem:[%s8466_s1 + $0x348] sm:$0xff]   ;;  %v6749_v52 = vld [vmem:[%s8466_s1 + $0x350] sm:$0xff]  }
 0x534   : > { %v2325_v56 = vadd.f32 %v6904_v55, %v2324_v53 }
 0x536   : > { %2326 = vadd.xlane.f32.xlu0 %v2325_v56 }
 0x5c3   : > { %v2327_v59 = vpop.xlane.xlu0 %2326 }
 0x5c4   : > { %v2328_v60 = vmul.f32 0.041666668, %v2327_v59  ;;  %v6751_v59 = vld [vmem:[%s8466_s1 + $0x358] sm:$0xff]  }
 0x5c6   : > { %v2332_v61 = vsub.f32 %v2325_v56, %v2328_v60  ;;  %v6752_v60 = vld [vmem:[%s8466_s1 + $0x320] sm:$0xff]  }
 0x5c8   : > { %v2333_v62 = vsel %vm2331_vm3, %v2332_v61, 0.0  ;;  %v6753_v61 = vld [vmem:[%s8466_s1 + $0x360] sm:$0xff]  }
 0x5c9   : > { %v2334_v18 = vmul.f32 %v2333_v62, %v2333_v62 }
 0x5cb   : > { %2335 = vadd.xlane.f32.xlu1 %v2334_v18  ;;  %v6755_v18 = vld [vmem:[%s8466_s1 + $0x368] sm:$0xff]  }
 0x658   : > { %v2336_v12 = vpop.xlane.xlu1 %2335 }
 0x659   : > { %v2337_v13 = vmul.f32 0.041666668, %v2336_v12 }
 0x65b   : > { %v2338_v14 = vadd.f32 1e-05, %v2337_v13 }
 0x65d   : > { %6880 = vrsqrt.f32 %v2338_v14 }
 0x667   : > { %v6881_v19 = vpop.eup %6880 }
 0x668   : > { %v2340_v20 = vmul.f32 %v6881_v19, %v2333_v62  ;;  %v6754_v62 = vld [vmem:[%s8466_s1 + $0x328] sm:$0xff]   ;;  %v6761_v19 = vld [vmem:[%s8466_s1 + $0x3c0] sm:$0xff]  }
 0x66a   : > { %v2345_v22 = vmul.f32 %v2344_v17, %v2340_v20  ;;  %v6760_v17 = vld [vmem:[%s8466_s1 + $0x380] sm:$0xff]  }
 0x66c   : > { %v2350_v23 = vadd.f32 %v2349_v21, %v2345_v22  ;;  %v6763_v21 = vld [vmem:[%s8466_s1 + $0x3c8] sm:$0xff]   ;;  %v6764_v22 = vld [vmem:[%s8466_s1 + $0x390] sm:$0xff]  }
 0x66e   : > { %v2351_v24 = vpack.c.bf16 %v2350_v23, %v2350_v23 }
 0x670   : > { %6196 = vmatmul.mubr.bf16.vlgmr.msra.gmra.mrb[40].mxu0 %v2351_v24  ;;  %v6766_v24 = vld [vmem:[%s8466_s1 + $0x398] sm:$0xff]  }
 0x671   : > { %6235 = vmatprep.mubr.msk.bf16.mxu0 %vm6970_vm0, %v6969_v1  ;;  %6220 = vmatpush3.bf16.msra.mxu0 %v6744_v45  ;;  %v6784_v45 = vld [vmem:[%s8466_s1 + $0x420] sm:$0xff]  }
 0x672   : > { %6221 = vmatprep.subr.bf16.mxu0 %v6969_v1 }
 0x675   : > { %6222 = vmatpush3.bf16.msra.mxu0 %v6746_v49  ;;  %v6786_v49 = vld [vmem:[%s8466_s1 + $0x428] sm:$0xff]  }
 0x676   : > { %6223 = vmatprep.subr.bf16.mxu0 %v6969_v1 }
 0x679   : > { %6224 = vmatpush3.bf16.msra.mxu0 %v6748_v51  ;;  %v6788_v51 = vld [vmem:[%s8466_s1 + $0x430] sm:$0xff]  }
 0x67a   : > { %6225 = vmatprep.subr.bf16.mxu0 %v6969_v1 }
 0x67d   : > { %6226 = vmatpush3.bf16.msra.mxu0 %v6750_v57  ;;  %v6795_v57 = vld [vmem:[%s8466_s1 + $0x4c8] sm:$0xff]  }
 0x67e   : > { %6227 = vmatprep.subr.bf16.mxu0 %v6969_v1 }
 0x681   : > { %6228 = vmatpush3.bf16.msra.mxu0 %v6752_v60  ;;  %v6797_v60 = vld [vmem:[%s8466_s1 + $0x4d0] sm:$0xff]  }
 0x682   : > { %6229 = vmatprep.subr.bf16.mxu0 %v6969_v1 }
 0x685   : > { %6230 = vmatpush3.bf16.msra.mxu0 %v6754_v62  ;;  %v6799_v62 = vld [vmem:[%s8466_s1 + $0x4d8] sm:$0xff]  }
 0x686   : > { %6231 = vmatprep.subr.bf16.mxu0 %v6969_v1 }
 0x689   : > { %6232 = vmatpush3.bf16.msra.mxu0 %v6756_v63  ;;  %v6801_v63 = vld [vmem:[%s8466_s1 + $0x4e0] sm:$0xff]  }
 0x68a   : > { %6233 = vmatprep.subr.bf16.mxu0 %v6969_v1 }
 0x68d   : > { %6234 = vmatpush3.bf16.msra.mxu0 %v6758_v2  ;;  %v6803_v2 = vld [vmem:[%s8466_s1 + $0x4e8] sm:$0xff]  }
 0x68e   : > { %6259 = vmatprep.subr.bf16.mxu0 %v6969_v1 }
 0x743   : > { %v2457_v28 = vpop.f32.mrb[40].mxu0 }
 0x744   : > { %v2458_v29 = vadd.f32 %v5149_v27, %v2457_v28  ;;  %v6197_v30 = vpop.f32.mrb[41].mxu0  ;;  %v6769_v27 = vld [vmem:[%s8466_s1 + $0x3e0] sm:$0xff]   ;;  %v6770_v28 = vld [vmem:[%s8466_s1 + $0x3a8] sm:$0xff]  }
 0x745   : > { %v2460_v32 = vpop.f32.mrb[42].mxu0  ;;  %v6772_v30 = vld [vmem:[%s8466_s1 + $0x3b0] sm:$0xff]  }
 0x746   : > { %v2463_v33 = vmax.f32 %v2458_v29, 0.0  ;;  %v6198_v34 = vpop.f32.mrb[43].mxu0  ;;  %v6771_v29 = vld [vmem:[%s8466_s1 + $0x3e8] sm:$0xff]   ;;  %v6773_v32 = vld [vmem:[%s8466_s1 + $0x3f0] sm:$0xff]  }
 0x747   : > { %v6775_v34 = vld [vmem:[%s8466_s1 + $0x3f8] sm:$0xff]  }
 0x748   : > { %v2464_v35 = vpack.c.bf16 %v2463_v33, %v2463_v33  ;;  %v6774_v33 = vld [vmem:[%s8466_s1 + $0x3b8] sm:$0xff]  }
 0x74a   : > { %6216 = vmatmul.mubr.bf16.vlgmr.msra.gmra.mrb[56].mxu1 %v2464_v35  ;;  %v6776_v35 = vld [vmem:[%s8466_s1 + $0x400] sm:$0xff]  }
 0x74b   : > { %6255 = vmatprep.mubr.msk.bf16.mxu1 %vm6970_vm0, %v6969_v1  ;;  %6240 = vmatpush3.bf16.msra.mxu1 %v6745_v48  ;;  %v6785_v48 = vld [vmem:[%s8466_s1 + $0x460] sm:$0xff]  }
 0x74c   : > { %6241 = vmatprep.subr.bf16.mxu1 %v6969_v1 }
 0x74f   : > { %6242 = vmatpush3.bf16.msra.mxu1 %v6747_v50  ;;  %v6787_v50 = vld [vmem:[%s8466_s1 + $0x468] sm:$0xff]  }
 0x750   : > { %6243 = vmatprep.subr.bf16.mxu1 %v6969_v1 }
 0x753   : > { %6244 = vmatpush3.bf16.msra.mxu1 %v6749_v52  ;;  %v6789_v52 = vld [vmem:[%s8466_s1 + $0x470] sm:$0xff]  }
 0x754   : > { %6245 = vmatprep.subr.bf16.mxu1 %v6969_v1 }
 0x757   : > { %6246 = vmatpush3.bf16.msra.mxu1 %v6751_v59  ;;  %v6796_v59 = vld [vmem:[%s8466_s1 + $0x490] sm:$0xff]  }
 0x758   : > { %6247 = vmatprep.subr.bf16.mxu1 %v6969_v1 }
 0x75b   : > { %6248 = vmatpush3.bf16.msra.mxu1 %v6753_v61  ;;  %v6798_v61 = vld [vmem:[%s8466_s1 + $0x498] sm:$0xff]  }
 0x75c   : > { %6249 = vmatprep.subr.bf16.mxu1 %v6969_v1 }
 0x75f   : > { %6250 = vmatpush3.bf16.msra.mxu1 %v6755_v18  ;;  %v6800_v18 = vld [vmem:[%s8466_s1 + $0x4a0] sm:$0xff]  }
 0x760   : > { %6251 = vmatprep.subr.bf16.mxu1 %v6969_v1 }
 0x763   : > { %6252 = vmatpush3.bf16.msra.mxu1 %v6757_v0  ;;  %v6802_v0 = vld [vmem:[%s8466_s1 + $0x4a8] sm:$0xff]  }
 0x764   : > { %6253 = vmatprep.subr.bf16.mxu1 %v6969_v1 }
 0x767   : > { %6254 = vmatpush3.bf16.msra.mxu1 %v6759_v3  ;;  %v6804_v3 = vld [vmem:[%s8466_s1 + $0x4b0] sm:$0xff]  }
 0x768   : > { %6279 = vmatprep.subr.bf16.mxu1 %v6969_v1 }
 0x81d   : > { %v2567_v38 = vpop.f32.mrb[56].mxu1 }
 0x81e   : > { %v2568_v39 = vadd.f32 %v2567_v38, %v2484_v37  ;;  %v6217_v41 = vpop.f32.mrb[57].mxu1  ;;  %v6777_v37 = vld [vmem:[%s8466_s1 + $0x440] sm:$0xff]   ;;  %v6778_v38 = vld [vmem:[%s8466_s1 + $0x408] sm:$0xff]  }
 0x81f   : > { %v2570_v42 = vpop.f32.mrb[58].mxu1  ;;  %v6780_v41 = vld [vmem:[%s8466_s1 + $0x410] sm:$0xff]  }
 0x820   : > { %v6218_v43 = vpop.f32.mrb[59].mxu1  ;;  %v2573_v44 = vadd.f32 %v2568_v39, %v2350_v23  ;;  %v6765_v23 = vld [vmem:[%s8466_s1 + $0x3d0] sm:$0xff]   ;;  %v6779_v39 = vld [vmem:[%s8466_s1 + $0x448] sm:$0xff]  }
 0x821   : > { %v6781_v42 = vld [vmem:[%s8466_s1 + $0x450] sm:$0xff]   ;;  %v6782_v43 = vld [vmem:[%s8466_s1 + $0x418] sm:$0xff]  }
 0x822   : > { %2574 = vadd.xlane.f32.xlu0 %v2573_v44 }
 0x8af   : > { %v2575_v53 = vpop.xlane.xlu0 %2574 }
 0x8b0   : > { %v2576_v54 = vmul.f32 0.041666668, %v2575_v53  ;;  %v6790_v53 = vld [vmem:[%s8466_s1 + $0x438] sm:$0xff]  }
 0x8b2   : > { %v2577_v55 = vsub.f32 %v2573_v44, %v2576_v54  ;;  %v6783_v44 = vld [vmem:[%s8466_s1 + $0x458] sm:$0xff]  }
 0x8b3   : > { %v6791_v54 = vld [vmem:[%s8466_s1 + $0x478] sm:$0xff]  }
 0x8b4   : > { %v2578_v56 = vsel %vm2331_vm3, %v2577_v55, 0.0  ;;  %v6792_v55 = vld [vmem:[%s8466_s1 + $0x480] sm:$0xff]  }
 0x8b5   : > { %v2579_v31 = vmul.f32 %v2578_v56, %v2578_v56 }
 0x8b7   : > { %2580 = vadd.xlane.f32.xlu1 %v2579_v31  ;;  %v6794_v31 = vld [vmem:[%s8466_s1 + $0x488] sm:$0xff]  }
 0x944   : > { %v2581_v4 = vpop.xlane.xlu1 %2580 }
 0x945   : > { %v2582_v5 = vmul.f32 0.041666668, %v2581_v4  ;;  %v6805_v4 = vld [vmem:[%s8466_s1 + $0x4f0] sm:$0xff]  }
 0x947   : > { %v2583_v6 = vadd.f32 1e-05, %v2582_v5  ;;  %v6806_v5 = vld [vmem:[%s8466_s1 + $0x4b8] sm:$0xff]  }
 0x949   : > { %6882 = vrsqrt.f32 %v2583_v6  ;;  %v6807_v6 = vld [vmem:[%s8466_s1 + $0x4f8] sm:$0xff]  }
 0x953   : > { %v6883_v10 = vpop.eup %6882 }
 0x954   : > { %v2585_v12 = vmul.f32 %v6883_v10, %v2578_v56  ;;  %v6793_v56 = vld [vmem:[%s8466_s1 + $0x4c0] sm:$0xff]  }
 0x955   : > { %v6809_v10 = vld [vmem:[%s8466_s1 + $0x540] sm:$0xff]  }
 0x956   : > { %v2590_v13 = vmul.f32 %v2589_v9, %v2585_v12  ;;  %v6808_v9 = vld [vmem:[%s8466_s1 + $0x500] sm:$0xff]   ;;  %v6811_v12 = vld [vmem:[%s8466_s1 + $0x548] sm:$0xff]  }
 0x958   : > { %v7804_v14 = vadd.f32 %v2594_v11, %v2590_v13  ;;  %v6810_v11 = vld [vmem:[%s8466_s1 + $0x508] sm:$0xff]   ;;  %v6812_v13 = vld [vmem:[%s8466_s1 + $0x510] sm:$0xff]  }
 0x95a   : > { %v7814_v20 = vpack.c.bf16 %v7804_v14, %v7804_v14 }
 0x95c   : > { %6236 = vmatmul.mubr.bf16.vlgmr.msra.gmra.mrb[44].mxu0 %v7814_v20  ;;  %6256 = vmatmul.mubr.bf16.vlgmr.msra.gmra.mrb[60].mxu1 %v7814_v20 }
 0x95d   : > { %6260 = vmatpush3.bf16.msra.mxu0 %v6760_v17  ;;  %6280 = vmatpush3.bf16.msra.mxu1 %v6761_v19  ;;  %v6813_v17 = vld [vmem:[%s8466_s1 + $0x550] sm:$0xff]   ;;  %v6814_v19 = vld [vmem:[%s8466_s1 + $0x518] sm:$0xff]  }
 0x95e   : > { %6261 = vmatprep.subr.bf16.mxu0 %v6969_v1  ;;  %6281 = vmatprep.subr.bf16.mxu1 %v6969_v1 }
 0x95f   : > { %6275 = vmatprep.mubr.msk.bf16.mxu0 %vm6970_vm0, %v6969_v1  ;;  %6295 = vmatprep.mubr.msk.bf16.mxu1 %vm6970_vm0, %v6969_v1 }
 0x961   : > { %6262 = vmatpush3.bf16.msra.mxu0 %v6762_v47  ;;  %6282 = vmatpush3.bf16.msra.mxu1 %v6763_v21  ;;  %v6815_v47 = vld [vmem:[%s8466_s1 + $0x558] sm:$0xff]   ;;  %v6816_v21 = vld [vmem:[%s8466_s1 + $0x520] sm:$0xff]  }
 0x962   : > { %6263 = vmatprep.subr.bf16.mxu0 %v6969_v1  ;;  %6283 = vmatprep.subr.bf16.mxu1 %v6969_v1 }
 0x965   : > { %6264 = vmatpush3.bf16.msra.mxu0 %v6764_v22  ;;  %6284 = vmatpush3.bf16.msra.mxu1 %v6765_v23  ;;  %v6817_v22 = vld [vmem:[%s8466_s1 + $0x560] sm:$0xff]   ;;  %v6818_v23 = vld [vmem:[%s8466_s1 + $0x528] sm:$0xff]  }
 0x966   : > { %6265 = vmatprep.subr.bf16.mxu0 %v6969_v1  ;;  %6285 = vmatprep.subr.bf16.mxu1 %v6969_v1 }
 0x969   : > { %6266 = vmatpush3.bf16.msra.mxu0 %v6766_v24  ;;  %6286 = vmatpush3.bf16.msra.mxu1 %v6767_v25  ;;  %v6819_v24 = vld [vmem:[%s8466_s1 + $0x568] sm:$0xff]   ;;  %v6820_v25 = vld [vmem:[%s8466_s1 + $0x530] sm:$0xff]  }
 0x96a   : > { %6267 = vmatprep.subr.bf16.mxu0 %v6969_v1  ;;  %6287 = vmatprep.subr.bf16.mxu1 %v6969_v1 }
 0x96d   : > { %6268 = vmatpush3.bf16.msra.mxu0 %v6768_v26  ;;  %6288 = vmatpush3.bf16.msra.mxu1 %v6769_v27  ;;  %v6821_v26 = vld [vmem:[%s8466_s1 + $0x570] sm:$0xff]   ;;  %v6822_v27 = vld [vmem:[%s8466_s1 + $0x538] sm:$0xff]  }
 0x96e   : > { %6269 = vmatprep.subr.bf16.mxu0 %v6969_v1  ;;  %6289 = vmatprep.subr.bf16.mxu1 %v6969_v1 }
 0x971   : > { %6270 = vmatpush3.bf16.msra.mxu0 %v6770_v28  ;;  %6290 = vmatpush3.bf16.msra.mxu1 %v6771_v29  ;;  %v6823_v28 = vld [vmem:[%s8466_s1 + $0x578] sm:$0xff]   ;;  %v6824_v29 = vld [vmem:[%s8466_s1 + $0x580] sm:$0xff]  }
 0x972   : > { %6271 = vmatprep.subr.bf16.mxu0 %v6969_v1  ;;  %6291 = vmatprep.subr.bf16.mxu1 %v6969_v1 }
 0x975   : > { %6272 = vmatpush3.bf16.msra.mxu0 %v6772_v30  ;;  %6292 = vmatpush3.bf16.msra.mxu1 %v6773_v32  ;;  %v6825_v30 = vld [vmem:[%s8466_s1 + $0x5c0] sm:$0xff]   ;;  %v6826_v32 = vld [vmem:[%s8466_s1 + $0x588] sm:$0xff]  }
 0x976   : > { %6273 = vmatprep.subr.bf16.mxu0 %v6969_v1  ;;  %6293 = vmatprep.subr.bf16.mxu1 %v6969_v1 }
 0x979   : > { %6274 = vmatpush3.bf16.msra.mxu0 %v6774_v33  ;;  %6294 = vmatpush3.bf16.msra.mxu1 %v6775_v34  ;;  %v6827_v33 = vld [vmem:[%s8466_s1 + $0x5c8] sm:$0xff]   ;;  %v6828_v34 = vld [vmem:[%s8466_s1 + $0x590] sm:$0xff]  }
 0x97a   : > { %6299 = vmatprep.subr.bf16.mxu0 %v6969_v1  ;;  %6319 = vmatprep.subr.bf16.mxu1 %v6969_v1 }
 0x97c   : > { %6276 = vmatmul.mubr.bf16.vlgmr.msra.gmra.mrb[48].mxu0 %v7814_v20  ;;  %6296 = vmatmul.mubr.bf16.vlgmr.msra.gmra.mrb[64].mxu1 %v7814_v20 }
 0x97d   : > { %6300 = vmatpush3.bf16.msra.mxu0 %v6776_v35  ;;  %6320 = vmatpush3.bf16.msra.mxu1 %v6777_v37  ;;  %v6829_v35 = vld [vmem:[%s8466_s1 + $0x5d0] sm:$0xff]   ;;  %v6830_v37 = vld [vmem:[%s8466_s1 + $0x598] sm:$0xff]  }
 0x97e   : > { %6301 = vmatprep.subr.bf16.mxu0 %v6969_v1  ;;  %6321 = vmatprep.subr.bf16.mxu1 %v6969_v1 }
 0x97f   : > { %6315 = vmatprep.mubr.msk.bf16.mxu0 %vm6970_vm0, %v6969_v1  ;;  %6335 = vmatprep.mubr.msk.bf16.mxu1 %vm6970_vm0, %v6969_v1 }
 0x981   : > { %6302 = vmatpush3.bf16.msra.mxu0 %v6778_v38  ;;  %6322 = vmatpush3.bf16.msra.mxu1 %v6779_v39  ;;  %v6831_v38 = vld [vmem:[%s8466_s1 + $0x5d8] sm:$0xff]   ;;  %v6832_v39 = vld [vmem:[%s8466_s1 + $0x5a0] sm:$0xff]  }
 0x982   : > { %6303 = vmatprep.subr.bf16.mxu0 %v6969_v1  ;;  %6323 = vmatprep.subr.bf16.mxu1 %v6969_v1 }
 0x985   : > { %6304 = vmatpush3.bf16.msra.mxu0 %v6780_v41  ;;  %6324 = vmatpush3.bf16.msra.mxu1 %v6781_v42  ;;  %v6833_v41 = vld [vmem:[%s8466_s1 + $0x5e0] sm:$0xff]   ;;  %v6834_v42 = vld [vmem:[%s8466_s1 + $0x5a8] sm:$0xff]  }
 0x986   : > { %6305 = vmatprep.subr.bf16.mxu0 %v6969_v1  ;;  %6325 = vmatprep.subr.bf16.mxu1 %v6969_v1 }
 0x989   : > { %6306 = vmatpush3.bf16.msra.mxu0 %v6782_v43  ;;  %6326 = vmatpush3.bf16.msra.mxu1 %v6783_v44  ;;  %v6835_v43 = vld [vmem:[%s8466_s1 + $0x5e8] sm:$0xff]   ;;  %v6836_v44 = vld [vmem:[%s8466_s1 + $0x5b0] sm:$0xff]  }
 0x98a   : > { %6307 = vmatprep.subr.bf16.mxu0 %v6969_v1  ;;  %6327 = vmatprep.subr.bf16.mxu1 %v6969_v1 }
 0x98d   : > { %6308 = vmatpush3.bf16.msra.mxu0 %v6784_v45  ;;  %6328 = vmatpush3.bf16.msra.mxu1 %v6785_v48  ;;  %v6837_v45 = vld [vmem:[%s8466_s1 + $0x5f0] sm:$0xff]   ;;  %v6838_v48 = vld [vmem:[%s8466_s1 + $0x5b8] sm:$0xff]  }
 0x98e   : > { %6309 = vmatprep.subr.bf16.mxu0 %v6969_v1  ;;  %6329 = vmatprep.subr.bf16.mxu1 %v6969_v1 }
 0x991   : > { %6310 = vmatpush3.bf16.msra.mxu0 %v6786_v49  ;;  %6330 = vmatpush3.bf16.msra.mxu1 %v6787_v50  ;;  %v6839_v49 = vld [vmem:[%s8466_s1 + $0x5f8] sm:$0xff]  }
 0x992   : > { %6311 = vmatprep.subr.bf16.mxu0 %v6969_v1  ;;  %6331 = vmatprep.subr.bf16.mxu1 %v6969_v1 }
 0x995   : > { %6312 = vmatpush3.bf16.msra.mxu0 %v6788_v51  ;;  %6332 = vmatpush3.bf16.msra.mxu1 %v6789_v52 }
 0x996   : > { %6313 = vmatprep.subr.bf16.mxu0 %v6969_v1  ;;  %6333 = vmatprep.subr.bf16.mxu1 %v6969_v1 }
 0x999   : > { %6314 = vmatpush3.bf16.msra.mxu0 %v6790_v53  ;;  %6334 = vmatpush3.bf16.msra.mxu1 %v6791_v54 }
 0x99a   : > { %6339 = vmatprep.subr.bf16.mxu0 %v6969_v1  ;;  %6359 = vmatprep.subr.bf16.mxu1 %v6969_v1 }
 0x99c   : > { %6316 = vmatmul.mubr.bf16.vlgmr.msra.gmra.mrb[52].mxu0 %v7814_v20  ;;  %6336 = vmatmul.mubr.bf16.vlgmr.msra.gmra.mrb[68].mxu1 %v7814_v20 }
 0x99d   : > { %6340 = vmatpush3.bf16.msra.mxu0 %v6792_v55  ;;  %6360 = vmatpush3.bf16.msra.mxu1 %v6793_v56 }
 0x99e   : > { %6341 = vmatprep.subr.bf16.mxu0 %v6969_v1  ;;  %6361 = vmatprep.subr.bf16.mxu1 %v6969_v1 }
 0x99f   : > { %6355 = vmatprep.mubr.msk.bf16.mxu0 %vm6970_vm0, %v6969_v1  ;;  %6375 = vmatprep.mubr.msk.bf16.mxu1 %vm6970_vm0, %v6969_v1 }
 0x9a1   : > { %6342 = vmatpush3.bf16.msra.mxu0 %v6794_v31  ;;  %6362 = vmatpush3.bf16.msra.mxu1 %v6795_v57 }
 0x9a2   : > { %6343 = vmatprep.subr.bf16.mxu0 %v6969_v1  ;;  %6363 = vmatprep.subr.bf16.mxu1 %v6969_v1 }
 0x9a5   : > { %6344 = vmatpush3.bf16.msra.mxu0 %v6796_v59  ;;  %6364 = vmatpush3.bf16.msra.mxu1 %v6797_v60 }
 0x9a6   : > { %6345 = vmatprep.subr.bf16.mxu0 %v6969_v1  ;;  %6365 = vmatprep.subr.bf16.mxu1 %v6969_v1 }
 0x9a9   : > { %6346 = vmatpush3.bf16.msra.mxu0 %v6798_v61  ;;  %6366 = vmatpush3.bf16.msra.mxu1 %v6799_v62 }
 0x9aa   : > { %6347 = vmatprep.subr.bf16.mxu0 %v6969_v1  ;;  %6367 = vmatprep.subr.bf16.mxu1 %v6969_v1 }
 0x9ad   : > { %6348 = vmatpush3.bf16.msra.mxu0 %v6800_v18  ;;  %6368 = vmatpush3.bf16.msra.mxu1 %v6801_v63 }
 0x9ae   : > { %6349 = vmatprep.subr.bf16.mxu0 %v6969_v1  ;;  %6369 = vmatprep.subr.bf16.mxu1 %v6969_v1 }
 0x9b1   : > { %6350 = vmatpush3.bf16.msra.mxu0 %v6802_v0  ;;  %6370 = vmatpush3.bf16.msra.mxu1 %v6803_v2  ;;  %v5379_v0 = vld [vmem:[%s8467_s2 + $0x10] ss:$0 sm:$0xff]  ;;  %v5380_v2 = vld [vmem:[%s8467_s2 + $0x11] ss:$0 sm:$0xff] }
 0x9b2   : > { %6351 = vmatprep.subr.bf16.mxu0 %v6969_v1  ;;  %6371 = vmatprep.subr.bf16.mxu1 %v6969_v1 }
 0x9b5   : > { %6352 = vmatpush3.bf16.msra.mxu0 %v6804_v3  ;;  %6372 = vmatpush3.bf16.msra.mxu1 %v6805_v4  ;;  %v5375_v3 = vld [vmem:[%s8467_s2 + $0xc] ss:$0 sm:$0xff]  ;;  %v5376_v4 = vld [vmem:[%s8467_s2 + $0xd] ss:$0 sm:$0xff] }
 0x9b6   : > { %6353 = vmatprep.subr.bf16.mxu0 %v6969_v1  ;;  %6373 = vmatprep.subr.bf16.mxu1 %v6969_v1 }
 0x9b9   : > { %6354 = vmatpush3.bf16.msra.mxu0 %v6806_v5  ;;  %6374 = vmatpush3.bf16.msra.mxu1 %v6807_v6 }
 0x9ba   : > { %6379 = vmatprep.subr.bf16.mxu0 %v6969_v1  ;;  %6399 = vmatprep.subr.bf16.mxu1 %v6969_v1 }
 0x9bc   : > { %6356 = vmatmul.mubr.bf16.vlgmr.msra.gmra.mrb[56].mxu0 %v7814_v20  ;;  %6376 = vmatmul.mubr.bf16.vlgmr.msra.gmra.mrb[72].mxu1 %v7814_v20 }
 0x9bd   : > { %6380 = vmatpush3.bf16.msra.mxu0 %v6808_v9  ;;  %6400 = vmatpush3.bf16.msra.mxu1 %v6809_v10 }
 0x9be   : > { %6381 = vmatprep.subr.bf16.mxu0 %v6969_v1  ;;  %6401 = vmatprep.subr.bf16.mxu1 %v6969_v1 }
 0x9bf   : > { %6395 = vmatprep.mubr.msk.bf16.mxu0 %vm6970_vm0, %v6969_v1  ;;  %6415 = vmatprep.mubr.msk.bf16.mxu1 %vm6970_vm0, %v6969_v1 }
 0x9c1   : > { %6382 = vmatpush3.bf16.msra.mxu0 %v6810_v11  ;;  %6402 = vmatpush3.bf16.msra.mxu1 %v6811_v12 }
 0x9c2   : > { %6383 = vmatprep.subr.bf16.mxu0 %v6969_v1  ;;  %6403 = vmatprep.subr.bf16.mxu1 %v6969_v1 }
 0x9c5   : > { %6384 = vmatpush3.bf16.msra.mxu0 %v6812_v13  ;;  %6404 = vmatpush3.bf16.msra.mxu1 %v6813_v17 }
 0x9c6   : > { %6385 = vmatprep.subr.bf16.mxu0 %v6969_v1  ;;  %6405 = vmatprep.subr.bf16.mxu1 %v6969_v1 }
 0x9c9   : > { %6386 = vmatpush3.bf16.msra.mxu0 %v6814_v19  ;;  %6406 = vmatpush3.bf16.msra.mxu1 %v6815_v47 }
 0x9ca   : > { %6387 = vmatprep.subr.bf16.mxu0 %v6969_v1  ;;  %6407 = vmatprep.subr.bf16.mxu1 %v6969_v1 }
 0x9cd   : > { %6388 = vmatpush3.bf16.msra.mxu0 %v6816_v21  ;;  %6408 = vmatpush3.bf16.msra.mxu1 %v6817_v22 }
 0x9ce   : > { %6389 = vmatprep.subr.bf16.mxu0 %v6969_v1  ;;  %6409 = vmatprep.subr.bf16.mxu1 %v6969_v1 }
 0x9d1   : > { %6390 = vmatpush3.bf16.msra.mxu0 %v6818_v23  ;;  %6410 = vmatpush3.bf16.msra.mxu1 %v6819_v24 }
 0x9d2   : > { %6391 = vmatprep.subr.bf16.mxu0 %v6969_v1  ;;  %6411 = vmatprep.subr.bf16.mxu1 %v6969_v1 }
 0x9d5   : > { %6392 = vmatpush3.bf16.msra.mxu0 %v6820_v25  ;;  %6412 = vmatpush3.bf16.msra.mxu1 %v6821_v26 }
 0x9d6   : > { %6393 = vmatprep.subr.bf16.mxu0 %v6969_v1  ;;  %6413 = vmatprep.subr.bf16.mxu1 %v6969_v1 }
 0x9d9   : > { %6394 = vmatpush3.bf16.msra.mxu0 %v6822_v27  ;;  %6414 = vmatpush3.bf16.msra.mxu1 %v6823_v28 }
 0x9da   : > { %6419 = vmatprep.subr.bf16.mxu0 %v6969_v1  ;;  %6439 = vmatprep.subr.bf16.mxu1 %v6969_v1 }
 0x9dc   : > { %6396 = vmatmul.mubr.bf16.vlgmr.msra.gmra.mrb[60].mxu0 %v7814_v20  ;;  %6416 = vmatmul.mubr.bf16.vlgmr.msra.gmra.mrb[76].mxu1 %v7814_v20 }
 0x9dd   : > { %6420 = vmatpush3.bf16.msra.mxu0 %v6824_v29  ;;  %6440 = vmatpush3.bf16.msra.mxu1 %v6825_v30 }
 0x9de   : > { %6421 = vmatprep.subr.bf16.mxu0 %v6969_v1  ;;  %6441 = vmatprep.subr.bf16.mxu1 %v6969_v1 }
 0x9df   : > { %6435 = vmatprep.mubr.msk.bf16.mxu0 %vm6970_vm0, %v6969_v1  ;;  %6455 = vmatprep.mubr.msk.bf16.mxu1 %vm6970_vm0, %v6969_v1 }
 0x9e1   : > { %6422 = vmatpush3.bf16.msra.mxu0 %v6826_v32  ;;  %6442 = vmatpush3.bf16.msra.mxu1 %v6827_v33  ;;  %v5381_v32 = vld [vmem:[%s8467_s2 + $0x12] ss:$0 sm:$0xff]  ;;  %v5382_v33 = vld [vmem:[%s8467_s2 + $0x13] ss:$0 sm:$0xff] }
 0x9e2   : > { %6423 = vmatprep.subr.bf16.mxu0 %v6969_v1  ;;  %6443 = vmatprep.subr.bf16.mxu1 %v6969_v1 }
 0x9e5   : > { %6424 = vmatpush3.bf16.msra.mxu0 %v6828_v34  ;;  %6444 = vmatpush3.bf16.msra.mxu1 %v6829_v35  ;;  %v5377_v34 = vld [vmem:[%s8467_s2 + $0xe] ss:$0 sm:$0xff]  ;;  %v5378_v35 = vld [vmem:[%s8467_s2 + $0xf] ss:$0 sm:$0xff] }
 0x9e6   : > { %6425 = vmatprep.subr.bf16.mxu0 %v6969_v1  ;;  %6445 = vmatprep.subr.bf16.mxu1 %v6969_v1 }
 0x9e9   : > { %6426 = vmatpush3.bf16.msra.mxu0 %v6830_v37  ;;  %6446 = vmatpush3.bf16.msra.mxu1 %v6831_v38 }
 0x9ea   : > { %6427 = vmatprep.subr.bf16.mxu0 %v6969_v1  ;;  %6447 = vmatprep.subr.bf16.mxu1 %v6969_v1 }
 0x9ed   : > { %6428 = vmatpush3.bf16.msra.mxu0 %v6832_v39  ;;  %6448 = vmatpush3.bf16.msra.mxu1 %v6833_v41 }
 0x9ee   : > { %6429 = vmatprep.subr.bf16.mxu0 %v6969_v1  ;;  %6449 = vmatprep.subr.bf16.mxu1 %v6969_v1 }
 0x9f1   : > { %6430 = vmatpush3.bf16.msra.mxu0 %v6834_v42  ;;  %6450 = vmatpush3.bf16.msra.mxu1 %v6835_v43 }
 0x9f2   : > { %6431 = vmatprep.subr.bf16.mxu0 %v6969_v1  ;;  %6451 = vmatprep.subr.bf16.mxu1 %v6969_v1 }
 0x9f5   : > { %6432 = vmatpush3.bf16.msra.mxu0 %v6836_v44  ;;  %6452 = vmatpush3.bf16.msra.mxu1 %v6837_v45 }
 0x9f6   : > { %6433 = vmatprep.subr.bf16.mxu0 %v6969_v1  ;;  %6453 = vmatprep.subr.bf16.mxu1 %v6969_v1 }
 0x9f9   : > { %6434 = vmatpush3.bf16.msra.mxu0 %v6838_v48  ;;  %6454 = vmatpush3.bf16.msra.mxu1 %v6839_v49 }
 0x9fa   : > { %6459 = vmatprep.subr.bf16.mxu0 %v6969_v1  ;;  %6465 = vmatprep.subr.bf16.mxu1 %v6969_v1 }
 0x9fc   : > { %6436 = vmatmul.mubr.bf16.vlgmr.msra.gmra.mrb[64].mxu0 %v7814_v20  ;;  %6456 = vmatmul.mubr.bf16.vlgmr.msra.gmra.mrb[80].mxu1 %v7814_v20 }
 0x9fd   : > { %6461 = vmatprep.mubr.msk.bf16.mxu0 %vm6970_vm0, %v6969_v1  ;;  %6467 = vmatprep.mubr.msk.bf16.mxu1 %vm6970_vm0, %v6969_v1 }
 0xa2f   : > { %v2964_v50 = vpop.f32.mrb[44].mxu0  ;;  %v3052_v51 = vpop.f32.mrb[60].mxu1 }
 0xa30   : > { %v6237_v52 = vpop.f32.mrb[45].mxu0  ;;  %v6257_v53 = vpop.f32.mrb[61].mxu1  ;;  %v2965_v19 = vadd.f32 %v5375_v3, %v2964_v50  ;;  %v3053_v47 = vadd.f32 %v5376_v4, %v3052_v51 }
 0xa31   : > { %v2967_v54 = vpop.f32.mrb[46].mxu0  ;;  %v3055_v55 = vpop.f32.mrb[62].mxu1 }
 0xa32   : > { %v6238_v56 = vpop.f32.mrb[47].mxu0  ;;  %v6258_v31 = vpop.f32.mrb[63].mxu1  ;;  %v3938_v27 = vmul.f32 0.35355338, %v2965_v19  ;;  %v3939_v28 = vmul.f32 0.35355338, %v3053_v47 }
 0xa34   : > { %v3942_v29 = vpack.c.bf16 %v3938_v27, %v3938_v27  ;;  %v3943_v30 = vpack.c.bf16 %v3939_v28, %v3939_v28 }
 0xa4f   : > { %v3140_v57 = vpop.f32.mrb[48].mxu0  ;;  %v3228_v59 = vpop.f32.mrb[64].mxu1 }
 0xa50   : > { %v6277_v60 = vpop.f32.mrb[49].mxu0  ;;  %v6297_v61 = vpop.f32.mrb[65].mxu1  ;;  %v3141_v48 = vadd.f32 %v5377_v34, %v3140_v57  ;;  %v3229_v49 = vadd.f32 %v5378_v35, %v3228_v59  ;;  %v5383_v57 = vld [vmem:[%s8467_s2 + $0x14] ss:$0 sm:$0xff]  ;;  %v5384_v59 = vld [vmem:[%s8467_s2 + $0x15] ss:$0 sm:$0xff] }
 0xa51   : > { %v3143_v62 = vpop.f32.mrb[50].mxu0  ;;  %v3231_v20 = vpop.f32.mrb[66].mxu1 }
 0xa52   : > { %v6278_v18 = vpop.f32.mrb[51].mxu0  ;;  %v6298_v63 = vpop.f32.mrb[67].mxu1  ;;  %v3940_v56 = vmul.f32 0.35355338, %v3141_v48  ;;  %v3941_v31 = vmul.f32 0.35355338, %v3229_v49 }
 0xa54   : > { %v3944_v60 = vpack.c.bf16 %v3940_v56, %v3940_v56  ;;  %v3945_v61 = vpack.c.bf16 %v3941_v31, %v3941_v31 }
 0xa6f   : > { %v3316_v5 = vpop.f32.mrb[52].mxu0  ;;  %v3404_v6 = vpop.f32.mrb[68].mxu1 }
 0xa70   : > { %v3317_v9 = vadd.f32 %v5379_v0, %v3316_v5  ;;  %v3405_v10 = vadd.f32 %v5380_v2, %v3404_v6  ;;  %v6317_v11 = vpop.f32.mrb[53].mxu0  ;;  %v6337_v12 = vpop.f32.mrb[69].mxu1 }
 0xa71   : > { %v3319_v13 = vpop.f32.mrb[54].mxu0  ;;  %v3407_v17 = vpop.f32.mrb[70].mxu1 }
 0xa72   : > { %v3946_v21 = vpack.c.bf16 %v3317_v9, %v3317_v9  ;;  %v3947_v22 = vpack.c.bf16 %v3405_v10, %v3405_v10  ;;  %v6318_v23 = vpop.f32.mrb[55].mxu0  ;;  %v6338_v24 = vpop.f32.mrb[71].mxu1 }
 0xa74   : > { %v3954_v25 = vsel %vm1707_vm1, %v3946_v21, 0  ;;  %v4000_v26 = vsel %vm1707_vm1, %v3947_v22, 0 }
 0xa75   : > { %6460 = vmatpush3.bf16.xpose.msra.mxu0 %v3954_v25  ;;  %6466 = vmatpush3.bf16.xpose.msra.mxu1 %v4000_v26 }
 0xa76   : > { %6471 = vmatprep.subr.bf16.mxu0 %v6969_v1  ;;  %6477 = vmatprep.subr.bf16.mxu1 %v6969_v1 }
 0xa7c   : > { %6462 = vmatmul.mubr.msk.bf16.vlgmr.msra.gmra.mrb[68].mxu0 %vm1707_vm1, %v3942_v29  ;;  %6468 = vmatmul.mubr.msk.bf16.vlgmr.msra.gmra.mrb[84].mxu1 %vm1707_vm1, %v3943_v30 }
 0xa7d   : > { %6473 = vmatprep.mubr.msk.bf16.mxu0 %vm6970_vm0, %v6969_v1  ;;  %6479 = vmatprep.mubr.msk.bf16.mxu1 %vm6970_vm0, %v6969_v1 }
 0xa8f   : > { %v3492_v37 = vpop.f32.mrb[56].mxu0  ;;  %v3580_v38 = vpop.f32.mrb[72].mxu1 }
 0xa90   : > { %v3493_v39 = vadd.f32 %v5381_v32, %v3492_v37  ;;  %v3581_v41 = vadd.f32 %v5382_v33, %v3580_v38  ;;  %v6357_v42 = vpop.f32.mrb[57].mxu0  ;;  %v6377_v43 = vpop.f32.mrb[73].mxu1 }
 0xa91   : > { %v3495_v44 = vpop.f32.mrb[58].mxu0  ;;  %v3583_v45 = vpop.f32.mrb[74].mxu1 }
 0xa92   : > { %v3948_v50 = vpack.c.bf16 %v3493_v39, %v3493_v39  ;;  %v3949_v51 = vpack.c.bf16 %v3581_v41, %v3581_v41  ;;  %v6358_v52 = vpop.f32.mrb[59].mxu0  ;;  %v6378_v53 = vpop.f32.mrb[75].mxu1 }
 0xa94   : > { %v4046_v54 = vsel %vm1707_vm1, %v3948_v50, 0  ;;  %v4092_v55 = vsel %vm1707_vm1, %v3949_v51, 0 }
 0xa95   : > { %6472 = vmatpush3.bf16.xpose.msra.mxu0 %v4046_v54  ;;  %6478 = vmatpush3.bf16.xpose.msra.mxu1 %v4092_v55 }
 0xa96   : > { %6483 = vmatprep.subr.bf16.mxu0 %v6969_v1  ;;  %6489 = vmatprep.subr.bf16.mxu1 %v6969_v1 }
 0xa9c   : > { %6474 = vmatmul.mubr.msk.bf16.vlgmr.msra.gmra.mrb[72].mxu0 %vm1707_vm1, %v3944_v60  ;;  %6480 = vmatmul.mubr.msk.bf16.vlgmr.msra.gmra.mrb[88].mxu1 %vm1707_vm1, %v3945_v61 }
 0xa9d   : > { %6485 = vmatprep.mubr.msk.bf16.mxu0 %vm6970_vm0, %v6969_v1  ;;  %6491 = vmatprep.mubr.msk.bf16.mxu1 %vm6970_vm0, %v6969_v1 }
 0xaaf   : > { %v3668_v62 = vpop.f32.mrb[60].mxu0  ;;  %v3756_v20 = vpop.f32.mrb[76].mxu1 }
 0xab0   : > { %v3669_v18 = vadd.f32 %v5383_v57, %v3668_v62  ;;  %v3757_v63 = vadd.f32 %v5384_v59, %v3756_v20  ;;  %v6397_v0 = vpop.f32.mrb[61].mxu0  ;;  %v6417_v2 = vpop.f32.mrb[77].mxu1 }
 0xab1   : > { %v3671_v3 = vpop.f32.mrb[62].mxu0  ;;  %v3759_v4 = vpop.f32.mrb[78].mxu1 }
 0xab2   : > { %v4182_v5 = vpack.c.bf16 %v3669_v18, %v3669_v18  ;;  %v4183_v6 = vpack.c.bf16 %v3757_v63, %v3757_v63  ;;  %v6398_v9 = vpop.f32.mrb[63].mxu0  ;;  %v6418_v10 = vpop.f32.mrb[79].mxu1 }
 0xab3   : > { %v5386_v9 = vld [vmem:[%s8467_s2 + $0x17] ss:$0 sm:$0xff]  ;;  %v5385_v10 = vld [vmem:[%s8467_s2 + $0x16] ss:$0 sm:$0xff] }
 0xab4   : > { %v4190_v11 = vsel %vm1947_vm2, %v4182_v5, 0  ;;  %v4236_v12 = vsel %vm1947_vm2, %v4183_v6, 0 }
 0xab5   : > { %6484 = vmatpush3.bf16.msra.mxu0 %v4190_v11  ;;  %6490 = vmatpush3.bf16.msra.mxu1 %v4236_v12 }
 0xab6   : > { %6495 = vmatprep.subr.bf16.mxu0 %v6969_v1  ;;  %6501 = vmatprep.subr.bf16.mxu1 %v6969_v1 }
 0xacf   : > { %v8220_v13 = vpop.f32.mrb[64].mxu0  ;;  %v8222_v17 = vpop.f32.mrb[80].mxu1 }
 0xad0   : > { %v6437_v19 = vpop.f32.mrb[65].mxu0  ;;  %v6457_v47 = vpop.f32.mrb[81].mxu1  ;;  %v3933_v11 = vadd.f32 %v5386_v9, %v8222_v17  ;;  %v3845_v12 = vadd.f32 %v5385_v10, %v8220_v13 }
 0xad1   : > { %v3847_v21 = vpop.f32.mrb[66].mxu0  ;;  %v3935_v22 = vpop.f32.mrb[82].mxu1 }
 0xad2   : > { %v6438_v23 = vpop.f32.mrb[67].mxu0  ;;  %v6458_v24 = vpop.f32.mrb[83].mxu1  ;;  %v4185_v21 = vpack.c.bf16 %v3933_v11, %v3933_v11 }
 0xad3   : > { %v4184_v23 = vpack.c.bf16 %v3845_v12, %v3845_v12 }
 0xb4f   : > { %v3990_v25 = vpop.f32.mrb[68].mxu0  ;;  %v4036_v26 = vpop.f32.mrb[84].mxu1 }
 0xb50   : > { %v6463_v27 = vpop.f32.mrb[69].mxu0  ;;  %v6469_v28 = vpop.f32.mrb[85].mxu1  ;;  %v4137_v29 = vsel %vm1707_vm1, %v4036_v26, -inf  ;;  %v4134_v30 = vsel %vm1707_vm1, %v3990_v25, -inf }
 0xb51   : > { %4138 = vmax.xlane.f32.xlu1 %v4137_v29  ;;  %v4039_v32 = vpop.f32.mrb[86].mxu1  ;;  %4135 = vmax.xlane.f32.xlu0 %v4134_v30  ;;  %v3993_v33 = vpop.f32.mrb[70].mxu0  ;;  %v4328_v27 = vsel %vm1947_vm2, %v4185_v21, 0  ;;  %v4282_v28 = vsel %vm1947_vm2, %v4184_v23, 0 }
 0xb52   : > { %v6464_v34 = vpop.f32.mrb[71].mxu0  ;;  %v6470_v35 = vpop.f32.mrb[87].mxu1 }
 0xb6f   : > { %v4082_v37 = vpop.f32.mrb[72].mxu0  ;;  %v4128_v38 = vpop.f32.mrb[88].mxu1 }
 0xb70   : > { %v6475_v39 = vpop.f32.mrb[73].mxu0  ;;  %v6481_v41 = vpop.f32.mrb[89].mxu1  ;;  %v4143_v42 = vsel %vm1707_vm1, %v4128_v38, -inf  ;;  %v4140_v43 = vsel %vm1707_vm1, %v4082_v37, -inf }
 0xb71   : > { %4144 = vmax.xlane.f32.xlu1 %v4143_v42  ;;  %v4131_v44 = vpop.f32.mrb[90].mxu1  ;;  %4141 = vmax.xlane.f32.xlu0 %v4140_v43  ;;  %v4085_v45 = vpop.f32.mrb[74].mxu0  ;;  %v5373_v42 = vld [vmem:[%s8468_s3 + $0x1c] sm:$0xf]  ;;  %v5372_v43 = vld [vmem:[%s8468_s3 + $0x18] sm:$0xf] }
 0xb72   : > { %v6476_v48 = vpop.f32.mrb[75].mxu0  ;;  %v6482_v49 = vpop.f32.mrb[91].mxu1 }
 0xbde   : > { %v4139_v50 = vpop.xlane.xlu1 %4138  ;;  %v4136_v51 = vpop.xlane.xlu0 %4135 }
 0xbdf   : > { %v4147_v52 = vsub.f32 %v4036_v26, %v4139_v50  ;;  %v4146_v53 = vsub.f32 %v3990_v25, %v4136_v51  ;;  %v4516_v50 = vsel %vm1947_vm2, %v5373_v42, 0  ;;  %v6844_v42 = vld [vmem:[%s8470_s5 + $0x60] sm:$0xff]  }
 0xbe1   : > { %v4152_v54 = vmul.f32 1.442695, %v4147_v52  ;;  %v4150_v55 = vmul.f32 1.442695, %v4146_v53 }
 0xbe3   : > { %6884 = vpow2.f32 %v4152_v54  ;;  %v4470_v54 = vsel %vm1947_vm2, %v5372_v43, 0  ;;  %v6845_v43 = vld [vmem:[%s8470_s5 + $0x68] sm:$0xff]  }
 0xbe4   : > { %6886 = vpow2.f32 %v4150_v55 }
 0xbed   : > { %v6885_v56 = vpop.eup %6884 }
 0xbee   : > { %v6887_v31 = vpop.eup %6886  ;;  %v4161_v60 = vsel %vm1707_vm1, %v6885_v56, 0.0 }
 0xbef   : > { %4162 = vadd.xlane.f32.xlu1 %v4161_v60  ;;  %v4158_v61 = vsel %vm1707_vm1, %v6887_v31, 0.0 }
 0xbf0   : > { %4159 = vadd.xlane.f32.xlu0 %v4158_v61 }
 0xbfe   : > { %v4145_v57 = vpop.xlane.xlu1 %4144  ;;  %v4142_v59 = vpop.xlane.xlu0 %4141 }
 0xbff   : > { %v4149_v62 = vsub.f32 %v4128_v38, %v4145_v57  ;;  %v4148_v20 = vsub.f32 %v4082_v37, %v4142_v59  ;;  %v5370_v37 = vld [vmem:[%s8468_s3 + $0x10] sm:$0xf]  ;;  %v5371_v38 = vld [vmem:[%s8468_s3 + $0x14] sm:$0xf] }
 0xc00   : > { %v4378_v39 = vsel %vm1947_vm2, %v5370_v37, 0  ;;  %v4424_v41 = vsel %vm1947_vm2, %v5371_v38, 0 }
 0xc01   : > { %v4156_v18 = vmul.f32 1.442695, %v4149_v62  ;;  %v4154_v63 = vmul.f32 1.442695, %v4148_v20 }
 0xc03   : > { %6888 = vpow2.f32 %v4156_v18 }
 0xc04   : > { %6890 = vpow2.f32 %v4154_v63 }
 0xc0d   : > { %v6889_v0 = vpop.eup %6888 }
 0xc0e   : > { %v6891_v2 = vpop.eup %6890  ;;  %v4167_v3 = vsel %vm1707_vm1, %v6889_v0, 0.0 }
 0xc0f   : > { %4168 = vadd.xlane.f32.xlu1 %v4167_v3  ;;  %v4164_v4 = vsel %vm1707_vm1, %v6891_v2, 0.0 }
 0xc10   : > { %4165 = vadd.xlane.f32.xlu0 %v4164_v4 }
 0xc7c   : > { %v4163_v5 = vpop.xlane.xlu1 %4162 }
 0xc7d   : > { %6892 = vrcp.f32 %v4163_v5  ;;  %v4160_v6 = vpop.xlane.xlu0 %4159 }
 0xc7e   : > { %6894 = vrcp.f32 %v4160_v6 }
 0xc87   : > { %v6893_v19 = vpop.eup %6892 }
 0xc88   : > { %v6895_v47 = vpop.eup %6894  ;;  %v4175_v22 = vmul.f32 %v6893_v19, %v6885_v56 }
 0xc89   : > { %v4174_v24 = vmul.f32 %v6895_v47, %v6887_v31  ;;  %v8291_v47 = vld [vmem:[%s8469_s4 + $0x8] sm:$0x3f] }
 0xc8a   : > { %v4179_v25 = vpack.c.bf16 %v4175_v22, %v4175_v22 }
 0xc8b   : > { %v4178_v26 = vpack.c.bf16 %v4174_v24, %v4174_v24 }
 0xc8c   : > { %6492 = vmatmul.mubr.msk.bf16.vlgmr.msra.gmra.mrb[92].mxu1 %vm1707_vm1, %v4179_v25  ;;  %v4564_v25 = vrot.slane %v8291_v47, %v2322_v46 }
 0xc8d   : > { %6486 = vmatmul.mubr.msk.bf16.vlgmr.msra.gmra.mrb[76].mxu0 %vm1707_vm1, %v4178_v26  ;;  %6502 = vmatpush3.bf16.msra.mxu1 %v4328_v27 }
 0xc8e   : > { %6496 = vmatpush3.bf16.msra.mxu0 %v4282_v28  ;;  %6497 = vmatprep.mubr.msk.bf16.mxu0 %vm6970_vm0, %v6969_v1 }
 0xc8f   : > { %6503 = vmatprep.mubr.msk.bf16.mxu1 %vm6970_vm0, %v6969_v1  ;;  %6507 = vmatprep.subr.bf16.mxu0 %v6969_v1 }
 0xc90   : > { %6513 = vmatprep.subr.bf16.mxu1 %v6969_v1 }
 0xc9c   : > { %v4169_v13 = vpop.xlane.xlu1 %4168 }
 0xc9d   : > { %6896 = vrcp.f32 %v4169_v13  ;;  %v4166_v17 = vpop.xlane.xlu0 %4165 }
 0xc9e   : > { %6898 = vrcp.f32 %v4166_v17 }
 0xca7   : > { %v6897_v29 = vpop.eup %6896 }
 0xca8   : > { %v6899_v30 = vpop.eup %6898  ;;  %v4177_v32 = vmul.f32 %v6897_v29, %v6889_v0 }
 0xca9   : > { %v4176_v33 = vmul.f32 %v6899_v30, %v6891_v2 }
 0xcaa   : > { %v4181_v34 = vpack.c.bf16 %v4177_v32, %v4177_v32 }
 0xcab   : > { %v4180_v35 = vpack.c.bf16 %v4176_v33, %v4176_v33  ;;  %v6840_v33 = vld [vmem:[%s8470_s5 + $0x40] sm:$0xff]  }
 0xcac   : > { %6504 = vmatmul.mubr.msk.bf16.vlgmr.msra.gmra.mrb[96].mxu1 %vm1707_vm1, %v4181_v34  ;;  %v6841_v34 = vld [vmem:[%s8470_s5 + $0x48] sm:$0xff]  }
 0xcad   : > { %6498 = vmatmul.mubr.msk.bf16.vlgmr.msra.gmra.mrb[80].mxu0 %vm1707_vm1, %v4180_v35  ;;  %6515 = vmatprep.mubr.msk.bf16.mxu1 %vm6970_vm0, %v6969_v1 }
 0xcae   : > { %6509 = vmatprep.mubr.msk.bf16.mxu0 %vm6970_vm0, %v6969_v1  ;;  %6508 = vmatpush3.bf16.msra.mxu0 %v4378_v39  ;;  %v6842_v39 = vld [vmem:[%s8470_s5 + $0x50] sm:$0xff]  }
 0xcaf   : > { %6514 = vmatpush3.bf16.msra.mxu1 %v4424_v41  ;;  %6519 = vmatprep.subr.bf16.mxu0 %v6969_v1  ;;  %v6843_v41 = vld [vmem:[%s8470_s5 + $0x58] sm:$0xff]  }
 0xcb0   : > { %6525 = vmatprep.subr.bf16.mxu1 %v6969_v1 }
 0xd5f   : > { %v4272_v44 = vpop.f32.mrb[92].mxu1 }
 0xd60   : > { %v4226_v45 = vpop.f32.mrb[76].mxu0  ;;  %v4371_v48 = vpack.c.bf16 %v4272_v44, %v4272_v44  ;;  %v6493_v49 = vpop.f32.mrb[93].mxu1  ;;  %v6846_v44 = vld [vmem:[%s8470_s5 + $0x70] sm:$0xff]  }
 0xd61   : > { %v4370_v51 = vpack.c.bf16 %v4226_v45, %v4226_v45  ;;  %v6487_v52 = vpop.f32.mrb[77].mxu0  ;;  %v4275_v53 = vpop.f32.mrb[94].mxu1  ;;  %v6847_v45 = vld [vmem:[%s8470_s5 + $0x78] sm:$0xff]   ;;  %v6849_v49 = vld [vmem:[%s8472_s7 + $0x48] sm:$0xff]  }
 0xd62   : > { %v4229_v55 = vpop.f32.mrb[78].mxu0  ;;  %v6494_v56 = vpop.f32.mrb[95].mxu1  ;;  %6516 = vmatmul.mubr.msk.bf16.vlgmr.msra.gmra.mrb[100].mxu1 %vm1707_vm1, %v4371_v48  ;;  %v6848_v48 = vld [vmem:[%s8472_s7 + $0x40] sm:$0xff]   ;;  %v6853_v53 = vld [vmem:[%s8472_s7 + $0x68] sm:$0xff]  }
 0xd63   : > { %v6488_v31 = vpop.f32.mrb[79].mxu0  ;;  %6510 = vmatmul.mubr.msk.bf16.vlgmr.msra.gmra.mrb[84].mxu0 %vm1707_vm1, %v4370_v51  ;;  %6526 = vmatpush3.bf16.msra.mxu1 %v4516_v50  ;;  %v6850_v50 = vld [vmem:[%s8472_s7 + $0x50] sm:$0xff]   ;;  %v6851_v51 = vld [vmem:[%s8472_s7 + $0x58] sm:$0xff]   ;;  %v6852_v52 = vld [vmem:[%s8472_s7 + $0x60] sm:$0xff]  }
 0xd64   : > { %6520 = vmatpush3.bf16.msra.mxu0 %v4470_v54  ;;  %6521 = vmatprep.mubr.msk.bf16.mxu0 %vm6970_vm0, %v6969_v1  ;;  %v4582_v31 = vrot.slane %v8291_v47, %v2343_v15  ;;  %v6855_v15 = vld [vmem:[%s8472_s7 + $0x78] sm:$0xff]  }
 0xd65   : > { %6527 = vmatprep.mubr.msk.bf16.mxu1 %vm6970_vm0, %v6969_v1  ;;  %6531 = vmatprep.subr.bf16.mxu0 %v6969_v1 }
 0xd66   : > { %6551 = vmatprep.subr.bf16.mxu1 %v6969_v1 }
 0xd7f   : > { %v4364_v60 = vpop.f32.mrb[96].mxu1 }
 0xd80   : > { %v4318_v61 = vpop.f32.mrb[80].mxu0  ;;  %v4373_v57 = vpack.c.bf16 %v4364_v60, %v4364_v60  ;;  %v6505_v59 = vpop.f32.mrb[97].mxu1 }
 0xd81   : > { %v4372_v62 = vpack.c.bf16 %v4318_v61, %v4318_v61  ;;  %v6499_v20 = vpop.f32.mrb[81].mxu0  ;;  %v4367_v18 = vpop.f32.mrb[98].mxu1 }
 0xd82   : > { %v4321_v63 = vpop.f32.mrb[82].mxu0  ;;  %v6506_v0 = vpop.f32.mrb[99].mxu1  ;;  %6528 = vmatmul.mubr.msk.bf16.vlgmr.msra.gmra.mrb[104].mxu1 %vm1707_vm1, %v4373_v57  ;;  %v4587_v57 = vrot.slane %v8291_v47, %v2348_v16  ;;  %v6854_v18 = vld [vmem:[%s8472_s7 + $0x70] sm:$0xff]   ;;  %v5512_v16 = vld [vmem:[%s8471_s6 + $0x1] ss:$0 sm:$0xff] }
 0xd83   : > { %v6500_v2 = vpop.f32.mrb[83].mxu0  ;;  %6522 = vmatmul.mubr.msk.bf16.vlgmr.msra.gmra.mrb[88].mxu0 %vm1707_vm1, %v4372_v62  ;;  %6567 = vmatprep.mubr.msk.bf16.mxu1 %vm6970_vm0, %v6969_v1 }
 0xd84   : > { %6547 = vmatprep.mubr.msk.bf16.mxu0 %vm6970_vm0, %v6969_v1  ;;  %6532 = vmatpush3.bf16.msra.mxu0 %v6840_v33 }
 0xd85   : > { %6533 = vmatprep.subr.bf16.mxu0 %v6969_v1  ;;  %6552 = vmatpush3.bf16.msra.mxu1 %v6848_v48 }
 0xd86   : > { %6553 = vmatprep.subr.bf16.mxu1 %v6969_v1 }
 0xd88   : > { %6534 = vmatpush3.bf16.msra.mxu0 %v6841_v34 }
 0xd89   : > { %6535 = vmatprep.subr.bf16.mxu0 %v6969_v1  ;;  %6554 = vmatpush3.bf16.msra.mxu1 %v6849_v49 }
 0xd8a   : > { %6555 = vmatprep.subr.bf16.mxu1 %v6969_v1 }
 0xd8c   : > { %6536 = vmatpush3.bf16.msra.mxu0 %v6842_v39 }
 0xd8d   : > { %6537 = vmatprep.subr.bf16.mxu0 %v6969_v1  ;;  %6556 = vmatpush3.bf16.msra.mxu1 %v6850_v50 }
 0xd8e   : > { %6557 = vmatprep.subr.bf16.mxu1 %v6969_v1 }
 0xd90   : > { %6538 = vmatpush3.bf16.msra.mxu0 %v6843_v41 }
 0xd91   : > { %6539 = vmatprep.subr.bf16.mxu0 %v6969_v1  ;;  %6558 = vmatpush3.bf16.msra.mxu1 %v6851_v51 }
 0xd92   : > { %6559 = vmatprep.subr.bf16.mxu1 %v6969_v1 }
 0xd94   : > { %6540 = vmatpush3.bf16.msra.mxu0 %v6844_v42 }
 0xd95   : > { %6541 = vmatprep.subr.bf16.mxu0 %v6969_v1  ;;  %6560 = vmatpush3.bf16.msra.mxu1 %v6852_v52 }
 0xd96   : > { %6561 = vmatprep.subr.bf16.mxu1 %v6969_v1 }
 0xd98   : > { %6542 = vmatpush3.bf16.msra.mxu0 %v6845_v43 }
 0xd99   : > { %6543 = vmatprep.subr.bf16.mxu0 %v6969_v1  ;;  %6562 = vmatpush3.bf16.msra.mxu1 %v6853_v53 }
 0xd9a   : > { %6563 = vmatprep.subr.bf16.mxu1 %v6969_v1 }
 0xd9c   : > { %6544 = vmatpush3.bf16.msra.mxu0 %v6846_v44 }
 0xd9d   : > { %6545 = vmatprep.subr.bf16.mxu0 %v6969_v1  ;;  %6564 = vmatpush3.bf16.msra.mxu1 %v6854_v18 }
 0xd9e   : > { %6565 = vmatprep.subr.bf16.mxu1 %v6969_v1 }
 0xda0   : > { %6546 = vmatpush3.bf16.msra.mxu0 %v6847_v45 }
 0xda1   : > { %6571 = vmatprep.subr.bf16.mxu0 %v6969_v1  ;;  %6566 = vmatpush3.bf16.msra.mxu1 %v6855_v15 }
 0xe35   : > { %v4460_v3 = vpop.f32.mrb[100].mxu1 }
 0xe36   : > { %v4414_v4 = vpop.f32.mrb[84].mxu0  ;;  %v6517_v5 = vpop.f32.mrb[101].mxu1 }
 0xe37   : > { %v4558_v6 = vadd.f32 %v4460_v3, %v4414_v4  ;;  %v6511_v9 = vpop.f32.mrb[85].mxu0  ;;  %v4463_v10 = vpop.f32.mrb[102].mxu1 }
 0xe38   : > { %v4417_v11 = vpop.f32.mrb[86].mxu0  ;;  %v6518_v12 = vpop.f32.mrb[103].mxu1  ;;  %v4725_v9 = vrot.slane %v8291_v47, %v2483_v36 }
 0xe39   : > { %v6512_v19 = vpop.f32.mrb[87].mxu0 }
 0xe55   : > { %v4552_v21 = vpop.f32.mrb[104].mxu1 }
 0xe56   : > { %v4506_v22 = vpop.f32.mrb[88].mxu0  ;;  %v6529_v23 = vpop.f32.mrb[105].mxu1 }
 0xe57   : > { %v4559_v24 = vadd.f32 %v4558_v6, %v4506_v22  ;;  %v6523_v26 = vpop.f32.mrb[89].mxu0  ;;  %v4555_v27 = vpop.f32.mrb[106].mxu1  ;;  %v6856_v23 = vld [vmem:[%s8473_s8] sm:$0xff]  }
 0xe58   : > { %v4509_v28 = vpop.f32.mrb[90].mxu0  ;;  %v6530_v13 = vpop.f32.mrb[107].mxu1 }
 0xe59   : > { %v4560_v17 = vadd.f32 %v4559_v24, %v4552_v21  ;;  %v6524_v29 = vpop.f32.mrb[91].mxu0  ;;  %v6857_v24 = vld [vmem:[%s8473_s8 + $0x8] sm:$0xff]   ;;  %v6858_v13 = vld [vmem:[%s8473_s8 + $0x10] sm:$0xff]  }
 0xe5a   : > { %v6861_v29 = vld [vmem:[%s8473_s8 + $0x28] sm:$0xff]  }
 0xe5b   : > { %v4565_v30 = vadd.f32 %v4564_v25, %v4560_v17  ;;  %v6859_v17 = vld [vmem:[%s8473_s8 + $0x18] sm:$0xff]  }
 0xe5d   : > { %v4566_v32 = vadd.f32 %v4565_v30, %v7804_v14  ;;  %v6862_v30 = vld [vmem:[%s8473_s8 + $0x30] sm:$0xff]  }
 0xe5f   : > { %4567 = vadd.xlane.f32.xlu0 %v4566_v32 }
 0xeec   : > { %v4568_v46 = vpop.xlane.xlu0 %4567 }
 0xeed   : > { %v4569_v35 = vmul.f32 0.041666668, %v4568_v46 }
 0xeef   : > { %v4570_v37 = vsub.f32 %v4566_v32, %v4569_v35  ;;  %v6863_v32 = vld [vmem:[%s8473_s8 + $0x38] sm:$0xff]   ;;  %v4830_v35 = vrot.slane %v8291_v47, %v2588_v7 }
 0xef1   : > { %v4571_v14 = vsel %vm2331_vm3, %v4570_v37, 0.0 }
 0xef2   : > { %v4572_v38 = vmul.f32 %v4571_v14, %v4571_v14 }
 0xef4   : > { %4573 = vadd.xlane.f32.xlu1 %v4572_v38  ;;  %v4835_v38 = vrot.slane %v8291_v47, %v2593_v8 }
 0xf81   : > { %v4574_v54 = vpop.xlane.xlu1 %4573 }
 0xf82   : > { %v4575_v55 = vmul.f32 0.041666668, %v4574_v54 }
 0xf84   : > { %v4576_v56 = vadd.f32 1e-05, %v4575_v55 }
 0xf86   : > { %6900 = vrsqrt.f32 %v4576_v56 }
 0xf90   : > { %v6901_v60 = vpop.eup %6900 }
 0xf91   : > { %v4578_v61 = vmul.f32 %v6901_v60, %v4571_v14 }
 0xf93   : > { %v4583_v59 = vmul.f32 %v4582_v31, %v4578_v61 }
 0xf95   : > { %v4588_v62 = vadd.f32 %v4587_v57, %v4583_v59 }
 0xf97   : > { %v4589_v20 = vpack.c.bf16 %v4588_v62, %v4588_v62 }
 0xf99   : > { %6548 = vmatmul.mubr.bf16.vlgmr.msra.gmra.mrb[92].mxu0 %v4589_v20 }
 0xf9a   : > { %6587 = vmatprep.mubr.msk.bf16.mxu0 %vm6970_vm0, %v6969_v1  ;;  %6572 = vmatpush3.bf16.msra.mxu0 %v6856_v23 }
 0xf9b   : > { %6573 = vmatprep.subr.bf16.mxu0 %v6969_v1 }
 0xf9e   : > { %6574 = vmatpush3.bf16.msra.mxu0 %v6857_v24 }
 0xf9f   : > { %6575 = vmatprep.subr.bf16.mxu0 %v6969_v1 }
 0xfa2   : > { %6576 = vmatpush3.bf16.msra.mxu0 %v6858_v13 }
 0xfa3   : > { %6577 = vmatprep.subr.bf16.mxu0 %v6969_v1 }
 0xfa6   : > { %6578 = vmatpush3.bf16.msra.mxu0 %v6859_v17 }
 0xfa7   : > { %6579 = vmatprep.subr.bf16.mxu0 %v6969_v1 }
 0xfaa   : > { %6580 = vmatpush3.bf16.msra.mxu0 %v6860_v58 }
 0xfab   : > { %6581 = vmatprep.subr.bf16.mxu0 %v6969_v1 }
 0xfae   : > { %6582 = vmatpush3.bf16.msra.mxu0 %v6861_v29 }
 0xfaf   : > { %6583 = vmatprep.subr.bf16.mxu0 %v6969_v1 }
 0xfb2   : > { %6584 = vmatpush3.bf16.msra.mxu0 %v6862_v30 }
 0xfb3   : > { %6585 = vmatprep.subr.bf16.mxu0 %v6969_v1  ;;  %v5545_v1 = vld [vmem:[%s8474_s9] ss:$0 sm:$0xff] }
 0xfb6   : > { %6586 = vmatpush3.bf16.msra.mxu0 %v6863_v32 }
0x106c   : > { %v4697_v63 = vpop.f32.mrb[92].mxu0 }
0x106d   : > { %v4698_v0 = vadd.f32 %v5512_v16, %v4697_v63  ;;  %v6549_v2 = vpop.f32.mrb[93].mxu0 }
0x106e   : > { %v4700_v3 = vpop.f32.mrb[94].mxu0 }
0x106f   : > { %v4703_v4 = vmax.f32 %v4698_v0, 0.0  ;;  %v6550_v5 = vpop.f32.mrb[95].mxu0 }
0x1071   : > { %v4704_v6 = vpack.c.bf16 %v4703_v4, %v4703_v4 }
0x1073   : > { %6568 = vmatmul.mubr.bf16.vlgmr.msra.gmra.mrb[108].mxu1 %v4704_v6 }
0x1146   : > { %v4808_v10 = vpop.f32.mrb[108].mxu1 }
0x1147   : > { %v4809_v11 = vadd.f32 %v4808_v10, %v4725_v9  ;;  %v6569_v12 = vpop.f32.mrb[109].mxu1 }
0x1148   : > { %v4811_v19 = vpop.f32.mrb[110].mxu1 }
0x1149   : > { %v6570_v21 = vpop.f32.mrb[111].mxu1  ;;  %v4814_v22 = vadd.f32 %v4809_v11, %v4588_v62 }
0x114b   : > { %4815 = vadd.xlane.f32.xlu0 %v4814_v22 }
0x11d8   : > { %v4816_v36 = vpop.xlane.xlu0 %4815 }
0x11d9   : > { %v4817_v25 = vmul.f32 0.041666668, %v4816_v36 }
0x11db   : > { %v4818_v26 = vsub.f32 %v4814_v22, %v4817_v25 }
0x11dd   : > { %v4819_v27 = vsel %vm2331_vm3, %v4818_v26, 0.0 }
0x11de   : > { %v4820_v28 = vmul.f32 %v4819_v27, %v4819_v27 }
0x11e0   : > { %4821 = vadd.xlane.f32.xlu1 %v4820_v28 }
0x126d   : > { %v4822_v33 = vpop.xlane.xlu1 %4821 }
0x126e   : > { %v4823_v34 = vmul.f32 0.041666668, %v4822_v33 }
0x1270   : > { %v4824_v46 = vadd.f32 1e-05, %v4823_v34 }
0x1272   : > { %6902 = vrsqrt.f32 %v4824_v46 }
0x127c   : > { %v6903_v37 = vpop.eup %6902 }
0x127d   : > { %v4826_v14 = vmul.f32 %v6903_v37, %v4819_v27 }
0x127f   : > { %v4831_v39 = vmul.f32 %v4830_v35, %v4826_v14 }
0x1281   : > { %v4836_v41 = vadd.f32 %v4835_v38, %v4831_v39 }
0x1283   : > { %v4837_v42 = vpack.c.bf16 %v4836_v41, %v4836_v41 }
0x1285   : > { %6588 = vmatmul.mubr.bf16.vlgmr.msra.gmra.mrb[96].mxu0 %v4837_v42 }
0x1358   : > { %v4943_v7 = vpop.f32.mrb[96].mxu0 }
0x1359   : > { %v4944_v43 = vadd.f32 %v5545_v1, %v4943_v7  ;;  %v6589_v44 = vpop.f32.mrb[97].mxu0 }
0x135a   : > { %v4946_v40 = vpop.f32.mrb[98].mxu0 }
0x135b   : > { %4949 = vst [vmem:[%s350_s29] sm:$0xff] %v4944_v43  ;;  %v6590_v8 = vpop.f32.mrb[99].mxu0 }
0x135c   : > { %6918 = shalt.err (!%p6915_p3)
}
0x135d   : > { %s6919_s20 = scalar_lea.hbm %s8423_s21, 128  ;;  %s6923_s11 = scalar_lea.hbm %s8475_s10, 256 }
0x135e   : > { %p6920_p4 = scmp.ne.s32.totalorder %s8423_s21, %s6919_s20  ;;  %p6924_p9 = scmp.lt.u32.totalorder %s8423_s21, %s8475_s10 }
0x135f   : > { %p6925_p10 = scmp.lt.u32.totalorder %s6923_s11, %s6919_s20  ;;  %p6927_p12 = scmp.lt.u32.totalorder %s6919_s20, %s8423_s21 }
0x1360   : > { %p6921_p7 = pnand %p6920_p4, %p7065_p5 }
0x1361   : > { %p6926_p11 = por %p6925_p10, %p6924_p9 }
0x1362   : > { %p6922_p8 = pneg %p6921_p7 }
0x1363   : > { %p6928_p13 = por %p6927_p12, %p6926_p11 }
0x1365   : > { %p6929_p0 = pnand %p6928_p13, %p6922_p8 }
0x1367   : > { %6932 = shalt.err (!%p6929_p0)
}
0x1368   : > { %6591 = dma.vmem_to_hbm [thread:$0]  (%p7065_p5), %s8425_s30, 128, %s8423_s21, %s4951_s25  }
0x1369 PF: > { %p6597_p1 = scmp.ge.s32.totalorder %s6967_s16, 2  ;;  %s4976_s17 = sand.u32 1, %s6955_s13  }
0x136a   : > { %s4977_s18 = scalar_lea.sflag [#allocation3], %s4976_s17 }
0x136b   : > { %p6594_p2 = pnand %p6597_p1, %p7069_p6 }
0x136d   : > { %6950 = dma.done.wait (!%p6594_p2), %s4977_s18, 128  }
0x136e   : > { %6952 = vsyncadd (!%p6594_p2), %s4977_s18, 4294967168  ;;  %p20_p3 = scmp.ge.s32.totalorder %s7052_s19, 4   ;;  %s8478_s13 = smov %s6959_s14 }
0x136f   : > { %s8479_s14 = smov %s6963_s15  ;;  %s8480_s15 = smov %s7063_s22 }
0x1370   : > { %s8481_s16 = smov %s7052_s19  ;;  %22 = sbr.rel (!%p20_p3) target bundleno = 3 (0x3), region = 102 }
0x1377   :  { %4982 = vsyncpa [#allocation3], 1 }
0x1378   :  { %4984 = vsyncpa [#allocation3 + $0x1], 1 }

</bundles_post_ra>
